<compile_context>
chip_gen: v7x
topology: tpu7x:2x2x1
jax: 0.10.0
libtpu: 0.0.40
codegen_flags: <defaults>
</compile_context>

<pallas_src>
import numpy as np
import jax
import jax.numpy as jnp
from jax import lax
from jax.experimental import pallas as pl
from jax.experimental.pallas import tpu as pltpu


# --------------------------------------------------------------------------
# Host-side weight preparation: block-Toeplitz expansion of a 3x3 kernel.
# --------------------------------------------------------------------------
def _toeplitz_weights(w_hwio, W):
    """Expand a (3, 3, Cin, Cout) HWIO kernel into 3 block-Toeplitz matrices.

    Returns (3, W*Cin, W*Cout) with
        T[dy, x*Cin + ci, w*Cout + co] = w[dy, x - w + 1, ci, co]
    (zero when x - w + 1 is outside [0, 3)).  For a row-packed activation row
    a[x*Cin + ci] = act[y, x, ci], the product a @ T[dy] accumulates the dy-th
    row of taps of a 'same' 3x3 convolution.  The x zero-padding taps are
    simply absent from T, so activation buffers only need y padding.
    """
    Cin, Cout = int(w_hwio.shape[2]), int(w_hwio.shape[3])
    ts = []
    for dy in range(3):
        band = jnp.zeros((W, W + 2, Cin, Cout), jnp.float32)
        rows = jnp.arange(W)[:, None]                 # output column w
        cols = rows + jnp.arange(3)[None, :]          # padded input column w+dx
        vals = jnp.broadcast_to(w_hwio[dy], (W, 3, Cin, Cout))
        band = band.at[rows, cols].set(vals)
        t = band[:, 1:W + 1]                          # crop to unpadded x range
        t = jnp.transpose(t, (1, 2, 0, 3)).reshape(W * Cin, W * Cout)
        ts.append(t)
    return jnp.stack(ts)                              # (3, W*Cin, W*Cout)


# --------------------------------------------------------------------------
# Fused ConvStack kernel: one grid step == B images
# --------------------------------------------------------------------------
def _make_kernel(B):
    def conv3(src_ref, t_ref, H):
        """3x3 'same' conv.  src_ref: (H+2, B, W*Cin) y-padded activation,
        t_ref: (3, W*Cin, W*Cout).  Returns (H*B, W*Cout), rows in (h, b) order."""
        K = src_ref.shape[-1]
        acc = None
        for dy in range(3):
            lhs = src_ref[dy:dy + H].reshape(H * B, K)
            part = jnp.dot(lhs, t_ref[dy], preferred_element_type=jnp.float32)
            acc = part if acc is None else acc + part
        return acc

    def pool_relu(acc, H, C):
        """2x2 stride-2 max-pool + ReLU of acc ((H*B, W*C), rows (h, b)),
        returning (H//2, B, (W//2)*C)."""
        L = acc.shape[-1]
        W2 = (L // C) // 2
        y = acc.reshape(H // 2, 2 * B, L)
        rm = jnp.maximum(y[:, :B, :], y[:, B:, :])        # row-pair max (VPU)
        parts = [jnp.maximum(rm[..., (2 * j) * C:(2 * j + 1) * C],
                             rm[..., (2 * j + 1) * C:(2 * j + 2) * C])
                 for j in range(W2)]                      # column-pair max
        return jnp.maximum(jnp.concatenate(parts, axis=-1), 0.0)

    def kernel(x_ref, t1a, t1b, t2a, t2b, t3a, t3b, o_ref, p2, p3, p4, p5, p6):
        # Only the y-border rows of the intermediate buffers must be zero; the
        # interiors are fully overwritten every step.  Zero just the borders,
        # every step (cheap: 10 tiny dense stores), which stays correct when the
        # parallel grid is split across TensorCores (no reliance on step 0).
        for p in (p2, p3, p4, p5, p6):
            zrow = jnp.zeros(p.shape[1:], jnp.float32)
            p[0] = zrow
            p[p.shape[0] - 1] = zrow

        # -- block 1: 16x16, 3 -> 16 -> 16, pool+relu -> 8x8x16 ---------------
        a = conv3(x_ref, t1a, 16)                  # (16B, 256)
        p2[1:17] = a.reshape(16, B, 256)
        a = conv3(p2, t1b, 16)                     # (16B, 256)
        p3[1:9] = pool_relu(a, 16, 16)             # (8, B, 128)

        # -- block 2: 8x8, 16 -> 32 -> 32, pool+relu -> 4x4x32 ----------------
        a = conv3(p3, t2a, 8)                      # (8B, 256)
        p4[1:9] = a.reshape(8, B, 256)
        a = conv3(p4, t2b, 8)                      # (8B, 256)
        p5[1:5] = pool_relu(a, 8, 32)              # (4, B, 128)

        # -- block 3: 4x4, 32 -> 64 -> 64, pool+relu -> 2x2x64 ----------------
        a = conv3(p5, t3a, 4)                      # (4B, 256)
        p6[1:5] = a.reshape(4, B, 256)
        a = conv3(p6, t3b, 4)                      # (4B, 256)
        o_ref[...] = pool_relu(a, 4, 64)           # (2, B, 128) lane-dense

    return kernel


# --------------------------------------------------------------------------
# Wrapper + deterministic parameter init
# --------------------------------------------------------------------------
def init_params(key):
    """Deterministic init; weights stored in HWIO = (3, 3, Cin, Cout)."""
    specs = [(3, 16), (16, 32), (32, 64)]
    params = []
    for cin, cout in specs:
        key, k1, k2 = jax.random.split(key, 3)
        b_in = 1.0 / np.sqrt(9 * cin)              # ~ PyTorch conv default bound
        b_rep = 1.0 / np.sqrt(9 * cout)
        w_in = jax.random.uniform(k1, (3, 3, cin, cout), jnp.float32, -b_in, b_in)
        w_rep = jax.random.uniform(k2, (3, 3, cout, cout), jnp.float32, -b_rep, b_rep)
        params.append((w_in, w_rep))
    return params


def conv_stack_forward(x_nchw, params, images_per_step=32):
    """PyTorch-compatible forward: NCHW in, NCHW out (rep=2 => conv_rep once)."""
    N, C, H, W = x_nchw.shape
    assert (C, H, W) == (3, 16, 16), "kernel is specialized to 3x16x16 inputs"

    # Images per grid step: a multiple of 8 (sublane tile), capped.  The batch
    # is zero-padded to a multiple of B; padded images are discarded at the end.
    B = min(images_per_step, ((N + 7) // 8) * 8)
    G = -(-N // B)
    Npad = G * B

    # Pack input into kernel layout (G, H+2, B, W*Cin): lanes = (x, channel),
    # zero rows as y padding (x padding is folded into the Toeplitz weights).
    x = jnp.transpose(x_nchw, (0, 2, 3, 1)).reshape(N, 16, 48)
    x = jnp.pad(x, ((0, Npad - N), (1, 1), (0, 0)))
    x = x.reshape(G, B, 18, 48).transpose(0, 2, 1, 3)        # (G, 18, B, 48)

    # Block-Toeplitz weights (3, W*Cin, W*Cout) per conv, built on the host.
    (w1a, w1b), (w2a, w2b), (w3a, w3b) = params
    ts = [_toeplitz_weights(w1a, 16), _toeplitz_weights(w1b, 16),
          _toeplitz_weights(w2a, 8), _toeplitz_weights(w2b, 8),
          _toeplitz_weights(w3a, 4), _toeplitz_weights(w3b, 4)]

    out = pl.pallas_call(
        _make_kernel(B),
        out_shape=jax.ShapeDtypeStruct((G, 2, B, 128), jnp.float32),
        grid=(G,),
        in_specs=[pl.BlockSpec((None, 18, B, 48), lambda i: (i, 0, 0, 0))]
                 + [pl.BlockSpec(t.shape, lambda i: (0, 0, 0)) for t in ts],
        out_specs=pl.BlockSpec((None, 2, B, 128), lambda i: (i, 0, 0, 0)),
        scratch_shapes=[
            pltpu.VMEM((18, B, 256), jnp.float32),   # block-1 conv1 out (y-padded)
            pltpu.VMEM((10, B, 128), jnp.float32),   # block-2 input     (y-padded)
            pltpu.VMEM((10, B, 256), jnp.float32),   # block-2 conv1 out
            pltpu.VMEM((6,  B, 128), jnp.float32),   # block-3 input
            pltpu.VMEM((6,  B, 256), jnp.float32),   # block-3 conv1 out
        ],
        compiler_params=pltpu.CompilerParams(
            dimension_semantics=("parallel",),
            vmem_limit_bytes=32 * 1024 * 1024),
    )(x, *ts)

    # (G, 2, B, 128) == (g, h2, b, (w2, c)) -> NCHW (N, 64, 2, 2)
    out = out.reshape(G, 2, B, 2, 64)
    out = jnp.transpose(out, (0, 2, 4, 1, 3)).reshape(Npad, 64, 2, 2)
    return out[:N]


# --------------------------------------------------------------------------
# Pure-JAX reference (for correctness check only)
# --------------------------------------------------------------------------
def conv_stack_ref(x_nchw, params):
    x = x_nchw
    for w_in, w_rep in params:
        for w in (w_in, w_rep):
            w_oihw = jnp.transpose(w, (3, 2, 0, 1))
            x = lax.conv_general_dilated(
                x, w_oihw, window_strides=(1, 1), padding=((1, 1), (1, 1)),
                dimension_numbers=("NCHW", "OIHW", "NCHW"))
        x = lax.reduce_window(x, jnp.array(-jnp.inf, x.dtype), lax.max,
                              window_dimensions=(1, 1, 2, 2),
                              window_strides=(1, 1, 2, 2), padding="VALID")
        x = jnp.maximum(x, 0.0)
    return x


if __name__ == "__main__":
    key = jax.random.PRNGKey(0)
    kx, kp = jax.random.split(key)

    # small shapes consistent with the module: NCHW, in_channels=3
    x = jax.random.normal(kx, (2, 3, 16, 16), jnp.float32)
    params = init_params(kp)

    out = jax.block_until_ready(conv_stack_forward(x, params))
    assert out.shape == (2, 64, 2, 2), out.shape

    ref = jax.block_until_ready(conv_stack_ref(x, params))
    np.testing.assert_allclose(np.asarray(out), np.asarray(ref), rtol=1e-4, atol=1e-4)

    print("KERNEL_OK")
</pallas_src>

<mosaic_0001>
module attributes {stable_mosaic.version = 11 : i64} {
  func.func @kernel(%arg0: i32, %arg1: memref<1x18x8x48xf32, #tpu.memory_space<vmem>>, %arg2: memref<3x48x256xf32, #tpu.memory_space<vmem>>, %arg3: memref<3x256x256xf32, #tpu.memory_space<vmem>>, %arg4: memref<3x128x256xf32, #tpu.memory_space<vmem>>, %arg5: memref<3x256x256xf32, #tpu.memory_space<vmem>>, %arg6: memref<3x128x256xf32, #tpu.memory_space<vmem>>, %arg7: memref<3x256x256xf32, #tpu.memory_space<vmem>>, %arg8: memref<1x2x8x128xf32, #tpu.memory_space<vmem>>, %arg9: memref<18x8x256xf32, #tpu.memory_space<vmem>>, %arg10: memref<10x8x128xf32, #tpu.memory_space<vmem>>, %arg11: memref<10x8x256xf32, #tpu.memory_space<vmem>>, %arg12: memref<6x8x128xf32, #tpu.memory_space<vmem>>, %arg13: memref<6x8x256xf32, #tpu.memory_space<vmem>>) attributes {dimension_semantics = [#tpu.dimension_semantics<parallel>], iteration_bounds = array<i64: 1>, scalar_prefetch = 0 : i64, scratch_operands = 5 : i64, tpu.core_type = #tpu.core_type<tc>, window_params = [{transform_indices = @transform_0, window_bounds = array<i64: 1, 18, 8, 48>}, {pipeline_mode = #tpu.pipeline_mode<synchronous>, transform_indices = @transform_1, window_bounds = array<i64: 3, 48, 256>}, {pipeline_mode = #tpu.pipeline_mode<synchronous>, transform_indices = @transform_2, window_bounds = array<i64: 3, 256, 256>}, {pipeline_mode = #tpu.pipeline_mode<synchronous>, transform_indices = @transform_3, window_bounds = array<i64: 3, 128, 256>}, {pipeline_mode = #tpu.pipeline_mode<synchronous>, transform_indices = @transform_4, window_bounds = array<i64: 3, 256, 256>}, {pipeline_mode = #tpu.pipeline_mode<synchronous>, transform_indices = @transform_5, window_bounds = array<i64: 3, 128, 256>}, {pipeline_mode = #tpu.pipeline_mode<synchronous>, transform_indices = @transform_6, window_bounds = array<i64: 3, 256, 256>}, {transform_indices = @transform_7, window_bounds = array<i64: 1, 2, 8, 128>}]} {
    %cst = arith.constant 0.000000e+00 : f32
    %0 = vector.broadcast %cst : f32 to vector<8x256xf32>
    %c0 = arith.constant 0 : index
    %c0_0 = arith.constant 0 : index
    %c0_1 = arith.constant 0 : index
    %1 = vector.load %arg9[%c0, %c0_0, %c0_1] : memref<18x8x256xf32, #tpu.memory_space<vmem>>, vector<1x8x256xf32>
    %2 = vector.shape_cast %1 : vector<1x8x256xf32> to vector<8x256xf32>
    %3 = vector.shape_cast %0 : vector<8x256xf32> to vector<1x8x256xf32>
    tpu.vector_store %arg9[%c0, %c0_0, %c0_1], %3 {strides = array<i32>} : memref<18x8x256xf32, #tpu.memory_space<vmem>>, vector<1x8x256xf32>,
    %c17 = arith.constant 17 : index
    %c0_2 = arith.constant 0 : index
    %c0_3 = arith.constant 0 : index
    %4 = vector.load %arg9[%c17, %c0_2, %c0_3] : memref<18x8x256xf32, #tpu.memory_space<vmem>>, vector<1x8x256xf32>
    %5 = vector.shape_cast %4 : vector<1x8x256xf32> to vector<8x256xf32>
    %6 = vector.shape_cast %0 : vector<8x256xf32> to vector<1x8x256xf32>
    tpu.vector_store %arg9[%c17, %c0_2, %c0_3], %6 {strides = array<i32>} : memref<18x8x256xf32, #tpu.memory_space<vmem>>, vector<1x8x256xf32>,
    %cst_4 = arith.constant 0.000000e+00 : f32
    %7 = vector.broadcast %cst_4 : f32 to vector<8x128xf32>
    %c0_5 = arith.constant 0 : index
    %c0_6 = arith.constant 0 : index
    %c0_7 = arith.constant 0 : index
    %8 = vector.load %arg10[%c0_5, %c0_6, %c0_7] : memref<10x8x128xf32, #tpu.memory_space<vmem>>, vector<1x8x128xf32>
    %9 = vector.shape_cast %8 : vector<1x8x128xf32> to vector<8x128xf32>
    %10 = vector.shape_cast %7 : vector<8x128xf32> to vector<1x8x128xf32>
    tpu.vector_store %arg10[%c0_5, %c0_6, %c0_7], %10 {strides = array<i32>} : memref<10x8x128xf32, #tpu.memory_space<vmem>>, vector<1x8x128xf32>,
    %c9 = arith.constant 9 : index
    %c0_8 = arith.constant 0 : index
    %c0_9 = arith.constant 0 : index
    %11 = vector.load %arg10[%c9, %c0_8, %c0_9] : memref<10x8x128xf32, #tpu.memory_space<vmem>>, vector<1x8x128xf32>
    %12 = vector.shape_cast %11 : vector<1x8x128xf32> to vector<8x128xf32>
    %13 = vector.shape_cast %7 : vector<8x128xf32> to vector<1x8x128xf32>
    tpu.vector_store %arg10[%c9, %c0_8, %c0_9], %13 {strides = array<i32>} : memref<10x8x128xf32, #tpu.memory_space<vmem>>, vector<1x8x128xf32>,
    %cst_10 = arith.constant 0.000000e+00 : f32
    %14 = vector.broadcast %cst_10 : f32 to vector<8x256xf32>
    %c0_11 = arith.constant 0 : index
    %c0_12 = arith.constant 0 : index
    %c0_13 = arith.constant 0 : index
    %15 = vector.load %arg11[%c0_11, %c0_12, %c0_13] : memref<10x8x256xf32, #tpu.memory_space<vmem>>, vector<1x8x256xf32>
    %16 = vector.shape_cast %15 : vector<1x8x256xf32> to vector<8x256xf32>
    %17 = vector.shape_cast %14 : vector<8x256xf32> to vector<1x8x256xf32>
    tpu.vector_store %arg11[%c0_11, %c0_12, %c0_13], %17 {strides = array<i32>} : memref<10x8x256xf32, #tpu.memory_space<vmem>>, vector<1x8x256xf32>,
    %c9_14 = arith.constant 9 : index
    %c0_15 = arith.constant 0 : index
    %c0_16 = arith.constant 0 : index
    %18 = vector.load %arg11[%c9_14, %c0_15, %c0_16] : memref<10x8x256xf32, #tpu.memory_space<vmem>>, vector<1x8x256xf32>
    %19 = vector.shape_cast %18 : vector<1x8x256xf32> to vector<8x256xf32>
    %20 = vector.shape_cast %14 : vector<8x256xf32> to vector<1x8x256xf32>
    tpu.vector_store %arg11[%c9_14, %c0_15, %c0_16], %20 {strides = array<i32>} : memref<10x8x256xf32, #tpu.memory_space<vmem>>, vector<1x8x256xf32>,
    %cst_17 = arith.constant 0.000000e+00 : f32
    %21 = vector.broadcast %cst_17 : f32 to vector<8x128xf32>
    %c0_18 = arith.constant 0 : index
    %c0_19 = arith.constant 0 : index
    %c0_20 = arith.constant 0 : index
    %22 = vector.load %arg12[%c0_18, %c0_19, %c0_20] : memref<6x8x128xf32, #tpu.memory_space<vmem>>, vector<1x8x128xf32>
    %23 = vector.shape_cast %22 : vector<1x8x128xf32> to vector<8x128xf32>
    %24 = vector.shape_cast %21 : vector<8x128xf32> to vector<1x8x128xf32>
    tpu.vector_store %arg12[%c0_18, %c0_19, %c0_20], %24 {strides = array<i32>} : memref<6x8x128xf32, #tpu.memory_space<vmem>>, vector<1x8x128xf32>,
    %c5 = arith.constant 5 : index
    %c0_21 = arith.constant 0 : index
    %c0_22 = arith.constant 0 : index
    %25 = vector.load %arg12[%c5, %c0_21, %c0_22] : memref<6x8x128xf32, #tpu.memory_space<vmem>>, vector<1x8x128xf32>
    %26 = vector.shape_cast %25 : vector<1x8x128xf32> to vector<8x128xf32>
    %27 = vector.shape_cast %21 : vector<8x128xf32> to vector<1x8x128xf32>
    tpu.vector_store %arg12[%c5, %c0_21, %c0_22], %27 {strides = array<i32>} : memref<6x8x128xf32, #tpu.memory_space<vmem>>, vector<1x8x128xf32>,
    %cst_23 = arith.constant 0.000000e+00 : f32
    %28 = vector.broadcast %cst_23 : f32 to vector<8x256xf32>
    %c0_24 = arith.constant 0 : index
    %c0_25 = arith.constant 0 : index
    %c0_26 = arith.constant 0 : index
    %29 = vector.load %arg13[%c0_24, %c0_25, %c0_26] : memref<6x8x256xf32, #tpu.memory_space<vmem>>, vector<1x8x256xf32>
    %30 = vector.shape_cast %29 : vector<1x8x256xf32> to vector<8x256xf32>
    %31 = vector.shape_cast %28 : vector<8x256xf32> to vector<1x8x256xf32>
    tpu.vector_store %arg13[%c0_24, %c0_25, %c0_26], %31 {strides = array<i32>} : memref<6x8x256xf32, #tpu.memory_space<vmem>>, vector<1x8x256xf32>,
    %c5_27 = arith.constant 5 : index
    %c0_28 = arith.constant 0 : index
    %c0_29 = arith.constant 0 : index
    %32 = vector.load %arg13[%c5_27, %c0_28, %c0_29] : memref<6x8x256xf32, #tpu.memory_space<vmem>>, vector<1x8x256xf32>
    %33 = vector.shape_cast %32 : vector<1x8x256xf32> to vector<8x256xf32>
    %34 = vector.shape_cast %28 : vector<8x256xf32> to vector<1x8x256xf32>
    tpu.vector_store %arg13[%c5_27, %c0_28, %c0_29], %34 {strides = array<i32>} : memref<6x8x256xf32, #tpu.memory_space<vmem>>, vector<1x8x256xf32>,
    %c0_30 = arith.constant 0 : index
    %c0_31 = arith.constant 0 : index
    %c0_32 = arith.constant 0 : index
    %c0_33 = arith.constant 0 : index
    %35 = vector.load %arg1[%c0_30, %c0_31, %c0_32, %c0_33] : memref<1x18x8x48xf32, #tpu.memory_space<vmem>>, vector<1x16x8x48xf32>
    %36 = vector.shape_cast %35 : vector<1x16x8x48xf32> to vector<16x8x48xf32>
    %37 = vector.shape_cast %36 : vector<16x8x48xf32> to vector<128x48xf32>
    %c0_34 = arith.constant 0 : index
    %c0_35 = arith.constant 0 : index
    %c0_36 = arith.constant 0 : index
    %38 = vector.load %arg2[%c0_34, %c0_35, %c0_36] : memref<3x48x256xf32, #tpu.memory_space<vmem>>, vector<1x48x256xf32>
    %39 = vector.shape_cast %38 : vector<1x48x256xf32> to vector<48x256xf32>
    %cst_37 = arith.constant dense<0.000000e+00> : vector<128x256xf32>
    %40 = tpu.matmul %37, %39, %cst_37 {dimension_numbers = #tpu.dot_dimension_numbers<[1], [0], [0], [1], [0, 0, 1, 1], [], []>} : vector<128x48xf32>, vector<48x256xf32>, vector<128x256xf32> -> vector<128x256xf32>
    %c0_38 = arith.constant 0 : index
    %c1 = arith.constant 1 : index
    %c0_39 = arith.constant 0 : index
    %c0_40 = arith.constant 0 : index
    %41 = vector.load %arg1[%c0_38, %c1, %c0_39, %c0_40] : memref<1x18x8x48xf32, #tpu.memory_space<vmem>>, vector<1x16x8x48xf32>
    %42 = vector.shape_cast %41 : vector<1x16x8x48xf32> to vector<16x8x48xf32>
    %43 = vector.shape_cast %42 : vector<16x8x48xf32> to vector<128x48xf32>
    %c1_41 = arith.constant 1 : index
    %c0_42 = arith.constant 0 : index
    %c0_43 = arith.constant 0 : index
    %44 = vector.load %arg2[%c1_41, %c0_42, %c0_43] : memref<3x48x256xf32, #tpu.memory_space<vmem>>, vector<1x48x256xf32>
    %45 = vector.shape_cast %44 : vector<1x48x256xf32> to vector<48x256xf32>
    %cst_44 = arith.constant dense<0.000000e+00> : vector<128x256xf32>
    %46 = tpu.matmul %43, %45, %cst_44 {dimension_numbers = #tpu.dot_dimension_numbers<[1], [0], [0], [1], [0, 0, 1, 1], [], []>} : vector<128x48xf32>, vector<48x256xf32>, vector<128x256xf32> -> vector<128x256xf32>
    %47 = arith.addf %40, %46 : vector<128x256xf32>
    %c0_45 = arith.constant 0 : index
    %c2 = arith.constant 2 : index
    %c0_46 = arith.constant 0 : index
    %c0_47 = arith.constant 0 : index
    %48 = vector.load %arg1[%c0_45, %c2, %c0_46, %c0_47] : memref<1x18x8x48xf32, #tpu.memory_space<vmem>>, vector<1x16x8x48xf32>
    %49 = vector.shape_cast %48 : vector<1x16x8x48xf32> to vector<16x8x48xf32>
    %50 = vector.shape_cast %49 : vector<16x8x48xf32> to vector<128x48xf32>
    %c2_48 = arith.constant 2 : index
    %c0_49 = arith.constant 0 : index
    %c0_50 = arith.constant 0 : index
    %51 = vector.load %arg2[%c2_48, %c0_49, %c0_50] : memref<3x48x256xf32, #tpu.memory_space<vmem>>, vector<1x48x256xf32>
    %52 = vector.shape_cast %51 : vector<1x48x256xf32> to vector<48x256xf32>
    %cst_51 = arith.constant dense<0.000000e+00> : vector<128x256xf32>
    %53 = tpu.matmul %50, %52, %cst_51 {dimension_numbers = #tpu.dot_dimension_numbers<[1], [0], [0], [1], [0, 0, 1, 1], [], []>} : vector<128x48xf32>, vector<48x256xf32>, vector<128x256xf32> -> vector<128x256xf32>
    %54 = arith.addf %47, %53 : vector<128x256xf32>
    %55 = vector.shape_cast %54 : vector<128x256xf32> to vector<16x8x256xf32>
    %c1_52 = arith.constant 1 : index
    %c0_53 = arith.constant 0 : index
    %c0_54 = arith.constant 0 : index
    %56 = vector.load %arg9[%c1_52, %c0_53, %c0_54] : memref<18x8x256xf32, #tpu.memory_space<vmem>>, vector<16x8x256xf32>
    tpu.vector_store %arg9[%c1_52, %c0_53, %c0_54], %55 {strides = array<i32>} : memref<18x8x256xf32, #tpu.memory_space<vmem>>, vector<16x8x256xf32>,
    %c0_55 = arith.constant 0 : index
    %c0_56 = arith.constant 0 : index
    %c0_57 = arith.constant 0 : index
    %57 = vector.load %arg9[%c0_55, %c0_56, %c0_57] : memref<18x8x256xf32, #tpu.memory_space<vmem>>, vector<16x8x256xf32>
    %58 = vector.shape_cast %57 : vector<16x8x256xf32> to vector<128x256xf32>
    %c0_58 = arith.constant 0 : index
    %c0_59 = arith.constant 0 : index
    %c0_60 = arith.constant 0 : index
    %59 = vector.load %arg3[%c0_58, %c0_59, %c0_60] : memref<3x256x256xf32, #tpu.memory_space<vmem>>, vector<1x256x256xf32>
    %60 = vector.shape_cast %59 : vector<1x256x256xf32> to vector<256x256xf32>
    %cst_61 = arith.constant dense<0.000000e+00> : vector<128x256xf32>
    %61 = tpu.matmul %58, %60, %cst_61 {dimension_numbers = #tpu.dot_dimension_numbers<[1], [0], [0], [1], [0, 0, 1, 1], [], []>} : vector<128x256xf32>, vector<256x256xf32>, vector<128x256xf32> -> vector<128x256xf32>
    %c1_62 = arith.constant 1 : index
    %c0_63 = arith.constant 0 : index
    %c0_64 = arith.constant 0 : index
    %62 = vector.load %arg9[%c1_62, %c0_63, %c0_64] : memref<18x8x256xf32, #tpu.memory_space<vmem>>, vector<16x8x256xf32>
    %63 = vector.shape_cast %62 : vector<16x8x256xf32> to vector<128x256xf32>
    %c1_65 = arith.constant 1 : index
    %c0_66 = arith.constant 0 : index
    %c0_67 = arith.constant 0 : index
    %64 = vector.load %arg3[%c1_65, %c0_66, %c0_67] : memref<3x256x256xf32, #tpu.memory_space<vmem>>, vector<1x256x256xf32>
    %65 = vector.shape_cast %64 : vector<1x256x256xf32> to vector<256x256xf32>
    %cst_68 = arith.constant dense<0.000000e+00> : vector<128x256xf32>
    %66 = tpu.matmul %63, %65, %cst_68 {dimension_numbers = #tpu.dot_dimension_numbers<[1], [0], [0], [1], [0, 0, 1, 1], [], []>} : vector<128x256xf32>, vector<256x256xf32>, vector<128x256xf32> -> vector<128x256xf32>
    %67 = arith.addf %61, %66 : vector<128x256xf32>
    %c2_69 = arith.constant 2 : index
    %c0_70 = arith.constant 0 : index
    %c0_71 = arith.constant 0 : index
    %68 = vector.load %arg9[%c2_69, %c0_70, %c0_71] : memref<18x8x256xf32, #tpu.memory_space<vmem>>, vector<16x8x256xf32>
    %69 = vector.shape_cast %68 : vector<16x8x256xf32> to vector<128x256xf32>
    %c2_72 = arith.constant 2 : index
    %c0_73 = arith.constant 0 : index
    %c0_74 = arith.constant 0 : index
    %70 = vector.load %arg3[%c2_72, %c0_73, %c0_74] : memref<3x256x256xf32, #tpu.memory_space<vmem>>, vector<1x256x256xf32>
    %71 = vector.shape_cast %70 : vector<1x256x256xf32> to vector<256x256xf32>
    %cst_75 = arith.constant dense<0.000000e+00> : vector<128x256xf32>
    %72 = tpu.matmul %69, %71, %cst_75 {dimension_numbers = #tpu.dot_dimension_numbers<[1], [0], [0], [1], [0, 0, 1, 1], [], []>} : vector<128x256xf32>, vector<256x256xf32>, vector<128x256xf32> -> vector<128x256xf32>
    %73 = arith.addf %67, %72 : vector<128x256xf32>
    %74 = vector.shape_cast %73 : vector<128x256xf32> to vector<8x16x256xf32>
    %75 = vector.extract_strided_slice %74 {offsets = [0, 0, 0], sizes = [8, 8, 256], strides = [1, 1, 1]} : vector<8x16x256xf32> to vector<8x8x256xf32>
    %76 = vector.extract_strided_slice %74 {offsets = [0, 8, 0], sizes = [8, 8, 256], strides = [1, 1, 1]} : vector<8x16x256xf32> to vector<8x8x256xf32>
    %77 = arith.maximumf %75, %76 : vector<8x8x256xf32>
    %78 = vector.extract_strided_slice %77 {offsets = [0, 0, 0], sizes = [8, 8, 16], strides = [1, 1, 1]} : vector<8x8x256xf32> to vector<8x8x16xf32>
    %79 = vector.extract_strided_slice %77 {offsets = [0, 0, 16], sizes = [8, 8, 16], strides = [1, 1, 1]} : vector<8x8x256xf32> to vector<8x8x16xf32>
    %80 = arith.maximumf %78, %79 : vector<8x8x16xf32>
    %81 = vector.extract_strided_slice %77 {offsets = [0, 0, 32], sizes = [8, 8, 16], strides = [1, 1, 1]} : vector<8x8x256xf32> to vector<8x8x16xf32>
    %82 = vector.extract_strided_slice %77 {offsets = [0, 0, 48], sizes = [8, 8, 16], strides = [1, 1, 1]} : vector<8x8x256xf32> to vector<8x8x16xf32>
    %83 = arith.maximumf %81, %82 : vector<8x8x16xf32>
    %84 = vector.extract_strided_slice %77 {offsets = [0, 0, 64], sizes = [8, 8, 16], strides = [1, 1, 1]} : vector<8x8x256xf32> to vector<8x8x16xf32>
    %85 = vector.extract_strided_slice %77 {offsets = [0, 0, 80], sizes = [8, 8, 16], strides = [1, 1, 1]} : vector<8x8x256xf32> to vector<8x8x16xf32>
    %86 = arith.maximumf %84, %85 : vector<8x8x16xf32>
    %87 = vector.extract_strided_slice %77 {offsets = [0, 0, 96], sizes = [8, 8, 16], strides = [1, 1, 1]} : vector<8x8x256xf32> to vector<8x8x16xf32>
    %88 = vector.extract_strided_slice %77 {offsets = [0, 0, 112], sizes = [8, 8, 16], strides = [1, 1, 1]} : vector<8x8x256xf32> to vector<8x8x16xf32>
    %89 = arith.maximumf %87, %88 : vector<8x8x16xf32>
    %90 = vector.extract_strided_slice %77 {offsets = [0, 0, 128], sizes = [8, 8, 16], strides = [1, 1, 1]} : vector<8x8x256xf32> to vector<8x8x16xf32>
    %91 = vector.extract_strided_slice %77 {offsets = [0, 0, 144], sizes = [8, 8, 16], strides = [1, 1, 1]} : vector<8x8x256xf32> to vector<8x8x16xf32>
    %92 = arith.maximumf %90, %91 : vector<8x8x16xf32>
    %93 = vector.extract_strided_slice %77 {offsets = [0, 0, 160], sizes = [8, 8, 16], strides = [1, 1, 1]} : vector<8x8x256xf32> to vector<8x8x16xf32>
    %94 = vector.extract_strided_slice %77 {offsets = [0, 0, 176], sizes = [8, 8, 16], strides = [1, 1, 1]} : vector<8x8x256xf32> to vector<8x8x16xf32>
    %95 = arith.maximumf %93, %94 : vector<8x8x16xf32>
    %96 = vector.extract_strided_slice %77 {offsets = [0, 0, 192], sizes = [8, 8, 16], strides = [1, 1, 1]} : vector<8x8x256xf32> to vector<8x8x16xf32>
    %97 = vector.extract_strided_slice %77 {offsets = [0, 0, 208], sizes = [8, 8, 16], strides = [1, 1, 1]} : vector<8x8x256xf32> to vector<8x8x16xf32>
    %98 = arith.maximumf %96, %97 : vector<8x8x16xf32>
    %99 = vector.extract_strided_slice %77 {offsets = [0, 0, 224], sizes = [8, 8, 16], strides = [1, 1, 1]} : vector<8x8x256xf32> to vector<8x8x16xf32>
    %100 = vector.extract_strided_slice %77 {offsets = [0, 0, 240], sizes = [8, 8, 16], strides = [1, 1, 1]} : vector<8x8x256xf32> to vector<8x8x16xf32>
    %101 = arith.maximumf %99, %100 : vector<8x8x16xf32>
    %102 = tpu.concatenate %80, %83, %86, %89, %92, %95, %98, %101 in 2 : vector<8x8x16xf32>, vector<8x8x16xf32>, vector<8x8x16xf32>, vector<8x8x16xf32>, vector<8x8x16xf32>, vector<8x8x16xf32>, vector<8x8x16xf32>, vector<8x8x16xf32> -> vector<8x8x128xf32>
    %cst_76 = arith.constant 0.000000e+00 : f32
    %103 = vector.broadcast %cst_76 : f32 to vector<8x8x128xf32>
    %104 = arith.maximumf %102, %103 : vector<8x8x128xf32>
    %c1_77 = arith.constant 1 : index
    %c0_78 = arith.constant 0 : index
    %c0_79 = arith.constant 0 : index
    %105 = vector.load %arg10[%c1_77, %c0_78, %c0_79] : memref<10x8x128xf32, #tpu.memory_space<vmem>>, vector<8x8x128xf32>
    tpu.vector_store %arg10[%c1_77, %c0_78, %c0_79], %104 {strides = array<i32>} : memref<10x8x128xf32, #tpu.memory_space<vmem>>, vector<8x8x128xf32>,
    %c0_80 = arith.constant 0 : index
    %c0_81 = arith.constant 0 : index
    %c0_82 = arith.constant 0 : index
    %106 = vector.load %arg10[%c0_80, %c0_81, %c0_82] : memref<10x8x128xf32, #tpu.memory_space<vmem>>, vector<8x8x128xf32>
    %107 = vector.shape_cast %106 : vector<8x8x128xf32> to vector<64x128xf32>
    %c0_83 = arith.constant 0 : index
    %c0_84 = arith.constant 0 : index
    %c0_85 = arith.constant 0 : index
    %108 = vector.load %arg4[%c0_83, %c0_84, %c0_85] : memref<3x128x256xf32, #tpu.memory_space<vmem>>, vector<1x128x256xf32>
    %109 = vector.shape_cast %108 : vector<1x128x256xf32> to vector<128x256xf32>
    %cst_86 = arith.constant dense<0.000000e+00> : vector<64x256xf32>
    %110 = tpu.matmul %107, %109, %cst_86 {dimension_numbers = #tpu.dot_dimension_numbers<[1], [0], [0], [1], [0, 0, 1, 1], [], []>} : vector<64x128xf32>, vector<128x256xf32>, vector<64x256xf32> -> vector<64x256xf32>
    %c1_87 = arith.constant 1 : index
    %c0_88 = arith.constant 0 : index
    %c0_89 = arith.constant 0 : index
    %111 = vector.load %arg10[%c1_87, %c0_88, %c0_89] : memref<10x8x128xf32, #tpu.memory_space<vmem>>, vector<8x8x128xf32>
    %112 = vector.shape_cast %111 : vector<8x8x128xf32> to vector<64x128xf32>
    %c1_90 = arith.constant 1 : index
    %c0_91 = arith.constant 0 : index
    %c0_92 = arith.constant 0 : index
    %113 = vector.load %arg4[%c1_90, %c0_91, %c0_92] : memref<3x128x256xf32, #tpu.memory_space<vmem>>, vector<1x128x256xf32>
    %114 = vector.shape_cast %113 : vector<1x128x256xf32> to vector<128x256xf32>
    %cst_93 = arith.constant dense<0.000000e+00> : vector<64x256xf32>
    %115 = tpu.matmul %112, %114, %cst_93 {dimension_numbers = #tpu.dot_dimension_numbers<[1], [0], [0], [1], [0, 0, 1, 1], [], []>} : vector<64x128xf32>, vector<128x256xf32>, vector<64x256xf32> -> vector<64x256xf32>
    %116 = arith.addf %110, %115 : vector<64x256xf32>
    %c2_94 = arith.constant 2 : index
    %c0_95 = arith.constant 0 : index
    %c0_96 = arith.constant 0 : index
    %117 = vector.load %arg10[%c2_94, %c0_95, %c0_96] : memref<10x8x128xf32, #tpu.memory_space<vmem>>, vector<8x8x128xf32>
    %118 = vector.shape_cast %117 : vector<8x8x128xf32> to vector<64x128xf32>
    %c2_97 = arith.constant 2 : index
    %c0_98 = arith.constant 0 : index
    %c0_99 = arith.constant 0 : index
    %119 = vector.load %arg4[%c2_97, %c0_98, %c0_99] : memref<3x128x256xf32, #tpu.memory_space<vmem>>, vector<1x128x256xf32>
    %120 = vector.shape_cast %119 : vector<1x128x256xf32> to vector<128x256xf32>
    %cst_100 = arith.constant dense<0.000000e+00> : vector<64x256xf32>
    %121 = tpu.matmul %118, %120, %cst_100 {dimension_numbers = #tpu.dot_dimension_numbers<[1], [0], [0], [1], [0, 0, 1, 1], [], []>} : vector<64x128xf32>, vector<128x256xf32>, vector<64x256xf32> -> vector<64x256xf32>
    %122 = arith.addf %116, %121 : vector<64x256xf32>
    %123 = vector.shape_cast %122 : vector<64x256xf32> to vector<8x8x256xf32>
    %c1_101 = arith.constant 1 : index
    %c0_102 = arith.constant 0 : index
    %c0_103 = arith.constant 0 : index
    %124 = vector.load %arg11[%c1_101, %c0_102, %c0_103] : memref<10x8x256xf32, #tpu.memory_space<vmem>>, vector<8x8x256xf32>
    tpu.vector_store %arg11[%c1_101, %c0_102, %c0_103], %123 {strides = array<i32>} : memref<10x8x256xf32, #tpu.memory_space<vmem>>, vector<8x8x256xf32>,
    %c0_104 = arith.constant 0 : index
    %c0_105 = arith.constant 0 : index
    %c0_106 = arith.constant 0 : index
    %125 = vector.load %arg11[%c0_104, %c0_105, %c0_106] : memref<10x8x256xf32, #tpu.memory_space<vmem>>, vector<8x8x256xf32>
    %126 = vector.shape_cast %125 : vector<8x8x256xf32> to vector<64x256xf32>
    %c0_107 = arith.constant 0 : index
    %c0_108 = arith.constant 0 : index
    %c0_109 = arith.constant 0 : index
    %127 = vector.load %arg5[%c0_107, %c0_108, %c0_109] : memref<3x256x256xf32, #tpu.memory_space<vmem>>, vector<1x256x256xf32>
    %128 = vector.shape_cast %127 : vector<1x256x256xf32> to vector<256x256xf32>
    %cst_110 = arith.constant dense<0.000000e+00> : vector<64x256xf32>
    %129 = tpu.matmul %126, %128, %cst_110 {dimension_numbers = #tpu.dot_dimension_numbers<[1], [0], [0], [1], [0, 0, 1, 1], [], []>} : vector<64x256xf32>, vector<256x256xf32>, vector<64x256xf32> -> vector<64x256xf32>
    %c1_111 = arith.constant 1 : index
    %c0_112 = arith.constant 0 : index
    %c0_113 = arith.constant 0 : index
    %130 = vector.load %arg11[%c1_111, %c0_112, %c0_113] : memref<10x8x256xf32, #tpu.memory_space<vmem>>, vector<8x8x256xf32>
    %131 = vector.shape_cast %130 : vector<8x8x256xf32> to vector<64x256xf32>
    %c1_114 = arith.constant 1 : index
    %c0_115 = arith.constant 0 : index
    %c0_116 = arith.constant 0 : index
    %132 = vector.load %arg5[%c1_114, %c0_115, %c0_116] : memref<3x256x256xf32, #tpu.memory_space<vmem>>, vector<1x256x256xf32>
    %133 = vector.shape_cast %132 : vector<1x256x256xf32> to vector<256x256xf32>
    %cst_117 = arith.constant dense<0.000000e+00> : vector<64x256xf32>
    %134 = tpu.matmul %131, %133, %cst_117 {dimension_numbers = #tpu.dot_dimension_numbers<[1], [0], [0], [1], [0, 0, 1, 1], [], []>} : vector<64x256xf32>, vector<256x256xf32>, vector<64x256xf32> -> vector<64x256xf32>
    %135 = arith.addf %129, %134 : vector<64x256xf32>
    %c2_118 = arith.constant 2 : index
    %c0_119 = arith.constant 0 : index
    %c0_120 = arith.constant 0 : index
    %136 = vector.load %arg11[%c2_118, %c0_119, %c0_120] : memref<10x8x256xf32, #tpu.memory_space<vmem>>, vector<8x8x256xf32>
    %137 = vector.shape_cast %136 : vector<8x8x256xf32> to vector<64x256xf32>
    %c2_121 = arith.constant 2 : index
    %c0_122 = arith.constant 0 : index
    %c0_123 = arith.constant 0 : index
    %138 = vector.load %arg5[%c2_121, %c0_122, %c0_123] : memref<3x256x256xf32, #tpu.memory_space<vmem>>, vector<1x256x256xf32>
    %139 = vector.shape_cast %138 : vector<1x256x256xf32> to vector<256x256xf32>
    %cst_124 = arith.constant dense<0.000000e+00> : vector<64x256xf32>
    %140 = tpu.matmul %137, %139, %cst_124 {dimension_numbers = #tpu.dot_dimension_numbers<[1], [0], [0], [1], [0, 0, 1, 1], [], []>} : vector<64x256xf32>, vector<256x256xf32>, vector<64x256xf32> -> vector<64x256xf32>
    %141 = arith.addf %135, %140 : vector<64x256xf32>
    %142 = vector.shape_cast %141 : vector<64x256xf32> to vector<4x16x256xf32>
    %143 = vector.extract_strided_slice %142 {offsets = [0, 0, 0], sizes = [4, 8, 256], strides = [1, 1, 1]} : vector<4x16x256xf32> to vector<4x8x256xf32>
    %144 = vector.extract_strided_slice %142 {offsets = [0, 8, 0], sizes = [4, 8, 256], strides = [1, 1, 1]} : vector<4x16x256xf32> to vector<4x8x256xf32>
    %145 = arith.maximumf %143, %144 : vector<4x8x256xf32>
    %146 = vector.extract_strided_slice %145 {offsets = [0, 0, 0], sizes = [4, 8, 32], strides = [1, 1, 1]} : vector<4x8x256xf32> to vector<4x8x32xf32>
    %147 = vector.extract_strided_slice %145 {offsets = [0, 0, 32], sizes = [4, 8, 32], strides = [1, 1, 1]} : vector<4x8x256xf32> to vector<4x8x32xf32>
    %148 = arith.maximumf %146, %147 : vector<4x8x32xf32>
    %149 = vector.extract_strided_slice %145 {offsets = [0, 0, 64], sizes = [4, 8, 32], strides = [1, 1, 1]} : vector<4x8x256xf32> to vector<4x8x32xf32>
    %150 = vector.extract_strided_slice %145 {offsets = [0, 0, 96], sizes = [4, 8, 32], strides = [1, 1, 1]} : vector<4x8x256xf32> to vector<4x8x32xf32>
    %151 = arith.maximumf %149, %150 : vector<4x8x32xf32>
    %152 = vector.extract_strided_slice %145 {offsets = [0, 0, 128], sizes = [4, 8, 32], strides = [1, 1, 1]} : vector<4x8x256xf32> to vector<4x8x32xf32>
    %153 = vector.extract_strided_slice %145 {offsets = [0, 0, 160], sizes = [4, 8, 32], strides = [1, 1, 1]} : vector<4x8x256xf32> to vector<4x8x32xf32>
    %154 = arith.maximumf %152, %153 : vector<4x8x32xf32>
    %155 = vector.extract_strided_slice %145 {offsets = [0, 0, 192], sizes = [4, 8, 32], strides = [1, 1, 1]} : vector<4x8x256xf32> to vector<4x8x32xf32>
    %156 = vector.extract_strided_slice %145 {offsets = [0, 0, 224], sizes = [4, 8, 32], strides = [1, 1, 1]} : vector<4x8x256xf32> to vector<4x8x32xf32>
    %157 = arith.maximumf %155, %156 : vector<4x8x32xf32>
    %158 = tpu.concatenate %148, %151, %154, %157 in 2 : vector<4x8x32xf32>, vector<4x8x32xf32>, vector<4x8x32xf32>, vector<4x8x32xf32> -> vector<4x8x128xf32>
    %cst_125 = arith.constant 0.000000e+00 : f32
    %159 = vector.broadcast %cst_125 : f32 to vector<4x8x128xf32>
    %160 = arith.maximumf %158, %159 : vector<4x8x128xf32>
    %c1_126 = arith.constant 1 : index
    %c0_127 = arith.constant 0 : index
    %c0_128 = arith.constant 0 : index
    %161 = vector.load %arg12[%c1_126, %c0_127, %c0_128] : memref<6x8x128xf32, #tpu.memory_space<vmem>>, vector<4x8x128xf32>
    tpu.vector_store %arg12[%c1_126, %c0_127, %c0_128], %160 {strides = array<i32>} : memref<6x8x128xf32, #tpu.memory_space<vmem>>, vector<4x8x128xf32>,
    %c0_129 = arith.constant 0 : index
    %c0_130 = arith.constant 0 : index
    %c0_131 = arith.constant 0 : index
    %162 = vector.load %arg12[%c0_129, %c0_130, %c0_131] : memref<6x8x128xf32, #tpu.memory_space<vmem>>, vector<4x8x128xf32>
    %163 = vector.shape_cast %162 : vector<4x8x128xf32> to vector<32x128xf32>
    %c0_132 = arith.constant 0 : index
    %c0_133 = arith.constant 0 : index
    %c0_134 = arith.constant 0 : index
    %164 = vector.load %arg6[%c0_132, %c0_133, %c0_134] : memref<3x128x256xf32, #tpu.memory_space<vmem>>, vector<1x128x256xf32>
    %165 = vector.shape_cast %164 : vector<1x128x256xf32> to vector<128x256xf32>
    %cst_135 = arith.constant dense<0.000000e+00> : vector<32x256xf32>
    %166 = tpu.matmul %163, %165, %cst_135 {dimension_numbers = #tpu.dot_dimension_numbers<[1], [0], [0], [1], [0, 0, 1, 1], [], []>} : vector<32x128xf32>, vector<128x256xf32>, vector<32x256xf32> -> vector<32x256xf32>
    %c1_136 = arith.constant 1 : index
    %c0_137 = arith.constant 0 : index
    %c0_138 = arith.constant 0 : index
    %167 = vector.load %arg12[%c1_136, %c0_137, %c0_138] : memref<6x8x128xf32, #tpu.memory_space<vmem>>, vector<4x8x128xf32>
    %168 = vector.shape_cast %167 : vector<4x8x128xf32> to vector<32x128xf32>
    %c1_139 = arith.constant 1 : index
    %c0_140 = arith.constant 0 : index
    %c0_141 = arith.constant 0 : index
    %169 = vector.load %arg6[%c1_139, %c0_140, %c0_141] : memref<3x128x256xf32, #tpu.memory_space<vmem>>, vector<1x128x256xf32>
    %170 = vector.shape_cast %169 : vector<1x128x256xf32> to vector<128x256xf32>
    %cst_142 = arith.constant dense<0.000000e+00> : vector<32x256xf32>
    %171 = tpu.matmul %168, %170, %cst_142 {dimension_numbers = #tpu.dot_dimension_numbers<[1], [0], [0], [1], [0, 0, 1, 1], [], []>} : vector<32x128xf32>, vector<128x256xf32>, vector<32x256xf32> -> vector<32x256xf32>
    %172 = arith.addf %166, %171 : vector<32x256xf32>
    %c2_143 = arith.constant 2 : index
    %c0_144 = arith.constant 0 : index
    %c0_145 = arith.constant 0 : index
    %173 = vector.load %arg12[%c2_143, %c0_144, %c0_145] : memref<6x8x128xf32, #tpu.memory_space<vmem>>, vector<4x8x128xf32>
    %174 = vector.shape_cast %173 : vector<4x8x128xf32> to vector<32x128xf32>
    %c2_146 = arith.constant 2 : index
    %c0_147 = arith.constant 0 : index
    %c0_148 = arith.constant 0 : index
    %175 = vector.load %arg6[%c2_146, %c0_147, %c0_148] : memref<3x128x256xf32, #tpu.memory_space<vmem>>, vector<1x128x256xf32>
    %176 = vector.shape_cast %175 : vector<1x128x256xf32> to vector<128x256xf32>
    %cst_149 = arith.constant dense<0.000000e+00> : vector<32x256xf32>
    %177 = tpu.matmul %174, %176, %cst_149 {dimension_numbers = #tpu.dot_dimension_numbers<[1], [0], [0], [1], [0, 0, 1, 1], [], []>} : vector<32x128xf32>, vector<128x256xf32>, vector<32x256xf32> -> vector<32x256xf32>
    %178 = arith.addf %172, %177 : vector<32x256xf32>
    %179 = vector.shape_cast %178 : vector<32x256xf32> to vector<4x8x256xf32>
    %c1_150 = arith.constant 1 : index
    %c0_151 = arith.constant 0 : index
    %c0_152 = arith.constant 0 : index
    %180 = vector.load %arg13[%c1_150, %c0_151, %c0_152] : memref<6x8x256xf32, #tpu.memory_space<vmem>>, vector<4x8x256xf32>
    tpu.vector_store %arg13[%c1_150, %c0_151, %c0_152], %179 {strides = array<i32>} : memref<6x8x256xf32, #tpu.memory_space<vmem>>, vector<4x8x256xf32>,
    %c0_153 = arith.constant 0 : index
    %c0_154 = arith.constant 0 : index
    %c0_155 = arith.constant 0 : index
    %181 = vector.load %arg13[%c0_153, %c0_154, %c0_155] : memref<6x8x256xf32, #tpu.memory_space<vmem>>, vector<4x8x256xf32>
    %182 = vector.shape_cast %181 : vector<4x8x256xf32> to vector<32x256xf32>
    %c0_156 = arith.constant 0 : index
    %c0_157 = arith.constant 0 : index
    %c0_158 = arith.constant 0 : index
    %183 = vector.load %arg7[%c0_156, %c0_157, %c0_158] : memref<3x256x256xf32, #tpu.memory_space<vmem>>, vector<1x256x256xf32>
    %184 = vector.shape_cast %183 : vector<1x256x256xf32> to vector<256x256xf32>
    %cst_159 = arith.constant dense<0.000000e+00> : vector<32x256xf32>
    %185 = tpu.matmul %182, %184, %cst_159 {dimension_numbers = #tpu.dot_dimension_numbers<[1], [0], [0], [1], [0, 0, 1, 1], [], []>} : vector<32x256xf32>, vector<256x256xf32>, vector<32x256xf32> -> vector<32x256xf32>
    %c1_160 = arith.constant 1 : index
    %c0_161 = arith.constant 0 : index
    %c0_162 = arith.constant 0 : index
    %186 = vector.load %arg13[%c1_160, %c0_161, %c0_162] : memref<6x8x256xf32, #tpu.memory_space<vmem>>, vector<4x8x256xf32>
    %187 = vector.shape_cast %186 : vector<4x8x256xf32> to vector<32x256xf32>
    %c1_163 = arith.constant 1 : index
    %c0_164 = arith.constant 0 : index
    %c0_165 = arith.constant 0 : index
    %188 = vector.load %arg7[%c1_163, %c0_164, %c0_165] : memref<3x256x256xf32, #tpu.memory_space<vmem>>, vector<1x256x256xf32>
    %189 = vector.shape_cast %188 : vector<1x256x256xf32> to vector<256x256xf32>
    %cst_166 = arith.constant dense<0.000000e+00> : vector<32x256xf32>
    %190 = tpu.matmul %187, %189, %cst_166 {dimension_numbers = #tpu.dot_dimension_numbers<[1], [0], [0], [1], [0, 0, 1, 1], [], []>} : vector<32x256xf32>, vector<256x256xf32>, vector<32x256xf32> -> vector<32x256xf32>
    %191 = arith.addf %185, %190 : vector<32x256xf32>
    %c2_167 = arith.constant 2 : index
    %c0_168 = arith.constant 0 : index
    %c0_169 = arith.constant 0 : index
    %192 = vector.load %arg13[%c2_167, %c0_168, %c0_169] : memref<6x8x256xf32, #tpu.memory_space<vmem>>, vector<4x8x256xf32>
    %193 = vector.shape_cast %192 : vector<4x8x256xf32> to vector<32x256xf32>
    %c2_170 = arith.constant 2 : index
    %c0_171 = arith.constant 0 : index
    %c0_172 = arith.constant 0 : index
    %194 = vector.load %arg7[%c2_170, %c0_171, %c0_172] : memref<3x256x256xf32, #tpu.memory_space<vmem>>, vector<1x256x256xf32>
    %195 = vector.shape_cast %194 : vector<1x256x256xf32> to vector<256x256xf32>
    %cst_173 = arith.constant dense<0.000000e+00> : vector<32x256xf32>
    %196 = tpu.matmul %193, %195, %cst_173 {dimension_numbers = #tpu.dot_dimension_numbers<[1], [0], [0], [1], [0, 0, 1, 1], [], []>} : vector<32x256xf32>, vector<256x256xf32>, vector<32x256xf32> -> vector<32x256xf32>
    %197 = arith.addf %191, %196 : vector<32x256xf32>
    %198 = vector.shape_cast %197 : vector<32x256xf32> to vector<2x16x256xf32>
    %199 = vector.extract_strided_slice %198 {offsets = [0, 0, 0], sizes = [2, 8, 256], strides = [1, 1, 1]} : vector<2x16x256xf32> to vector<2x8x256xf32>
    %200 = vector.extract_strided_slice %198 {offsets = [0, 8, 0], sizes = [2, 8, 256], strides = [1, 1, 1]} : vector<2x16x256xf32> to vector<2x8x256xf32>
    %201 = arith.maximumf %199, %200 : vector<2x8x256xf32>
    %202 = vector.extract_strided_slice %201 {offsets = [0, 0, 0], sizes = [2, 8, 64], strides = [1, 1, 1]} : vector<2x8x256xf32> to vector<2x8x64xf32>
    %203 = vector.extract_strided_slice %201 {offsets = [0, 0, 64], sizes = [2, 8, 64], strides = [1, 1, 1]} : vector<2x8x256xf32> to vector<2x8x64xf32>
    %204 = arith.maximumf %202, %203 : vector<2x8x64xf32>
    %205 = vector.extract_strided_slice %201 {offsets = [0, 0, 128], sizes = [2, 8, 64], strides = [1, 1, 1]} : vector<2x8x256xf32> to vector<2x8x64xf32>
    %206 = vector.extract_strided_slice %201 {offsets = [0, 0, 192], sizes = [2, 8, 64], strides = [1, 1, 1]} : vector<2x8x256xf32> to vector<2x8x64xf32>
    %207 = arith.maximumf %205, %206 : vector<2x8x64xf32>
    %208 = tpu.concatenate %204, %207 in 2 : vector<2x8x64xf32>, vector<2x8x64xf32> -> vector<2x8x128xf32>
    %cst_174 = arith.constant 0.000000e+00 : f32
    %209 = vector.broadcast %cst_174 : f32 to vector<2x8x128xf32>
    %210 = arith.maximumf %208, %209 : vector<2x8x128xf32>
    %c0_175 = arith.constant 0 : index
    %c0_176 = arith.constant 0 : index
    %c0_177 = arith.constant 0 : index
    %c0_178 = arith.constant 0 : index
    %211 = vector.load %arg8[%c0_175, %c0_176, %c0_177, %c0_178] : memref<1x2x8x128xf32, #tpu.memory_space<vmem>>, vector<1x2x8x128xf32>
    %212 = vector.shape_cast %211 : vector<1x2x8x128xf32> to vector<2x8x128xf32>
    %213 = vector.shape_cast %210 : vector<2x8x128xf32> to vector<1x2x8x128xf32>
    tpu.vector_store %arg8[%c0_175, %c0_176, %c0_177, %c0_178], %213 {strides = array<i32>} : memref<1x2x8x128xf32, #tpu.memory_space<vmem>>, vector<1x2x8x128xf32>,
    return
  }
  func.func @transform_0(%arg0: i32) -> (i32, i32, i32, i32) {
    %c0_i32 = arith.constant 0 : i32
    %c0_i32_0 = arith.constant 0 : i32
    %c0_i32_1 = arith.constant 0 : i32
    %c0_i32_2 = arith.constant 0 : i32
    return %arg0, %c0_i32, %c0_i32_0, %c0_i32_1 : i32, i32, i32, i32
  }
  func.func @transform_1(%arg0: i32) -> (i32, i32, i32) {
    %c0_i32 = arith.constant 0 : i32
    %c0_i32_0 = arith.constant 0 : i32
    %c0_i32_1 = arith.constant 0 : i32
    %c0_i32_2 = arith.constant 0 : i32
    return %c0_i32, %c0_i32_0, %c0_i32_1 : i32, i32, i32
  }
  func.func @transform_2(%arg0: i32) -> (i32, i32, i32) {
    %c0_i32 = arith.constant 0 : i32
    %c0_i32_0 = arith.constant 0 : i32
    %c0_i32_1 = arith.constant 0 : i32
    %c0_i32_2 = arith.constant 0 : i32
    return %c0_i32, %c0_i32_0, %c0_i32_1 : i32, i32, i32
  }
  func.func @transform_3(%arg0: i32) -> (i32, i32, i32) {
    %c0_i32 = arith.constant 0 : i32
    %c0_i32_0 = arith.constant 0 : i32
    %c0_i32_1 = arith.constant 0 : i32
    %c0_i32_2 = arith.constant 0 : i32
    return %c0_i32, %c0_i32_0, %c0_i32_1 : i32, i32, i32
  }
  func.func @transform_4(%arg0: i32) -> (i32, i32, i32) {
    %c0_i32 = arith.constant 0 : i32
    %c0_i32_0 = arith.constant 0 : i32
    %c0_i32_1 = arith.constant 0 : i32
    %c0_i32_2 = arith.constant 0 : i32
    return %c0_i32, %c0_i32_0, %c0_i32_1 : i32, i32, i32
  }
  func.func @transform_5(%arg0: i32) -> (i32, i32, i32) {
    %c0_i32 = arith.constant 0 : i32
    %c0_i32_0 = arith.constant 0 : i32
    %c0_i32_1 = arith.constant 0 : i32
    %c0_i32_2 = arith.constant 0 : i32
    return %c0_i32, %c0_i32_0, %c0_i32_1 : i32, i32, i32
  }
  func.func @transform_6(%arg0: i32) -> (i32, i32, i32) {
    %c0_i32 = arith.constant 0 : i32
    %c0_i32_0 = arith.constant 0 : i32
    %c0_i32_1 = arith.constant 0 : i32
    %c0_i32_2 = arith.constant 0 : i32
    return %c0_i32, %c0_i32_0, %c0_i32_1 : i32, i32, i32
  }
  func.func @transform_7(%arg0: i32) -> (i32, i32, i32, i32) {
    %c0_i32 = arith.constant 0 : i32
    %c0_i32_0 = arith.constant 0 : i32
    %c0_i32_1 = arith.constant 0 : i32
    %c0_i32_2 = arith.constant 0 : i32
    return %arg0, %c0_i32, %c0_i32_0, %c0_i32_1 : i32, i32, i32, i32
  }
}

</mosaic_0001>

<bundles_post_ra>
// kernel: tpu_custom_call.1
= control target key start
LH: loop header
LB: loop body
LE: loop exit
PB: predicated region body
PF: predicated region fallthrough
CT: control target
= control target key end

     0   :  { %12 = vsyncpa [#allocation8], 0  ;;  %s6781_s0 = inlined_call_operand.hbm [shape: f32[1,18,8,48], index: 0, kind: input, shape index: {}]   ;;  %s6782_s1 = inlined_call_operand.hbm [shape: f32[3,48,256], index: 1, kind: input, shape index: {}]   ;;  %s6783_s2 = inlined_call_operand.hbm [shape: f32[3,256,256], index: 2, kind: input, shape index: {}]   ;;  %s6784_s3 = inlined_call_operand.hbm [shape: f32[3,128,256], index: 3, kind: input, shape index: {}]   ;;  %s6785_s4 = inlined_call_operand.hbm [shape: f32[3,256,256], index: 4, kind: input, shape index: {}]   ;;  %s6786_s5 = inlined_call_operand.hbm [shape: f32[3,128,256], index: 5, kind: input, shape index: {}]   ;;  %s6787_s6 = inlined_call_operand.hbm [shape: f32[3,256,256], index: 6, kind: input, shape index: {}]   ;;  %s6788_s7 = inlined_call_operand.hbm [shape: f32[1,2,8,128], index: 7, kind: output, shape index: {}]  }
   0x1   :  { %13 = vsyncpa [#allocation11], 0 }
   0x2   :  { %14 = vsyncpa [#allocation14], 0 }
   0x3   :  { %15 = vsyncpa [#allocation17], 0 }
   0x4   :  { %16 = vsyncpa [#allocation9], 0  ;;  %s5723_s24 = smov [#allocation10]   ;;  %s5537_s28 = scalar_lea.hbm %s6782_s1, 4608 }
   0x5   :  { %s34_s25 = sshll.u32 %s5723_s24, 4  ;;  %p5538_p0 = scmp.ne.s32.totalorder %s6782_s1, %s5537_s28  ;;  %s35_s25 = int_to_ptr.vmem [resolvable:$true] %s34_s25 }
   0x6   :  { %p5541_p1 = scmp.lt.u32.totalorder %s5537_s28, %s6782_s1 }
   0x8   :  { %p5543_p2 = pnand %p5541_p1, %p5538_p0 }
   0xa   :  { %5546 = shalt.err (!%p5543_p2)
}
   0xb   :  { %s5547_s10 = scalar_lea.vmem %s35_s25, 4608  ;;  %p5552_p4 = scmp.lt.s32.totalorder %s35_s25, %s35_s25 }
   0xc   :  { %p5548_p3 = scmp.ne.s32.totalorder %s35_s25, %s5547_s10  ;;  %p5553_p5 = scmp.lt.s32.totalorder %s5547_s10, %s5547_s10 }
   0xe   :  { %p5554_p6 = por %p5553_p5, %p5552_p4 }
  0x10   :  { %p5555_p7 = pnand %p5554_p6, %p5548_p3 }
  0x12   :  { %5558 = shalt.err (!%p5555_p7)
}
  0x13   :  { %s5724_s11 = smov 256   ;;  %s5725_s12 = smov 16  }
  0x14   :  { %40 = dma.hbm_to_vmem [thread:$0]  %s6782_s1, 4608, %s35_s25, [#allocation11], %s5724_s11, %s5724_s11, %s5725_s12  }
  0x15   :  { %s5726_s15 = smov [#allocation13]   ;;  %s5727_s17 = smov [#allocation16]  }
  0x16   :  { %s58_s16 = sshll.u32 %s5726_s15, 4  ;;  %s82_s18 = sshll.u32 %s5727_s17, 4  ;;  %s59_s16 = int_to_ptr.vmem [resolvable:$true] %s58_s16  ;;  %s83_s18 = int_to_ptr.vmem [resolvable:$true] %s82_s18 }
  0x17   :  { %s5559_s21 = scalar_lea.hbm %s6784_s3, 12288 }
  0x18   :  { %p5560_p8 = scmp.ne.s32.totalorder %s6784_s3, %s5559_s21  ;;  %p5563_p9 = scmp.lt.u32.totalorder %s5559_s21, %s6784_s3 }
  0x1a   :  { %p5565_p10 = pnand %p5563_p9, %p5560_p8 }
  0x1c   :  { %5568 = shalt.err (!%p5565_p10)
}
  0x1d   :  { %s5569_s1 = scalar_lea.vmem %s59_s16, 12288  ;;  %p5574_p12 = scmp.lt.s32.totalorder %s59_s16, %s59_s16 }
  0x1e   :  { %p5570_p11 = scmp.ne.s32.totalorder %s59_s16, %s5569_s1  ;;  %p5575_p13 = scmp.lt.s32.totalorder %s5569_s1, %s5569_s1 }
  0x20   :  { %p5576_p0 = por %p5575_p13, %p5574_p12 }
  0x22   :  { %p5577_p1 = pnand %p5576_p0, %p5570_p11 }
  0x24   :  { %5580 = shalt.err (!%p5577_p1)
}
  0x25   :  { %64 = dma.hbm_to_vmem [thread:$0]  %s6784_s3, 12288, %s59_s16, [#allocation14], %s5724_s11, %s5724_s11, %s5725_s12  }
  0x26   :  { %s5581_s30 = scalar_lea.hbm %s6786_s5, 12288 }
  0x27   :  { %p5582_p2 = scmp.ne.s32.totalorder %s6786_s5, %s5581_s30  ;;  %p5585_p3 = scmp.lt.u32.totalorder %s5581_s30, %s6786_s5 }
  0x29   :  { %p5587_p4 = pnand %p5585_p3, %p5582_p2 }
  0x2b   :  { %5590 = shalt.err (!%p5587_p4)
}
  0x2c   :  { %s5591_s14 = scalar_lea.vmem %s83_s18, 12288  ;;  %p5596_p6 = scmp.lt.s32.totalorder %s83_s18, %s83_s18 }
  0x2d   :  { %p5592_p5 = scmp.ne.s32.totalorder %s83_s18, %s5591_s14  ;;  %p5597_p7 = scmp.lt.s32.totalorder %s5591_s14, %s5591_s14 }
  0x2f   :  { %p5598_p8 = por %p5597_p7, %p5596_p6 }
  0x31   :  { %p5599_p9 = pnand %p5598_p8, %p5592_p5 }
  0x33   :  { %5602 = shalt.err (!%p5599_p9)
}
  0x34   :  { %88 = dma.hbm_to_vmem [thread:$0]  %s6786_s5, 12288, %s83_s18, [#allocation17], %s5724_s11, %s5724_s11, %s5725_s12  }
  0x35   :  { %s5728_s16 = smov [#allocation7]   ;;  %s5603_s21 = scalar_lea.hbm %s6781_s0, 2304 }
  0x36   :  { %s22_s17 = sshll.u32 %s5728_s16, 4  ;;  %p5604_p10 = scmp.ne.s32.totalorder %s6781_s0, %s5603_s21  ;;  %s23_s17 = int_to_ptr.vmem [resolvable:$true] %s22_s17 }
  0x37   :  { %p5607_p11 = scmp.lt.u32.totalorder %s5603_s21, %s6781_s0 }
  0x39   :  { %p5609_p12 = pnand %p5607_p11, %p5604_p10 }
  0x3b   :  { %5612 = shalt.err (!%p5609_p12)
}
  0x3c   :  { %s5613_s1 = scalar_lea.vmem %s23_s17, 2304  ;;  %p5618_p0 = scmp.lt.s32.totalorder %s23_s17, %s23_s17 }
  0x3d   :  { %p5614_p13 = scmp.ne.s32.totalorder %s23_s17, %s5613_s1  ;;  %p5619_p1 = scmp.lt.s32.totalorder %s5613_s1, %s5613_s1 }
  0x3f   :  { %p5620_p2 = por %p5619_p1, %p5618_p0 }
  0x41   :  { %p5621_p3 = pnand %p5620_p2, %p5614_p13 }
  0x43   :  { %5624 = shalt.err (!%p5621_p3)
}
  0x44   :  { %s5729_s5 = smov 128   ;;  %s5730_s18 = smov 8  }
  0x45   :  { %28 = dma.hbm_to_vmem [thread:$0]  %s6781_s0, 2304, %s23_s17, [#allocation8], %s5729_s5, %s5729_s5, %s5730_s18  }
  0x46   :  { %s5731_s28 = smov [#allocation12]   ;;  %s5732_s30 = smov [#allocation15]  }
  0x47   :  { %s46_s29 = sshll.u32 %s5731_s28, 4  ;;  %s70_s8 = sshll.u32 %s5732_s30, 4  ;;  %s47_s29 = int_to_ptr.vmem [resolvable:$true] %s46_s29  ;;  %s5842_s8 = int_to_ptr.vmem [resolvable:$true] %s70_s8 }
  0x48   :  { %s5625_s13 = scalar_lea.hbm %s6783_s2, 24576 }
  0x49   :  { %p5626_p4 = scmp.ne.s32.totalorder %s6783_s2, %s5625_s13  ;;  %p5629_p5 = scmp.lt.u32.totalorder %s5625_s13, %s6783_s2 }
  0x4b   :  { %p5631_p6 = pnand %p5629_p5, %p5626_p4 }
  0x4d   :  { %5634 = shalt.err (!%p5631_p6)
}
  0x4e   :  { %s5635_s0 = scalar_lea.vmem %s47_s29, 24576  ;;  %p5640_p8 = scmp.lt.s32.totalorder %s47_s29, %s47_s29 }
  0x4f   :  { %p5636_p7 = scmp.ne.s32.totalorder %s47_s29, %s5635_s0  ;;  %p5641_p9 = scmp.lt.s32.totalorder %s5635_s0, %s5635_s0 }
  0x51   :  { %p5642_p10 = por %p5641_p9, %p5640_p8 }
  0x53   :  { %p5643_p11 = pnand %p5642_p10, %p5636_p7 }
  0x55   :  { %5646 = shalt.err (!%p5643_p11)
}
  0x56   :  { %52 = dma.hbm_to_vmem [thread:$0]  %s6783_s2, 24576, %s47_s29, [#allocation11], %s5724_s11, %s5724_s11, %s5725_s12  }
  0x57   :  { %s5647_s22 = scalar_lea.hbm %s6785_s4, 24576 }
  0x58   :  { %p5648_p12 = scmp.ne.s32.totalorder %s6785_s4, %s5647_s22  ;;  %p5651_p13 = scmp.lt.u32.totalorder %s5647_s22, %s6785_s4 }
  0x5a   :  { %p5653_p0 = pnand %p5651_p13, %p5648_p12 }
  0x5c   :  { %5656 = shalt.err (!%p5653_p0)
}
  0x5d   :  { %s5657_s25 = scalar_lea.vmem %s5842_s8, 24576  ;;  %p5662_p2 = scmp.lt.s32.totalorder %s5842_s8, %s5842_s8 }
  0x5e   :  { %p5658_p1 = scmp.ne.s32.totalorder %s5842_s8, %s5657_s25  ;;  %p5663_p3 = scmp.lt.s32.totalorder %s5657_s25, %s5657_s25 }
  0x60   :  { %p5664_p4 = por %p5663_p3, %p5662_p2 }
  0x62   :  { %p5665_p5 = pnand %p5664_p4, %p5658_p1 }
  0x64   :  { %5668 = shalt.err (!%p5665_p5)
}
  0x65   :  { %76 = dma.hbm_to_vmem [thread:$0]  %s6785_s4, 24576, %s5842_s8, [#allocation14], %s5724_s11, %s5724_s11, %s5725_s12  }
  0x66   :  { %s5733_s28 = smov [#allocation18]   ;;  %s5669_s10 = scalar_lea.hbm %s6787_s6, 24576 }
  0x67   :  { %s94_s29 = sshll.u32 %s5733_s28, 4  ;;  %p5670_p6 = scmp.ne.s32.totalorder %s6787_s6, %s5669_s10  ;;  %s95_s29 = int_to_ptr.vmem [resolvable:$true] %s94_s29 }
  0x68   :  { %p5673_p7 = scmp.lt.u32.totalorder %s5669_s10, %s6787_s6 }
  0x6a   :  { %p5675_p8 = pnand %p5673_p7, %p5670_p6 }
  0x6c   :  { %5678 = shalt.err (!%p5675_p8)
}
  0x6d   :  { %s5679_s16 = scalar_lea.vmem %s95_s29, 24576  ;;  %p5684_p10 = scmp.lt.s32.totalorder %s95_s29, %s95_s29 }
  0x6e   :  { %p5680_p9 = scmp.ne.s32.totalorder %s95_s29, %s5679_s16  ;;  %p5685_p11 = scmp.lt.s32.totalorder %s5679_s16, %s5679_s16 }
  0x70   :  { %p5686_p12 = por %p5685_p11, %p5684_p10 }
  0x72   :  { %p5687_p13 = pnand %p5686_p12, %p5680_p9 }
  0x74   :  { %5690 = shalt.err (!%p5687_p13)
}
  0x75   :  { %100 = dma.hbm_to_vmem [thread:$0]  %s6787_s6, 24576, %s95_s29, [#allocation17], %s5724_s11, %s5724_s11, %s5725_s12  }
  0x76   :  { %5713 = dma.done.wait [#allocation8], 2304  }
  0x77   :  { %5714 = vsyncadd [#allocation8], 4294964992 }
  0x78   :  { %5715 = dma.done.wait [#allocation11], 29184  }
  0x79   :  { %5716 = vsyncadd [#allocation11], 4294938112 }
  0x7a   :  { %5717 = dma.done.wait [#allocation14], 36864  }
  0x7b   :  { %5718 = vsyncadd [#allocation14], 4294930432 }
  0x7c   :  { %5719 = dma.done.wait [#allocation17], 36864  }
  0x7d   :  { %5720 = vsyncadd [#allocation17], 4294930432  ;;  %v5734_v0 = vmov 0.0   ;;  %v160_v1 = vld [vmem:[#allocation10 + $0x8] sm:$0xff]  ;;  %v162_v2 = vld [vmem:[#allocation10 + $0x18] sm:$0xff]  ;;  %vm201_vm0 = vcmask 392192  }
  0x7e   :  { %523 = vmatprep.mubr.f32.mxu0 %v5734_v0  ;;  %314 = vmatprep.mubr.f32.mxu1 %v5734_v0  ;;  %v159_v3 = vld [vmem:[#allocation10] sm:$0xff]  ;;  %v4302_v4 = vpack.c.bf16 %v162_v2, %v160_v1  ;;  %v161_v5 = vld [vmem:[#allocation10 + $0x10] sm:$0xff]  ;;  %v164_v6 = vld [vmem:[#allocation10 + $0x28] sm:$0xff]  ;;  %s5735_s6 = smov 112   ;;  %s5736_s11 = smov 96   ;;  %vm2010_vm1 = vcmask 130048  }
  0x7f   :  { %v166_v7 = vld [vmem:[#allocation10 + $0x38] sm:$0xff]  ;;  %v4304_v8 = vpack.c.bf16 %v161_v5, %v159_v3  ;;  %v163_v10 = vld [vmem:[#allocation10 + $0x20] sm:$0xff]  ;;  %v165_v11 = vld [vmem:[#allocation10 + $0x30] sm:$0xff]  ;;  %s5737_s0 = smov 80   ;;  %s5738_s17 = smov 64   ;;  %vm2019_vm2 = vcmask 261120  }
  0x80   :  { %v4306_v9 = vpack.c.bf16 %v166_v7, %v164_v6  ;;  %v168_v12 = vld [vmem:[#allocation10 + $0x48] sm:$0xff]  ;;  %4303 = vmatprep.subr.bf16.mxu0 %v4302_v4  ;;  %v170_v13 = vld [vmem:[#allocation10 + $0x58] sm:$0xff]  ;;  %v4308_v14 = vpack.c.bf16 %v165_v11, %v163_v10  ;;  %v167_v16 = vld [vmem:[#allocation10 + $0x40] sm:$0xff]  ;;  %s5739_s19 = smov 48   ;;  %s5740_s20 = smov 32   ;;  %vm2036_vm3 = vcmask 523264  }
  0x81   :  { %4305 = vmatpush1.bf16.msra.mxu0 %v4304_v8  ;;  %v4310_v15 = vpack.c.bf16 %v170_v13, %v168_v12  ;;  %v169_v17 = vld [vmem:[#allocation10 + $0x50] sm:$0xff]  ;;  %v639_v18 = vld [vmem:[#allocation10 + $0xc8] sm:$0xff]  ;;  %v641_v19 = vld [vmem:[#allocation10 + $0xd8] sm:$0xff]  ;;  %vm2045_vm4 = vcmask 654336   ;;  %vm2054_vm5 = vcmask 785408   ;;  %vm2063_vm6 = vcmask 916480  }
  0x82   :  { %4307 = vmatprep.subr.bf16.mxu0 %v4306_v9  ;;  %v4312_v20 = vpack.c.bf16 %v169_v17, %v167_v16  ;;  %v4314_v21 = vpack.c.bf16 %v641_v19, %v639_v18  ;;  %v638_v22 = vld [vmem:[#allocation10 + $0xc0] sm:$0xff]  ;;  %v640_v23 = vld [vmem:[#allocation10 + $0xd0] sm:$0xff]  ;;  %v643_v24 = vld [vmem:[#allocation10 + $0xe8] sm:$0xff] }
  0x83   :  { %v645_v25 = vld [vmem:[#allocation10 + $0xf8] sm:$0xff]  ;;  %v143_v26 = vld [vmem:[#allocation7] sm:$0xff]  ;;  %v642_v27 = vld [vmem:[#allocation10 + $0xe0] sm:$0xff]  ;;  %v4316_v28 = vpack.c.bf16 %v640_v23, %v638_v22 }
  0x84   :  { %v644_v29 = vld [vmem:[#allocation10 + $0xf0] sm:$0xff]  ;;  %v190_v30 = vld [vmem:[#allocation10 + $0x68] sm:$0xff]  ;;  %v192_v31 = vld [vmem:[#allocation10 + $0x78] sm:$0xff]  ;;  %v4318_v32 = vpack.c.bf16 %v645_v25, %v643_v24 }
  0x85   :  { %4309 = vmatpush1.bf16.msra.mxu0 %v4308_v14  ;;  %v647_v33 = vld [vmem:[#allocation10 + $0x108] sm:$0xff]  ;;  %v4290_v34 = vpack.c.bf16 %v192_v31, %v190_v30  ;;  %v189_v35 = vld [vmem:[#allocation10 + $0x60] sm:$0xff]  ;;  %v191_v36 = vld [vmem:[#allocation10 + $0x70] sm:$0xff]  ;;  %v4320_v46 = vpack.c.bf16 %v644_v29, %v642_v27 }
  0x86   :  { %4311 = vmatprep.subr.bf16.mxu0 %v4310_v15  ;;  %v649_v37 = vld [vmem:[#allocation10 + $0x118] sm:$0xff]  ;;  %v4292_v38 = vpack.c.bf16 %v191_v36, %v189_v35  ;;  %v194_v39 = vld [vmem:[#allocation10 + $0x88] sm:$0xff]  ;;  %v193_v42 = vld [vmem:[#allocation10 + $0x80] sm:$0xff] }
  0x87   :  { %v196_v40 = vld [vmem:[#allocation10 + $0x98] sm:$0xff]  ;;  %4291 = vmatprep.subr.bf16.mxu1 %v4290_v34  ;;  %v195_v43 = vld [vmem:[#allocation10 + $0x90] sm:$0xff]  ;;  %v198_v44 = vld [vmem:[#allocation10 + $0xa8] sm:$0xff]  ;;  %v4322_v48 = vpack.c.bf16 %v649_v37, %v647_v33 }
  0x88   :  { %v4294_v41 = vpack.c.bf16 %v196_v40, %v194_v39  ;;  %v144_v45 = vld [vmem:[#allocation7 + $0x8] sm:$0xff]  ;;  %v646_v49 = vld [vmem:[#allocation10 + $0x100] sm:$0xff]  ;;  %v648_v50 = vld [vmem:[#allocation10 + $0x110] sm:$0xff]  ;;  %4293 = vmatpush1.bf16.msra.mxu1 %v4292_v38  ;;  %v4296_v51 = vpack.c.bf16 %v195_v43, %v193_v42 }
  0x89   :  { %4313 = vmatpush1.bf16.msra.mxu0 %v4312_v20  ;;  %v200_v47 = vld [vmem:[#allocation10 + $0xb8] sm:$0xff]  ;;  %v197_v53 = vld [vmem:[#allocation10 + $0xa0] sm:$0xff]  ;;  %v199_v54 = vld [vmem:[#allocation10 + $0xb0] sm:$0xff]  ;;  %v4324_v58 = vpack.c.bf16 %v648_v50, %v646_v49 }
  0x8a   :  { %4315 = vmatprep.subr.bf16.mxu0 %v4314_v21  ;;  %4295 = vmatprep.subr.bf16.mxu1 %v4294_v41  ;;  %v4298_v52 = vpack.c.bf16 %v200_v47, %v198_v44  ;;  %v1054_v55 = vld [vmem:[#allocation12 + $0x208] sm:$0xff]  ;;  %v1056_v56 = vld [vmem:[#allocation12 + $0x218] sm:$0xff]  ;;  %v5900_v57 = vld [vmem:[#allocation7 + $0x10] sm:$0xff]  ;;  %v4300_v59 = vpack.c.bf16 %v199_v54, %v197_v53 }
  0x8b   :  { %v4326_v60 = vpack.c.bf16 %v1056_v56, %v1054_v55  ;;  %v1053_v61 = vld [vmem:[#allocation12 + $0x200] sm:$0xff]  ;;  %v1055_v62 = vld [vmem:[#allocation12 + $0x210] sm:$0xff]  ;;  %v1058_v63 = vld [vmem:[#allocation12 + $0x228] sm:$0xff] }
  0x8c   :  { %4258 = vmatmul.mubr.msk.f32.vlgmr.msra.gmra.mrb[0].mxu0 %vm201_vm0, %v143_v26  ;;  %4297 = vmatpush1.bf16.msra.mxu1 %v4296_v51  ;;  %v1060_v1 = vld [vmem:[#allocation12 + $0x238] sm:$0xff]  ;;  %v5905_v2 = vld [vmem:[#allocation7 + $0x18] sm:$0xff]  ;;  %v4328_v3 = vpack.c.bf16 %v1055_v62, %v1053_v61  ;;  %v1057_v5 = vld [vmem:[#allocation12 + $0x220] sm:$0xff] }
  0x8d   :  { %4317 = vmatpush1.bf16.msra.mxu0 %v4316_v28  ;;  %529 = vmatprep.mubr.f32.mxu0 %v5734_v0  ;;  %v4330_v4 = vpack.c.bf16 %v1060_v1, %v1058_v63  ;;  %v1059_v6 = vld [vmem:[#allocation12 + $0x230] sm:$0xff]  ;;  %v1062_v7 = vld [vmem:[#allocation12 + $0x248] sm:$0xff]  ;;  %v1064_v8 = vld [vmem:[#allocation12 + $0x258] sm:$0xff] }
  0x8e   :  { %4319 = vmatprep.subr.bf16.mxu0 %v4318_v32  ;;  %4299 = vmatprep.subr.bf16.mxu1 %v4298_v52  ;;  %v5910_v9 = vld [vmem:[#allocation7 + $0x20] sm:$0xff]  ;;  %v4332_v10 = vpack.c.bf16 %v1059_v6, %v1057_v5  ;;  %v4334_v11 = vpack.c.bf16 %v1064_v8, %v1062_v7  ;;  %v1061_v12 = vld [vmem:[#allocation12 + $0x240] sm:$0xff]  ;;  %v1066_v14 = vld [vmem:[#allocation12 + $0x268] sm:$0xff] }
  0x8f   :  { %v1063_v13 = vld [vmem:[#allocation12 + $0x250] sm:$0xff]  ;;  %v1068_v15 = vld [vmem:[#allocation12 + $0x278] sm:$0xff]  ;;  %v1065_v19 = vld [vmem:[#allocation12 + $0x260] sm:$0xff] }
  0x90   :  { %4259 = vmatmul.mubr.msk.f32.gmra.mrb[2].mxu0 %vm201_vm0, %v144_v45  ;;  %4301 = vmatpush1.bf16.msra.mxu1 %v4300_v59  ;;  %v5917_v16 = vld [vmem:[#allocation7 + $0x28] sm:$0xff]  ;;  %v4336_v17 = vpack.c.bf16 %v1063_v13, %v1061_v12  ;;  %v4338_v18 = vpack.c.bf16 %v1068_v15, %v1066_v14  ;;  %v1067_v20 = vld [vmem:[#allocation12 + $0x270] sm:$0xff]  ;;  %v1070_v21 = vld [vmem:[#allocation12 + $0x288] sm:$0xff] }
  0x91   :  { %535 = vmatprep.mubr.f32.mxu0 %v5734_v0  ;;  %4321 = vmatpush1.bf16.msra.mxu0 %v4320_v46  ;;  %v1072_v22 = vld [vmem:[#allocation12 + $0x298] sm:$0xff]  ;;  %v5925_v23 = vld [vmem:[#allocation7 + $0x30] sm:$0xff]  ;;  %v4340_v24 = vpack.c.bf16 %v1067_v20, %v1065_v19  ;;  %v1071_v27 = vld [vmem:[#allocation12 + $0x290] sm:$0xff] }
  0x92   :  { %4323 = vmatprep.subr.bf16.mxu0 %v4322_v48  ;;  %4327 = vmatprep.subr.bf16.mxu1 %v4326_v60  ;;  %v4342_v25 = vpack.c.bf16 %v1072_v22, %v1070_v21  ;;  %v1069_v26 = vld [vmem:[#allocation12 + $0x280] sm:$0xff]  ;;  %v1074_v28 = vld [vmem:[#allocation12 + $0x2a8] sm:$0xff]  ;;  %v1076_v29 = vld [vmem:[#allocation12 + $0x2b8] sm:$0xff] }
  0x93   :  { %4242 = vmatmul.mubr.msk.f32.vlgmr.msra.gmra.mrb[0].mxu1 %vm201_vm0, %v144_v45  ;;  %v5933_v30 = vld [vmem:[#allocation7 + $0x38] sm:$0xff]  ;;  %v4344_v31 = vpack.c.bf16 %v1071_v27, %v1069_v26  ;;  %v4346_v32 = vpack.c.bf16 %v1076_v29, %v1074_v28  ;;  %v1073_v33 = vld [vmem:[#allocation12 + $0x2a0] sm:$0xff]  ;;  %v1075_v34 = vld [vmem:[#allocation12 + $0x2b0] sm:$0xff] }
  0x94   :  { %4260 = vmatmul.mubr.msk.f32.gmra.mrb[4].mxu0 %vm201_vm0, %v5900_v57  ;;  %320 = vmatprep.mubr.f32.mxu1 %v5734_v0  ;;  %v1078_v35 = vld [vmem:[#allocation12 + $0x2c8] sm:$0xff]  ;;  %v1080_v36 = vld [vmem:[#allocation12 + $0x2d8] sm:$0xff]  ;;  %v5941_v37 = vld [vmem:[#allocation7 + $0x40] sm:$0xff]  ;;  %v4348_v38 = vpack.c.bf16 %v1075_v34, %v1073_v33 }
  0x95   :  { %541 = vmatprep.mubr.f32.mxu0 %v5734_v0  ;;  %4325 = vmatpush1.bf16.msra.mxu0 %v4324_v58  ;;  %v4350_v39 = vpack.c.bf16 %v1080_v36, %v1078_v35  ;;  %v1077_v40 = vld [vmem:[#allocation12 + $0x2c0] sm:$0xff]  ;;  %v1079_v41 = vld [vmem:[#allocation12 + $0x2d0] sm:$0xff]  ;;  %v1082_v42 = vld [vmem:[#allocation12 + $0x2e8] sm:$0xff] }
  0x96   :  { %4329 = vmatpush1.bf16.msra.mxu1 %v4328_v3  ;;  %v1084_v43 = vld [vmem:[#allocation12 + $0x2f8] sm:$0xff]  ;;  %v4352_v45 = vpack.c.bf16 %v1079_v41, %v1077_v40  ;;  %v1081_v47 = vld [vmem:[#allocation12 + $0x2e0] sm:$0xff]  ;;  %v1083_v48 = vld [vmem:[#allocation12 + $0x2f0] sm:$0xff] }
  0x97   :  { %4331 = vmatprep.subr.bf16.mxu1 %v4330_v4  ;;  %4243 = vmatmul.mubr.msk.f32.gmra.mrb[2].mxu1 %vm201_vm0, %v5900_v57  ;;  %v5949_v44 = vld [vmem:[#allocation7 + $0x48] sm:$0xff]  ;;  %v4354_v46 = vpack.c.bf16 %v1084_v43, %v1082_v42  ;;  %v1086_v49 = vld [vmem:[#allocation12 + $0x308] sm:$0xff]  ;;  %v5957_v51 = vld [vmem:[#allocation7 + $0x50] sm:$0xff]  ;;  %v4356_v52 = vpack.c.bf16 %v1083_v48, %v1081_v47 }
  0x98   :  { %4261 = vmatmul.mubr.msk.f32.gmra.mrb[6].mxu0 %vm201_vm0, %v5905_v2  ;;  %326 = vmatprep.mubr.f32.mxu1 %v5734_v0  ;;  %v1088_v50 = vld [vmem:[#allocation12 + $0x318] sm:$0xff]  ;;  %v1085_v54 = vld [vmem:[#allocation12 + $0x300] sm:$0xff]  ;;  %v1087_v55 = vld [vmem:[#allocation12 + $0x310] sm:$0xff] }
  0x99   :  { %547 = vmatprep.mubr.f32.mxu0 %v5734_v0  ;;  %v4358_v53 = vpack.c.bf16 %v1088_v50, %v1086_v49  ;;  %v1090_v56 = vld [vmem:[#allocation12 + $0x328] sm:$0xff]  ;;  %v1092_v58 = vld [vmem:[#allocation12 + $0x338] sm:$0xff]  ;;  %v4360_v60 = vpack.c.bf16 %v1087_v55, %v1085_v54  ;;  %v1089_v62 = vld [vmem:[#allocation12 + $0x320] sm:$0xff] }
  0x9a   :  { %4333 = vmatpush1.bf16.msra.mxu1 %v4332_v10  ;;  %v5965_v59 = vld [vmem:[#allocation7 + $0x58] sm:$0xff]  ;;  %v4362_v61 = vpack.c.bf16 %v1092_v58, %v1090_v56  ;;  %v1091_v63 = vld [vmem:[#allocation12 + $0x330] sm:$0xff]  ;;  %v1096_v3 = vld [vmem:[#allocation12 + $0x358] sm:$0xff] }
  0x9b   :  { %4335 = vmatprep.subr.bf16.mxu1 %v4334_v11  ;;  %4244 = vmatmul.mubr.msk.f32.gmra.mrb[4].mxu1 %vm201_vm0, %v5905_v2  ;;  %v1094_v1 = vld [vmem:[#allocation12 + $0x348] sm:$0xff]  ;;  %v5973_v4 = vld [vmem:[#allocation7 + $0x60] sm:$0xff]  ;;  %v4364_v5 = vpack.c.bf16 %v1091_v63, %v1089_v62  ;;  %v1093_v7 = vld [vmem:[#allocation12 + $0x340] sm:$0xff] }
  0x9c   :  { %4262 = vmatmul.mubr.msk.f32.gmra.mrb[8].mxu0 %vm201_vm0, %v5910_v9  ;;  %332 = vmatprep.mubr.f32.mxu1 %v5734_v0  ;;  %v4366_v6 = vpack.c.bf16 %v1096_v3, %v1094_v1  ;;  %v1095_v8 = vld [vmem:[#allocation12 + $0x350] sm:$0xff]  ;;  %v1098_v10 = vld [vmem:[#allocation12 + $0x368] sm:$0xff]  ;;  %v1100_v11 = vld [vmem:[#allocation12 + $0x378] sm:$0xff] }
  0x9d   :  { %553 = vmatprep.mubr.f32.mxu0 %v5734_v0  ;;  %v5981_v12 = vld [vmem:[#allocation7 + $0x68] sm:$0xff]  ;;  %v4368_v13 = vpack.c.bf16 %v1095_v8, %v1093_v7  ;;  %v4370_v14 = vpack.c.bf16 %v1100_v11, %v1098_v10  ;;  %v1097_v15 = vld [vmem:[#allocation12 + $0x360] sm:$0xff]  ;;  %v1106_v26 = vld [vmem:[#allocation12 + $0x3a8] sm:$0xff] }
  0x9e   :  { %4337 = vmatpush1.bf16.msra.mxu1 %v4336_v17  ;;  %v1099_v17 = vld [vmem:[#allocation12 + $0x370] sm:$0xff]  ;;  %v1104_v19 = vld [vmem:[#allocation12 + $0x398] sm:$0xff]  ;;  %v5989_v20 = vld [vmem:[#allocation7 + $0x70] sm:$0xff] }
  0x9f   :  { %4339 = vmatprep.subr.bf16.mxu1 %v4338_v18  ;;  %4245 = vmatmul.mubr.msk.f32.gmra.mrb[6].mxu1 %vm201_vm0, %v5910_v9  ;;  %v1102_v18 = vld [vmem:[#allocation12 + $0x388] sm:$0xff]  ;;  %v4372_v21 = vpack.c.bf16 %v1099_v17, %v1097_v15  ;;  %v1108_v27 = vld [vmem:[#allocation12 + $0x3b8] sm:$0xff]  ;;  %v1107_v33 = vld [vmem:[#allocation12 + $0x3b0] sm:$0xff] }
  0xa0   :  { %4263 = vmatmul.mubr.msk.f32.gmra.mrb[10].mxu0 %vm201_vm0, %v5917_v16  ;;  %338 = vmatprep.mubr.f32.mxu1 %v5734_v0  ;;  %v4374_v22 = vpack.c.bf16 %v1104_v19, %v1102_v18  ;;  %v158_v28 = vld [vmem:[#allocation7 + $0x78] sm:$0xff]  ;;  %v1112_v35 = vld [vmem:[#allocation12 + $0x3d8] sm:$0xff]  ;;  %v1111_v40 = vld [vmem:[#allocation12 + $0x3d0] sm:$0xff] }
  0xa1   :  { %559 = vmatprep.mubr.f32.mxu0 %v5734_v0  ;;  %v1110_v34 = vld [vmem:[#allocation12 + $0x3c8] sm:$0xff]  ;;  %v963_v17 = vld [vmem:[#allocation12 + $0x38] sm:$0xff] }
  0xa2   :  { %4341 = vmatpush1.bf16.msra.mxu1 %v4340_v24  ;;  %v1101_v24 = vld [vmem:[#allocation12 + $0x380] sm:$0xff]  ;;  %v957_v43 = vld [vmem:[#allocation12 + $0x8] sm:$0xff] }
  0xa3   :  { %4343 = vmatprep.subr.bf16.mxu1 %v4342_v25  ;;  %4246 = vmatmul.mubr.msk.f32.gmra.mrb[8].mxu1 %vm201_vm0, %v5917_v16  ;;  %v1103_v25 = vld [vmem:[#allocation12 + $0x390] sm:$0xff]  ;;  %v961_v15 = vld [vmem:[#allocation12 + $0x28] sm:$0xff] }
  0xa4   :  { %4264 = vmatmul.mubr.msk.f32.gmra.mrb[12].mxu0 %vm201_vm0, %v5925_v23  ;;  %344 = vmatprep.mubr.f32.mxu1 %v5734_v0  ;;  %v4376_v29 = vpack.c.bf16 %v1103_v25, %v1101_v24  ;;  %v4394_v25 = vpack.c.bf16 %v963_v17, %v961_v15  ;;  %v972_v15 = vld [vmem:[#allocation12 + $0x80] sm:$0xff]  ;;  %v974_v17 = vld [vmem:[#allocation12 + $0x90] sm:$0xff] }
  0xa5   :  { %565 = vmatprep.mubr.f32.mxu0 %v5734_v0 }
  0xa6   :  { %4345 = vmatpush1.bf16.msra.mxu1 %v4344_v31  ;;  %v4378_v31 = vpack.c.bf16 %v1108_v27, %v1106_v26  ;;  %v960_v26 = vld [vmem:[#allocation12 + $0x20] sm:$0xff]  ;;  %v962_v27 = vld [vmem:[#allocation12 + $0x30] sm:$0xff] }
  0xa7   :  { %4347 = vmatprep.subr.bf16.mxu1 %v4346_v32  ;;  %4247 = vmatmul.mubr.msk.f32.gmra.mrb[10].mxu1 %vm201_vm0, %v5925_v23  ;;  %v1105_v32 = vld [vmem:[#allocation12 + $0x3a0] sm:$0xff] }
  0xa8   :  { %4265 = vmatmul.mubr.msk.f32.gmra.mrb[14].mxu0 %vm201_vm0, %v5933_v30  ;;  %350 = vmatprep.mubr.f32.mxu1 %v5734_v0  ;;  %v4380_v36 = vpack.c.bf16 %v1107_v33, %v1105_v32 }
  0xa9   :  { %571 = vmatprep.mubr.f32.mxu0 %v5734_v0 }
  0xaa   :  { %4349 = vmatpush1.bf16.msra.mxu1 %v4348_v38  ;;  %v4382_v38 = vpack.c.bf16 %v1112_v35, %v1110_v34 }
  0xab   :  { %4351 = vmatprep.subr.bf16.mxu1 %v4350_v39  ;;  %4248 = vmatmul.mubr.msk.f32.gmra.mrb[12].mxu1 %vm201_vm0, %v5933_v30  ;;  %v1109_v39 = vld [vmem:[#allocation12 + $0x3c0] sm:$0xff] }
  0xac   :  { %4266 = vmatmul.mubr.msk.f32.gmra.mrb[16].mxu0 %vm201_vm0, %v5941_v37  ;;  %356 = vmatprep.mubr.f32.mxu1 %v5734_v0  ;;  %v4384_v41 = vpack.c.bf16 %v1111_v40, %v1109_v39  ;;  %v964_v40 = vld [vmem:[#allocation12 + $0x40] sm:$0xff] }
  0xad   :  { %577 = vmatprep.mubr.f32.mxu0 %v5734_v0 }
  0xae   :  { %4353 = vmatpush1.bf16.msra.mxu1 %v4352_v45 }
  0xaf   :  { %4355 = vmatprep.subr.bf16.mxu1 %v4354_v46  ;;  %4249 = vmatmul.mubr.msk.f32.gmra.mrb[14].mxu1 %vm201_vm0, %v5941_v37 }
  0xb0   :  { %4267 = vmatmul.mubr.msk.f32.gmra.mrb[18].mxu0 %vm201_vm0, %v5949_v44  ;;  %362 = vmatprep.mubr.f32.mxu1 %v5734_v0 }
  0xb1   :  { %583 = vmatprep.mubr.f32.mxu0 %v5734_v0 }
  0xb2   :  { %4357 = vmatpush1.bf16.msra.mxu1 %v4356_v52 }
  0xb3   :  { %4359 = vmatprep.subr.bf16.mxu1 %v4358_v53  ;;  %4250 = vmatmul.mubr.msk.f32.gmra.mrb[16].mxu1 %vm201_vm0, %v5949_v44 }
  0xb4   :  { %4268 = vmatmul.mubr.msk.f32.gmra.mrb[20].mxu0 %vm201_vm0, %v5957_v51  ;;  %368 = vmatprep.mubr.f32.mxu1 %v5734_v0 }
  0xb5   :  { %589 = vmatprep.mubr.f32.mxu0 %v5734_v0 }
  0xb6   :  { %4361 = vmatpush1.bf16.msra.mxu1 %v4360_v60 }
  0xb7   :  { %4363 = vmatprep.subr.bf16.mxu1 %v4362_v61  ;;  %4251 = vmatmul.mubr.msk.f32.gmra.mrb[18].mxu1 %vm201_vm0, %v5957_v51 }
  0xb8   :  { %4269 = vmatmul.mubr.msk.f32.gmra.mrb[22].mxu0 %vm201_vm0, %v5965_v59  ;;  %374 = vmatprep.mubr.f32.mxu1 %v5734_v0 }
  0xb9   :  { %595 = vmatprep.mubr.f32.mxu0 %v5734_v0 }
  0xba   :  { %4365 = vmatpush1.bf16.msra.mxu1 %v4364_v5 }
  0xbb   :  { %4367 = vmatprep.subr.bf16.mxu1 %v4366_v6  ;;  %4252 = vmatmul.mubr.msk.f32.gmra.mrb[20].mxu1 %vm201_vm0, %v5965_v59 }
  0xbc   :  { %4270 = vmatmul.mubr.msk.f32.gmra.mrb[24].mxu0 %vm201_vm0, %v5973_v4  ;;  %380 = vmatprep.mubr.f32.mxu1 %v5734_v0 }
  0xbd   :  { %601 = vmatprep.mubr.f32.mxu0 %v5734_v0 }
  0xbe   :  { %4369 = vmatpush1.bf16.msra.mxu1 %v4368_v13  ;;  %v958_v13 = vld [vmem:[#allocation12 + $0x10] sm:$0xff] }
  0xbf   :  { %4371 = vmatprep.subr.bf16.mxu1 %v4370_v14  ;;  %4253 = vmatmul.mubr.msk.f32.gmra.mrb[22].mxu1 %vm201_vm0, %v5973_v4 }
  0xc0   :  { %4271 = vmatmul.mubr.msk.f32.gmra.mrb[26].mxu0 %vm201_vm0, %v5981_v12  ;;  %386 = vmatprep.mubr.f32.mxu1 %v5734_v0 }
  0xc1   :  { %607 = vmatprep.mubr.f32.mxu0 %v5734_v0 }
  0xc2   :  { %4373 = vmatpush1.bf16.msra.mxu1 %v4372_v21 }
  0xc3   :  { %4375 = vmatprep.subr.bf16.mxu1 %v4374_v22  ;;  %4254 = vmatmul.mubr.msk.f32.gmra.mrb[24].mxu1 %vm201_vm0, %v5981_v12 }
  0xc4   :  { %4272 = vmatmul.mubr.msk.f32.gmra.mrb[28].mxu0 %vm201_vm0, %v5989_v20  ;;  %392 = vmatprep.mubr.f32.mxu1 %v5734_v0 }
  0xc5   :  { %613 = vmatprep.mubr.f32.mxu0 %v5734_v0 }
  0xc6   :  { %4377 = vmatpush1.bf16.msra.mxu1 %v4376_v29  ;;  %v965_v29 = vld [vmem:[#allocation12 + $0x48] sm:$0xff] }
  0xc7   :  { %4379 = vmatprep.subr.bf16.mxu1 %v4378_v31  ;;  %4255 = vmatmul.mubr.msk.f32.gmra.mrb[26].mxu1 %vm201_vm0, %v5989_v20  ;;  %v967_v31 = vld [vmem:[#allocation12 + $0x58] sm:$0xff] }
  0xc8   :  { %4273 = vmatmul.mubr.msk.f32.gmra.mrb[30].mxu0 %vm201_vm0, %v158_v28  ;;  %398 = vmatprep.mubr.f32.mxu1 %v5734_v0  ;;  %v4398_v39 = vpack.c.bf16 %v967_v31, %v965_v29  ;;  %v976_v29 = vld [vmem:[#allocation12 + $0xa0] sm:$0xff]  ;;  %v978_v31 = vld [vmem:[#allocation12 + $0xb0] sm:$0xff] }
  0xc9   :  { %762 = vmatprep.mubr.f32.mxu0 %v5734_v0 }
  0xca   :  { %4381 = vmatpush1.bf16.msra.mxu1 %v4380_v36  ;;  %v4396_v36 = vpack.c.bf16 %v962_v27, %v960_v26  ;;  %v4408_v27 = vpack.c.bf16 %v974_v17, %v972_v15 }
  0xcb   :  { %4383 = vmatprep.subr.bf16.mxu1 %v4382_v38  ;;  %4256 = vmatmul.mubr.msk.f32.gmra.mrb[28].mxu1 %vm201_vm0, %v158_v28 }
  0xcc   :  { %4274 = vmatmul.mubr.msk.f32.vlgmr.msra.gmra.mrb[0].mxu0 %vm201_vm0, %v5900_v57  ;;  %404 = vmatprep.mubr.f32.mxu1 %v5734_v0  ;;  %v635_v57 = vld [vmem:[#allocation7 + $0x80] sm:$0xff] }
  0xcd   :  { %768 = vmatprep.mubr.f32.mxu0 %v5734_v0 }
  0xce   :  { %4385 = vmatpush1.bf16.msra.mxu1 %v4384_v41  ;;  %v966_v41 = vld [vmem:[#allocation12 + $0x50] sm:$0xff] }
  0xcf   :  { %4257 = vmatmul.mubr.msk.f32.gmra.mrb[30].mxu1 %vm201_vm0, %v635_v57 }
  0xd0   :  { %4275 = vmatmul.mubr.msk.f32.gmra.mrb[2].mxu0 %vm201_vm0, %v5905_v2  ;;  %v636_v2 = vld [vmem:[#allocation7 + $0x88] sm:$0xff] }
  0xd1   :  { %774 = vmatprep.mubr.f32.mxu0 %v5734_v0 }
  0xd4   :  { %4276 = vmatmul.mubr.msk.f32.gmra.mrb[4].mxu0 %vm201_vm0, %v5910_v9  ;;  %v1114_v9 = vld [vmem:[#allocation12 + $0x3e8] sm:$0xff] }
  0xd5   :  { %780 = vmatprep.mubr.f32.mxu0 %v5734_v0 }
  0xd8   :  { %4277 = vmatmul.mubr.msk.f32.gmra.mrb[6].mxu0 %vm201_vm0, %v5917_v16  ;;  %v1116_v16 = vld [vmem:[#allocation12 + $0x3f8] sm:$0xff] }
  0xd9   :  { %786 = vmatprep.mubr.f32.mxu0 %v5734_v0 }
  0xdc   :  { %4278 = vmatmul.mubr.msk.f32.gmra.mrb[8].mxu0 %vm201_vm0, %v5925_v23  ;;  %v4386_v23 = vpack.c.bf16 %v1116_v16, %v1114_v9  ;;  %v971_v9 = vld [vmem:[#allocation12 + $0x78] sm:$0xff] }
  0xdd   :  { %792 = vmatprep.mubr.f32.mxu0 %v5734_v0 }
  0xde   :  { %4387 = vmatprep.subr.bf16.mxu1 %v4386_v23 }
  0xe0   :  { %4279 = vmatmul.mubr.msk.f32.gmra.mrb[10].mxu0 %vm201_vm0, %v5933_v30  ;;  %v1113_v30 = vld [vmem:[#allocation12 + $0x3e0] sm:$0xff] }
  0xe1   :  { %798 = vmatprep.mubr.f32.mxu0 %v5734_v0 }
  0xe4   :  { %4280 = vmatmul.mubr.msk.f32.gmra.mrb[12].mxu0 %vm201_vm0, %v5941_v37  ;;  %v1115_v37 = vld [vmem:[#allocation12 + $0x3f0] sm:$0xff] }
  0xe5   :  { %804 = vmatprep.mubr.f32.mxu0 %v5734_v0  ;;  %v4388_v42 = vpack.c.bf16 %v1115_v37, %v1113_v30 }
  0xe7   :  { %4389 = vmatpush1.bf16.msra.mxu1 %v4388_v42  ;;  %v4400_v42 = vpack.c.bf16 %v966_v41, %v964_v40  ;;  %v4412_v41 = vpack.c.bf16 %v978_v31, %v976_v29 }
  0xe8   :  { %4281 = vmatmul.mubr.msk.f32.gmra.mrb[14].mxu0 %vm201_vm0, %v5949_v44  ;;  %v959_v44 = vld [vmem:[#allocation12 + $0x18] sm:$0xff] }
  0xe9   :  { %810 = vmatprep.mubr.f32.mxu0 %v5734_v0  ;;  %v4390_v45 = vpack.c.bf16 %v959_v44, %v957_v43 }
  0xeb   :  { %4391 = vmatprep.subr.bf16.mxu1 %v4390_v45  ;;  %v968_v45 = vld [vmem:[#allocation12 + $0x60] sm:$0xff] }
  0xec   :  { %4282 = vmatmul.mubr.msk.f32.gmra.mrb[16].mxu0 %vm201_vm0, %v5957_v51 }
  0xed   :  { %816 = vmatprep.mubr.f32.mxu0 %v5734_v0 }
  0xf0   :  { %4283 = vmatmul.mubr.msk.f32.gmra.mrb[18].mxu0 %vm201_vm0, %v5965_v59 }
  0xf1   :  { %822 = vmatprep.mubr.f32.mxu0 %v5734_v0 }
  0xf4   :  { %4284 = vmatmul.mubr.msk.f32.gmra.mrb[20].mxu0 %vm201_vm0, %v5973_v4 }
  0xf5   :  { %828 = vmatprep.mubr.f32.mxu0 %v5734_v0 }
  0xf8   :  { %4285 = vmatmul.mubr.msk.f32.gmra.mrb[22].mxu0 %vm201_vm0, %v5981_v12  ;;  %v956_v12 = vld [vmem:[#allocation12] sm:$0xff] }
  0xf9   :  { %834 = vmatprep.mubr.f32.mxu0 %v5734_v0  ;;  %v4392_v22 = vpack.c.bf16 %v958_v13, %v956_v12 }
  0xfc   :  { %4286 = vmatmul.mubr.msk.f32.gmra.mrb[24].mxu0 %vm201_vm0, %v5989_v20 }
  0xfd   :  { %840 = vmatprep.mubr.f32.mxu0 %v5734_v0 }
 0x100   :  { %4287 = vmatmul.mubr.msk.f32.gmra.mrb[26].mxu0 %vm201_vm0, %v158_v28 }
 0x101   :  { %846 = vmatprep.mubr.f32.mxu0 %v5734_v0 }
 0x104   :  { %4288 = vmatmul.mubr.msk.f32.gmra.mrb[28].mxu0 %vm201_vm0, %v635_v57 }
 0x105   :  { %852 = vmatprep.mubr.f32.mxu0 %v5734_v0 }
 0x108   :  { %4289 = vmatmul.mubr.msk.f32.gmra.mrb[30].mxu0 %vm201_vm0, %v636_v2  ;;  %v969_v2 = vld [vmem:[#allocation12 + $0x68] sm:$0xff] }
 0x109   :  { %2234 = vmatprep.mubr.f32.mxu0 %v5734_v0  ;;  %v4402_v44 = vpack.c.bf16 %v971_v9, %v969_v2  ;;  %v980_v2 = vld [vmem:[#allocation12 + $0xc0] sm:$0xff]  ;;  %v982_v9 = vld [vmem:[#allocation12 + $0xd0] sm:$0xff] }
 0x166   :  { %v316_v46 = vpop.f32.mrb[0].mxu1 }
 0x167   :  { %v318_v47 = vpop.f32.mrb[1].mxu1 }
 0x16a   :  { %v322_v48 = vpop.f32.mrb[2].mxu1 }
 0x16b   :  { %v324_v49 = vpop.f32.mrb[3].mxu1 }
 0x16e   :  { %v328_v50 = vpop.f32.mrb[4].mxu1 }
 0x16f   :  { %v330_v51 = vpop.f32.mrb[5].mxu1 }
 0x172   :  { %v6056_v52 = vpop.f32.mrb[6].mxu1 }
 0x173   :  { %v6058_v53 = vpop.f32.mrb[7].mxu1 }
 0x176   :  { %v6060_v54 = vpop.f32.mrb[8].mxu1 }
 0x177   :  { %v6062_v55 = vpop.f32.mrb[9].mxu1 }
 0x17a   :  { %v6064_v56 = vpop.f32.mrb[10].mxu1 }
 0x17b   :  { %v6066_v58 = vpop.f32.mrb[11].mxu1 }
 0x17e   :  { %v6068_v59 = vpop.f32.mrb[12].mxu1 }
 0x17f   :  { %v6070_v60 = vpop.f32.mrb[13].mxu1 }
 0x182   :  { %v6072_v61 = vpop.f32.mrb[14].mxu1 }
 0x183   :  { %v6074_v62 = vpop.f32.mrb[15].mxu1 }
 0x186   :  { %v6076_v63 = vpop.f32.mrb[16].mxu1 }
 0x187   :  { %v6078_v1 = vpop.f32.mrb[17].mxu1 }
 0x18a   :  { %v6080_v3 = vpop.f32.mrb[18].mxu1 }
 0x18b   :  { %v6082_v4 = vpop.f32.mrb[19].mxu1 }
 0x18e   :  { %v6084_v5 = vpop.f32.mrb[20].mxu1 }
 0x18f   :  { %v6086_v6 = vpop.f32.mrb[21].mxu1 }
 0x192   :  { %v6088_v7 = vpop.f32.mrb[22].mxu1 }
 0x193   :  { %v6090_v8 = vpop.f32.mrb[23].mxu1 }
 0x196   :  { %v6092_v10 = vpop.f32.mrb[24].mxu1 }
 0x197   :  { %v6094_v11 = vpop.f32.mrb[25].mxu1 }
 0x19a   :  { %v6098_v20 = vpop.f32.mrb[26].mxu1 }
 0x19b   :  { %v6102_v24 = vpop.f32.mrb[27].mxu1 }
 0x19e   :  { %v6108_v34 = vpop.f32.mrb[28].mxu1 }
 0x19f   :  { %v764_v14 = vpop.f32.mrb[0].mxu0  ;;  %v6112_v38 = vpop.f32.mrb[29].mxu1 }
 0x1a0   :  { %v6096_v18 = vadd.f32 %v764_v14, %v316_v46  ;;  %v766_v19 = vpop.f32.mrb[1].mxu0  ;;  %v970_v46 = vld [vmem:[#allocation12 + $0x70] sm:$0xff] }
 0x1a1   :  { %v6100_v21 = vadd.f32 %v766_v19, %v318_v47  ;;  %v4404_v13 = vpack.c.bf16 %v970_v46, %v968_v45  ;;  %v4416_v46 = vpack.c.bf16 %v982_v9, %v980_v2 }
 0x1a2   :  { %v6118_v30 = vpop.f32.mrb[30].mxu1 }
 0x1a3   :  { %v770_v28 = vpop.f32.mrb[2].mxu0  ;;  %1181 = vmatprep.mubr.f32.mxu1 %v6100_v21  ;;  %v6122_v43 = vpop.f32.mrb[31].mxu1 }
 0x1a4   :  { %v6105_v32 = vadd.f32 %v770_v28, %v322_v48  ;;  %v772_v33 = vpop.f32.mrb[3].mxu0  ;;  %1182 = vmatmul.mubr.f32.vlgmr.msra.gmra.mrb[32].mxu1 %v6096_v18  ;;  %v973_v48 = vld [vmem:[#allocation12 + $0x88] sm:$0xff] }
 0x1a5   :  { %v6110_v35 = vadd.f32 %v772_v33, %v324_v49  ;;  %4393 = vmatpush1.bf16.msra.mxu1 %v4392_v22  ;;  %v975_v49 = vld [vmem:[#allocation12 + $0x98] sm:$0xff]  ;;  %v977_v22 = vld [vmem:[#allocation12 + $0xa8] sm:$0xff] }
 0x1a6   :  { %4395 = vmatprep.subr.bf16.mxu1 %v4394_v25  ;;  %v4406_v14 = vpack.c.bf16 %v975_v49, %v973_v48  ;;  %v979_v25 = vld [vmem:[#allocation12 + $0xb8] sm:$0xff]  ;;  %v984_v48 = vld [vmem:[#allocation12 + $0xe0] sm:$0xff]  ;;  %v986_v49 = vld [vmem:[#allocation12 + $0xf0] sm:$0xff] }
 0x1a7   :  { %v776_v57 = vpop.f32.mrb[4].mxu0  ;;  %1187 = vmatprep.mubr.f32.mxu1 %v6110_v35  ;;  %v4410_v28 = vpack.c.bf16 %v979_v25, %v977_v22  ;;  %v4420_v17 = vpack.c.bf16 %v986_v49, %v984_v48  ;;  %v988_v22 = vld [vmem:[#allocation12 + $0x100] sm:$0xff]  ;;  %v990_v25 = vld [vmem:[#allocation12 + $0x110] sm:$0xff] }
 0x1a8   :  { %v6115_v16 = vadd.f32 %v776_v57, %v328_v50  ;;  %v778_v23 = vpop.f32.mrb[5].mxu0  ;;  %1188 = vmatmul.mubr.f32.gmra.mrb[34].mxu1 %v6105_v32  ;;  %v4424_v31 = vpack.c.bf16 %v990_v25, %v988_v22 }
 0x1a9   :  { %v6120_v37 = vadd.f32 %v778_v23, %v330_v51  ;;  %4397 = vmatpush1.bf16.msra.mxu1 %v4396_v36  ;;  %v981_v36 = vld [vmem:[#allocation12 + $0xc8] sm:$0xff] }
 0x1aa   :  { %4399 = vmatprep.subr.bf16.mxu1 %v4398_v39  ;;  %v983_v39 = vld [vmem:[#allocation12 + $0xd8] sm:$0xff] }
 0x1ab   :  { %v782_v47 = vpop.f32.mrb[6].mxu0  ;;  %1193 = vmatprep.mubr.f32.mxu1 %v6120_v37  ;;  %v4414_v57 = vpack.c.bf16 %v983_v39, %v981_v36  ;;  %v992_v36 = vld [vmem:[#allocation12 + $0x120] sm:$0xff]  ;;  %v994_v39 = vld [vmem:[#allocation12 + $0x130] sm:$0xff] }
 0x1ac   :  { %v6126_v50 = vadd.f32 %v782_v47, %v6056_v52  ;;  %v784_v12 = vpop.f32.mrb[7].mxu0  ;;  %1194 = vmatmul.mubr.f32.gmra.mrb[36].mxu1 %v6115_v16  ;;  %v4428_v9 = vpack.c.bf16 %v994_v39, %v992_v36 }
 0x1ad   :  { %v6130_v51 = vadd.f32 %v784_v12, %v6058_v53  ;;  %4401 = vmatpush1.bf16.msra.mxu1 %v4400_v42  ;;  %v985_v42 = vld [vmem:[#allocation12 + $0xe8] sm:$0xff] }
 0x1ae   :  { %4403 = vmatprep.subr.bf16.mxu1 %v4402_v44  ;;  %v987_v44 = vld [vmem:[#allocation12 + $0xf8] sm:$0xff] }
 0x1af   :  { %v788_v19 = vpop.f32.mrb[8].mxu0  ;;  %1199 = vmatprep.mubr.f32.mxu1 %v6130_v51  ;;  %v4418_v47 = vpack.c.bf16 %v987_v44, %v985_v42  ;;  %v996_v42 = vld [vmem:[#allocation12 + $0x140] sm:$0xff]  ;;  %v998_v44 = vld [vmem:[#allocation12 + $0x150] sm:$0xff] }
 0x1b0   :  { %v6134_v52 = vadd.f32 %v788_v19, %v6060_v54  ;;  %v790_v26 = vpop.f32.mrb[9].mxu0  ;;  %1200 = vmatmul.mubr.f32.gmra.mrb[38].mxu1 %v6126_v50  ;;  %v4432_v49 = vpack.c.bf16 %v998_v44, %v996_v42 }
 0x1b1   :  { %v6138_v53 = vadd.f32 %v790_v26, %v6062_v55  ;;  %4405 = vmatpush1.bf16.msra.mxu1 %v4404_v13  ;;  %v989_v13 = vld [vmem:[#allocation12 + $0x108] sm:$0xff] }
 0x1b2   :  { %4407 = vmatprep.subr.bf16.mxu1 %v4406_v14  ;;  %v991_v14 = vld [vmem:[#allocation12 + $0x118] sm:$0xff] }
 0x1b3   :  { %v794_v33 = vpop.f32.mrb[10].mxu0  ;;  %1205 = vmatprep.mubr.f32.mxu1 %v6138_v53  ;;  %v4422_v19 = vpack.c.bf16 %v991_v14, %v989_v13  ;;  %v1000_v13 = vld [vmem:[#allocation12 + $0x160] sm:$0xff]  ;;  %v1002_v14 = vld [vmem:[#allocation12 + $0x170] sm:$0xff] }
 0x1b4   :  { %v6142_v54 = vadd.f32 %v794_v33, %v6064_v56  ;;  %v796_v40 = vpop.f32.mrb[11].mxu0  ;;  %1206 = vmatmul.mubr.f32.gmra.mrb[40].mxu1 %v6134_v52  ;;  %v4436_v25 = vpack.c.bf16 %v1002_v14, %v1000_v13 }
 0x1b5   :  { %v6146_v55 = vadd.f32 %v796_v40, %v6066_v58  ;;  %4409 = vmatpush1.bf16.msra.mxu1 %v4408_v27  ;;  %v993_v27 = vld [vmem:[#allocation12 + $0x128] sm:$0xff] }
 0x1b6   :  { %4411 = vmatprep.subr.bf16.mxu1 %v4410_v28  ;;  %v995_v28 = vld [vmem:[#allocation12 + $0x138] sm:$0xff] }
 0x1b7   :  { %v800_v23 = vpop.f32.mrb[12].mxu0  ;;  %1211 = vmatprep.mubr.f32.mxu1 %v6146_v55  ;;  %v4426_v33 = vpack.c.bf16 %v995_v28, %v993_v27  ;;  %v1004_v27 = vld [vmem:[#allocation12 + $0x180] sm:$0xff]  ;;  %v1006_v28 = vld [vmem:[#allocation12 + $0x190] sm:$0xff] }
 0x1b8   :  { %v6150_v56 = vadd.f32 %v800_v23, %v6068_v59  ;;  %v802_v45 = vpop.f32.mrb[13].mxu0  ;;  %1212 = vmatmul.mubr.f32.gmra.mrb[42].mxu1 %v6142_v54  ;;  %v4440_v39 = vpack.c.bf16 %v1006_v28, %v1004_v27 }
 0x1b9   :  { %v6154_v58 = vadd.f32 %v802_v45, %v6070_v60  ;;  %4413 = vmatpush1.bf16.msra.mxu1 %v4412_v41  ;;  %v997_v41 = vld [vmem:[#allocation12 + $0x148] sm:$0xff] }
 0x1ba   :  { %4415 = vmatprep.subr.bf16.mxu1 %v4414_v57  ;;  %v999_v57 = vld [vmem:[#allocation12 + $0x158] sm:$0xff] }
 0x1bb   :  { %v806_v12 = vpop.f32.mrb[14].mxu0  ;;  %1217 = vmatprep.mubr.f32.mxu1 %v6154_v58  ;;  %v4430_v23 = vpack.c.bf16 %v999_v57, %v997_v41  ;;  %v1008_v41 = vld [vmem:[#allocation12 + $0x1a0] sm:$0xff]  ;;  %v1010_v57 = vld [vmem:[#allocation12 + $0x1b0] sm:$0xff] }
 0x1bc   :  { %v6158_v59 = vadd.f32 %v806_v12, %v6072_v61  ;;  %v808_v15 = vpop.f32.mrb[15].mxu0  ;;  %1218 = vmatmul.mubr.f32.gmra.mrb[44].mxu1 %v6150_v56  ;;  %v4444_v44 = vpack.c.bf16 %v1010_v57, %v1008_v41  ;;  %v1479_v41 = vld [vmem:[#allocation12 + $0x430] sm:$0xff]  ;;  %v1482_v57 = vld [vmem:[#allocation12 + $0x448] sm:$0xff] }
 0x1bd   :  { %v6162_v60 = vadd.f32 %v808_v15, %v6074_v62  ;;  %4417 = vmatpush1.bf16.msra.mxu1 %v4416_v46  ;;  %v1001_v46 = vld [vmem:[#allocation12 + $0x168] sm:$0xff] }
 0x1be   :  { %4419 = vmatprep.subr.bf16.mxu1 %v4418_v47  ;;  %v1003_v47 = vld [vmem:[#allocation12 + $0x178] sm:$0xff] }
 0x1bf   :  { %v812_v26 = vpop.f32.mrb[16].mxu0  ;;  %1223 = vmatprep.mubr.f32.mxu1 %v6162_v60  ;;  %v4434_v12 = vpack.c.bf16 %v1003_v47, %v1001_v46  ;;  %v1012_v46 = vld [vmem:[#allocation12 + $0x1c0] sm:$0xff]  ;;  %v1014_v47 = vld [vmem:[#allocation12 + $0x1d0] sm:$0xff] }
 0x1c0   :  { %v6166_v61 = vadd.f32 %v812_v26, %v6076_v63  ;;  %v814_v29 = vpop.f32.mrb[17].mxu0  ;;  %1224 = vmatmul.mubr.f32.gmra.mrb[46].mxu1 %v6158_v59  ;;  %v4448_v14 = vpack.c.bf16 %v1014_v47, %v1012_v46  ;;  %v1488_v46 = vld [vmem:[#allocation12 + $0x478] sm:$0xff] }
 0x1c1   :  { %v6170_v62 = vadd.f32 %v814_v29, %v6078_v1  ;;  %4421 = vmatpush1.bf16.msra.mxu1 %v4420_v17  ;;  %v1005_v17 = vld [vmem:[#allocation12 + $0x188] sm:$0xff] }
 0x1c2   :  { %4423 = vmatprep.subr.bf16.mxu1 %v4422_v19  ;;  %v1007_v19 = vld [vmem:[#allocation12 + $0x198] sm:$0xff] }
 0x1c3   :  { %v818_v40 = vpop.f32.mrb[18].mxu0  ;;  %1229 = vmatprep.mubr.f32.mxu1 %v6170_v62  ;;  %v4438_v26 = vpack.c.bf16 %v1007_v19, %v1005_v17  ;;  %v1016_v17 = vld [vmem:[#allocation12 + $0x1e0] sm:$0xff]  ;;  %v1018_v19 = vld [vmem:[#allocation12 + $0x1f0] sm:$0xff] }
 0x1c4   :  { %v6174_v63 = vadd.f32 %v818_v40, %v6080_v3  ;;  %v820_v2 = vpop.f32.mrb[19].mxu0  ;;  %1230 = vmatmul.mubr.f32.gmra.mrb[48].mxu1 %v6166_v61  ;;  %v4452_v28 = vpack.c.bf16 %v1018_v19, %v1016_v17  ;;  %v1489_v17 = vld [vmem:[#allocation12 + $0x480] sm:$0xff]  ;;  %v1494_v19 = vld [vmem:[#allocation12 + $0x4a8] sm:$0xff] }
 0x1c5   :  { %v6178_v1 = vadd.f32 %v820_v2, %v6082_v4  ;;  %4425 = vmatpush1.bf16.msra.mxu1 %v4424_v31  ;;  %v1009_v31 = vld [vmem:[#allocation12 + $0x1a8] sm:$0xff] }
 0x1c6   :  { %4427 = vmatprep.subr.bf16.mxu1 %v4426_v33  ;;  %v1011_v33 = vld [vmem:[#allocation12 + $0x1b8] sm:$0xff] }
 0x1c7   :  { %v824_v45 = vpop.f32.mrb[20].mxu0  ;;  %1235 = vmatprep.mubr.f32.mxu1 %v6178_v1  ;;  %v4442_v40 = vpack.c.bf16 %v1011_v33, %v1009_v31  ;;  %v1473_v31 = vld [vmem:[#allocation12 + $0x400] sm:$0xff]  ;;  %v1475_v33 = vld [vmem:[#allocation12 + $0x410] sm:$0xff] }
 0x1c8   :  { %v6182_v3 = vadd.f32 %v824_v45, %v6084_v5  ;;  %v826_v48 = vpop.f32.mrb[21].mxu0  ;;  %1236 = vmatmul.mubr.f32.gmra.mrb[50].mxu1 %v6174_v63 }
 0x1c9   :  { %v6186_v4 = vadd.f32 %v826_v48, %v6086_v6  ;;  %4429 = vmatpush1.bf16.msra.mxu1 %v4428_v9  ;;  %v1013_v9 = vld [vmem:[#allocation12 + $0x1c8] sm:$0xff] }
 0x1ca   :  { %4431 = vmatprep.subr.bf16.mxu1 %v4430_v23  ;;  %v1015_v23 = vld [vmem:[#allocation12 + $0x1d8] sm:$0xff] }
 0x1cb   :  { %v830_v15 = vpop.f32.mrb[22].mxu0  ;;  %1241 = vmatprep.mubr.f32.mxu1 %v6186_v4  ;;  %v4446_v45 = vpack.c.bf16 %v1015_v23, %v1013_v9 }
 0x1cc   :  { %v6190_v5 = vadd.f32 %v830_v15, %v6088_v7  ;;  %v832_v22 = vpop.f32.mrb[23].mxu0  ;;  %1242 = vmatmul.mubr.f32.gmra.mrb[52].mxu1 %v6182_v3 }
 0x1cd   :  { %v6194_v6 = vadd.f32 %v832_v22, %v6090_v8  ;;  %4433 = vmatpush1.bf16.msra.mxu1 %v4432_v49  ;;  %v1017_v49 = vld [vmem:[#allocation12 + $0x1e8] sm:$0xff] }
 0x1ce   :  { %4435 = vmatprep.subr.bf16.mxu1 %v4434_v12  ;;  %v1019_v12 = vld [vmem:[#allocation12 + $0x1f8] sm:$0xff] }
 0x1cf   :  { %v836_v29 = vpop.f32.mrb[24].mxu0  ;;  %1247 = vmatprep.mubr.f32.mxu1 %v6194_v6  ;;  %v4450_v15 = vpack.c.bf16 %v1019_v12, %v1017_v49  ;;  %v1485_v49 = vld [vmem:[#allocation12 + $0x460] sm:$0xff]  ;;  %v1487_v12 = vld [vmem:[#allocation12 + $0x470] sm:$0xff] }
 0x1d0   :  { %v6198_v7 = vadd.f32 %v836_v29, %v6092_v10  ;;  %v838_v36 = vpop.f32.mrb[25].mxu0  ;;  %1248 = vmatmul.mubr.f32.gmra.mrb[54].mxu1 %v6190_v5 }
 0x1d1   :  { %v6202_v8 = vadd.f32 %v838_v36, %v6094_v11  ;;  %4437 = vmatpush1.bf16.msra.mxu1 %v4436_v25  ;;  %v1474_v25 = vld [vmem:[#allocation12 + $0x408] sm:$0xff] }
 0x1d2   :  { %4439 = vmatprep.subr.bf16.mxu1 %v4438_v26  ;;  %v1476_v26 = vld [vmem:[#allocation12 + $0x418] sm:$0xff]  ;;  %v1478_v36 = vld [vmem:[#allocation12 + $0x428] sm:$0xff] }
 0x1d3   :  { %v842_v2 = vpop.f32.mrb[26].mxu0  ;;  %1253 = vmatprep.mubr.f32.mxu1 %v6202_v8  ;;  %v4454_v29 = vpack.c.bf16 %v1476_v26, %v1474_v25 }
 0x1d4   :  { %v6206_v10 = vadd.f32 %v842_v2, %v6098_v20  ;;  %v844_v42 = vpop.f32.mrb[27].mxu0  ;;  %1254 = vmatmul.mubr.f32.gmra.mrb[56].mxu1 %v6198_v7  ;;  %v1484_v2 = vld [vmem:[#allocation12 + $0x458] sm:$0xff] }
 0x1d5   :  { %v6210_v11 = vadd.f32 %v844_v42, %v6102_v24  ;;  %4441 = vmatpush1.bf16.msra.mxu1 %v4440_v39  ;;  %v1480_v39 = vld [vmem:[#allocation12 + $0x438] sm:$0xff]  ;;  %v4462_v23 = vpack.c.bf16 %v1484_v2, %v1482_v57  ;;  %v1481_v42 = vld [vmem:[#allocation12 + $0x440] sm:$0xff] }
 0x1d6   :  { %4443 = vmatprep.subr.bf16.mxu1 %v4442_v40  ;;  %v4458_v40 = vpack.c.bf16 %v1480_v39, %v1478_v36  ;;  %v1497_v39 = vld [vmem:[#allocation12 + $0x4c0] sm:$0xff] }
 0x1d7   :  { %v848_v48 = vpop.f32.mrb[28].mxu0  ;;  %1259 = vmatprep.mubr.f32.mxu1 %v6210_v11  ;;  %v1501_v2 = vld [vmem:[#allocation12 + $0x4e0] sm:$0xff] }
 0x1d8   :  { %v6214_v20 = vadd.f32 %v848_v48, %v6108_v34  ;;  %v850_v13 = vpop.f32.mrb[29].mxu0  ;;  %1260 = vmatmul.mubr.f32.gmra.mrb[58].mxu1 %v6206_v10 }
 0x1d9   :  { %v6218_v24 = vadd.f32 %v850_v13, %v6112_v38  ;;  %4445 = vmatpush1.bf16.msra.mxu1 %v4444_v44  ;;  %v1483_v44 = vld [vmem:[#allocation12 + $0x450] sm:$0xff]  ;;  %v1490_v13 = vld [vmem:[#allocation12 + $0x488] sm:$0xff] }
 0x1da   :  { %4447 = vmatprep.subr.bf16.mxu1 %v4446_v45  ;;  %v1486_v45 = vld [vmem:[#allocation12 + $0x468] sm:$0xff]  ;;  %v4464_v47 = vpack.c.bf16 %v1483_v44, %v1481_v42  ;;  %v1508_v42 = vld [vmem:[#allocation12 + $0x518] sm:$0xff] }
 0x1db   :  { %v854_v22 = vpop.f32.mrb[30].mxu0  ;;  %1265 = vmatprep.mubr.f32.mxu1 %v6218_v24  ;;  %v4466_v48 = vpack.c.bf16 %v1488_v46, %v1486_v45  ;;  %v1505_v46 = vld [vmem:[#allocation12 + $0x500] sm:$0xff] }
 0x1dc   :  { %v6222_v34 = vadd.f32 %v854_v22, %v6118_v30  ;;  %v856_v27 = vpop.f32.mrb[31].mxu0  ;;  %1266 = vmatmul.mubr.f32.gmra.mrb[60].mxu1 %v6214_v20  ;;  %v4456_v30 = vpack.c.bf16 %v1475_v33, %v1473_v31  ;;  %v1496_v22 = vld [vmem:[#allocation12 + $0x4b8] sm:$0xff] }
 0x1dd   :  { %v6226_v38 = vadd.f32 %v856_v27, %v6122_v43  ;;  %4449 = vmatpush1.bf16.msra.mxu1 %v4448_v14  ;;  %v1477_v43 = vld [vmem:[#allocation12 + $0x420] sm:$0xff]  ;;  %v4468_v14 = vpack.c.bf16 %v1487_v12, %v1485_v49  ;;  %v4474_v26 = vpack.c.bf16 %v1496_v22, %v1494_v19  ;;  %v1500_v31 = vld [vmem:[#allocation12 + $0x4d8] sm:$0xff] }
 0x1de   :  { %4451 = vmatprep.subr.bf16.mxu1 %v4450_v15  ;;  %v4460_v9 = vpack.c.bf16 %v1479_v41, %v1477_v43  ;;  %v1493_v27 = vld [vmem:[#allocation12 + $0x4a0] sm:$0xff]  ;;  %v1504_v43 = vld [vmem:[#allocation12 + $0x4f8] sm:$0xff] }
 0x1df   :  { %1271 = vmatprep.mubr.f32.mxu1 %v6226_v38  ;;  %v1512_v49 = vld [vmem:[#allocation12 + $0x538] sm:$0xff]  ;;  %v1513_v22 = vld [vmem:[#allocation12 + $0x540] sm:$0xff] }
 0x1e0   :  { %1272 = vmatmul.mubr.f32.gmra.mrb[62].mxu1 %v6222_v34 }
 0x1e1   :  { %4453 = vmatpush1.bf16.msra.mxu1 %v4452_v28  ;;  %1342 = vmatprep.mubr.f32.mxu1 %v5734_v0  ;;  %v1495_v28 = vld [vmem:[#allocation12 + $0x4b0] sm:$0xff] }
 0x1e2   :  { %4455 = vmatprep.subr.bf16.mxu1 %v4454_v29  ;;  %v1498_v29 = vld [vmem:[#allocation12 + $0x4c8] sm:$0xff]  ;;  %v4476_v33 = vpack.c.bf16 %v1495_v28, %v1493_v27  ;;  %v1520_v27 = vld [vmem:[#allocation12 + $0x578] sm:$0xff] }
 0x1e3   :  { %v4478_v36 = vpack.c.bf16 %v1500_v31, %v1498_v29  ;;  %v1517_v31 = vld [vmem:[#allocation12 + $0x560] sm:$0xff] }
 0x1e4   :  { %1343 = vmatmul.mubr.f32.vlgmr.msra.gmra.mrb[32].mxu1 %v5734_v0 }
 0x1e5   :  { %1348 = vmatprep.mubr.f32.mxu1 %v6100_v21  ;;  %4457 = vmatpush1.bf16.msra.mxu1 %v4456_v30  ;;  %v1492_v21 = vld [vmem:[#allocation12 + $0x498] sm:$0xff]  ;;  %v1499_v30 = vld [vmem:[#allocation12 + $0x4d0] sm:$0xff] }
 0x1e6   :  { %4459 = vmatprep.subr.bf16.mxu1 %v4458_v40  ;;  %v4470_v15 = vpack.c.bf16 %v1492_v21, %v1490_v13  ;;  %v1502_v40 = vld [vmem:[#allocation12 + $0x4e8] sm:$0xff]  ;;  %v4480_v41 = vpack.c.bf16 %v1499_v30, %v1497_v39  ;;  %v1509_v21 = vld [vmem:[#allocation12 + $0x520] sm:$0xff]  ;;  %v1524_v39 = vld [vmem:[#allocation12 + $0x598] sm:$0xff] }
 0x1e7   :  { %v4482_v57 = vpack.c.bf16 %v1504_v43, %v1502_v40  ;;  %v1521_v43 = vld [vmem:[#allocation12 + $0x580] sm:$0xff] }
 0x1e8   :  { %1349 = vmatmul.mubr.f32.gmra.mrb[34].mxu1 %v6096_v18  ;;  %v1491_v18 = vld [vmem:[#allocation12 + $0x490] sm:$0xff] }
 0x1e9   :  { %1354 = vmatprep.mubr.f32.mxu1 %v6110_v35  ;;  %4461 = vmatpush1.bf16.msra.mxu1 %v4460_v9  ;;  %v4472_v25 = vpack.c.bf16 %v1491_v18, %v1489_v17  ;;  %v1503_v9 = vld [vmem:[#allocation12 + $0x4f0] sm:$0xff]  ;;  %v1516_v17 = vld [vmem:[#allocation12 + $0x558] sm:$0xff] }
 0x1ea   :  { %4463 = vmatprep.subr.bf16.mxu1 %v4462_v23  ;;  %v1506_v23 = vld [vmem:[#allocation12 + $0x508] sm:$0xff]  ;;  %v4484_v44 = vpack.c.bf16 %v1503_v9, %v1501_v2  ;;  %v1528_v2 = vld [vmem:[#allocation12 + $0x5b8] sm:$0xff] }
 0x1eb   :  { %v4486_v45 = vpack.c.bf16 %v1508_v42, %v1506_v23  ;;  %v1525_v42 = vld [vmem:[#allocation12 + $0x5a0] sm:$0xff] }
 0x1ec   :  { %1355 = vmatmul.mubr.f32.gmra.mrb[36].mxu1 %v6105_v32 }
 0x1ed   :  { %1360 = vmatprep.mubr.f32.mxu1 %v6120_v37  ;;  %4465 = vmatpush1.bf16.msra.mxu1 %v4464_v47  ;;  %v1507_v47 = vld [vmem:[#allocation12 + $0x510] sm:$0xff] }
 0x1ee   :  { %4467 = vmatprep.subr.bf16.mxu1 %v4466_v48  ;;  %v1510_v48 = vld [vmem:[#allocation12 + $0x528] sm:$0xff]  ;;  %v4488_v12 = vpack.c.bf16 %v1507_v47, %v1505_v46  ;;  %v1532_v46 = vld [vmem:[#allocation12 + $0x5d8] sm:$0xff] }
 0x1ef   :  { %v4490_v13 = vpack.c.bf16 %v1512_v49, %v1510_v48  ;;  %v1529_v49 = vld [vmem:[#allocation12 + $0x5c0] sm:$0xff] }
 0x1f0   :  { %1361 = vmatmul.mubr.f32.gmra.mrb[38].mxu1 %v6115_v16 }
 0x1f1   :  { %1366 = vmatprep.mubr.f32.mxu1 %v6130_v51  ;;  %4469 = vmatpush1.bf16.msra.mxu1 %v4468_v14  ;;  %v1511_v14 = vld [vmem:[#allocation12 + $0x530] sm:$0xff] }
 0x1f2   :  { %4471 = vmatprep.subr.bf16.mxu1 %v4470_v15  ;;  %v1514_v15 = vld [vmem:[#allocation12 + $0x548] sm:$0xff]  ;;  %v4492_v18 = vpack.c.bf16 %v1511_v14, %v1509_v21  ;;  %v1536_v21 = vld [vmem:[#allocation12 + $0x5f8] sm:$0xff] }
 0x1f3   :  { %v4494_v19 = vpack.c.bf16 %v1516_v17, %v1514_v15  ;;  %v1533_v17 = vld [vmem:[#allocation12 + $0x5e0] sm:$0xff] }
 0x1f4   :  { %1367 = vmatmul.mubr.f32.gmra.mrb[40].mxu1 %v6126_v50 }
 0x1f5   :  { %1372 = vmatprep.mubr.f32.mxu1 %v6138_v53  ;;  %4473 = vmatpush1.bf16.msra.mxu1 %v4472_v25  ;;  %v1515_v25 = vld [vmem:[#allocation12 + $0x550] sm:$0xff] }
 0x1f6   :  { %4475 = vmatprep.subr.bf16.mxu1 %v4474_v26  ;;  %v1518_v26 = vld [vmem:[#allocation12 + $0x568] sm:$0xff]  ;;  %v4496_v28 = vpack.c.bf16 %v1515_v25, %v1513_v22 }
 0x1f7   :  { %v4498_v29 = vpack.c.bf16 %v1520_v27, %v1518_v26 }
 0x1f8   :  { %1373 = vmatmul.mubr.f32.gmra.mrb[42].mxu1 %v6134_v52 }
 0x1f9   :  { %1378 = vmatprep.mubr.f32.mxu1 %v6146_v55  ;;  %4477 = vmatpush1.bf16.msra.mxu1 %v4476_v33  ;;  %v1519_v33 = vld [vmem:[#allocation12 + $0x570] sm:$0xff] }
 0x1fa   :  { %4479 = vmatprep.subr.bf16.mxu1 %v4478_v36  ;;  %v1522_v36 = vld [vmem:[#allocation12 + $0x588] sm:$0xff]  ;;  %v4500_v30 = vpack.c.bf16 %v1519_v33, %v1517_v31 }
 0x1fb   :  { %v4502_v40 = vpack.c.bf16 %v1524_v39, %v1522_v36 }
 0x1fc   :  { %1379 = vmatmul.mubr.f32.gmra.mrb[44].mxu1 %v6142_v54 }
 0x1fd   :  { %1384 = vmatprep.mubr.f32.mxu1 %v6154_v58  ;;  %4481 = vmatpush1.bf16.msra.mxu1 %v4480_v41  ;;  %v1523_v41 = vld [vmem:[#allocation12 + $0x590] sm:$0xff] }
 0x1fe   :  { %4483 = vmatprep.subr.bf16.mxu1 %v4482_v57  ;;  %v1526_v57 = vld [vmem:[#allocation12 + $0x5a8] sm:$0xff]  ;;  %v4504_v9 = vpack.c.bf16 %v1523_v41, %v1521_v43 }
 0x1ff   :  { %v4506_v23 = vpack.c.bf16 %v1528_v2, %v1526_v57 }
 0x200   :  { %1385 = vmatmul.mubr.f32.gmra.mrb[46].mxu1 %v6150_v56 }
 0x201   :  { %1390 = vmatprep.mubr.f32.mxu1 %v6162_v60  ;;  %4485 = vmatpush1.bf16.msra.mxu1 %v4484_v44  ;;  %v1527_v44 = vld [vmem:[#allocation12 + $0x5b0] sm:$0xff] }
 0x202   :  { %4487 = vmatprep.subr.bf16.mxu1 %v4486_v45  ;;  %v1530_v45 = vld [vmem:[#allocation12 + $0x5c8] sm:$0xff]  ;;  %v4508_v47 = vpack.c.bf16 %v1527_v44, %v1525_v42 }
 0x203   :  { %v4510_v48 = vpack.c.bf16 %v1532_v46, %v1530_v45 }
 0x204   :  { %1391 = vmatmul.mubr.f32.gmra.mrb[48].mxu1 %v6158_v59 }
 0x205   :  { %1396 = vmatprep.mubr.f32.mxu1 %v6170_v62  ;;  %4489 = vmatpush1.bf16.msra.mxu1 %v4488_v12  ;;  %v1531_v12 = vld [vmem:[#allocation12 + $0x5d0] sm:$0xff] }
 0x206   :  { %4491 = vmatprep.subr.bf16.mxu1 %v4490_v13  ;;  %v1534_v13 = vld [vmem:[#allocation12 + $0x5e8] sm:$0xff]  ;;  %v4512_v14 = vpack.c.bf16 %v1531_v12, %v1529_v49 }
 0x207   :  { %v4514_v15 = vpack.c.bf16 %v1536_v21, %v1534_v13  ;;  %v2139_v13 = vld [vmem:[#allocation13 + $0x108] sm:$0xff]  ;;  %v2141_v21 = vld [vmem:[#allocation13 + $0x118] sm:$0xff] }
 0x208   :  { %1397 = vmatmul.mubr.f32.gmra.mrb[50].mxu1 %v6166_v61 }
 0x209   :  { %1402 = vmatprep.mubr.f32.mxu1 %v6178_v1  ;;  %4493 = vmatpush1.bf16.msra.mxu1 %v4492_v18  ;;  %v1535_v18 = vld [vmem:[#allocation12 + $0x5f0] sm:$0xff] }
 0x20a   :  { %4495 = vmatprep.subr.bf16.mxu1 %v4494_v19  ;;  %v4516_v19 = vpack.c.bf16 %v1535_v18, %v1533_v17  ;;  %v2140_v17 = vld [vmem:[#allocation13 + $0x110] sm:$0xff]  ;;  %v2143_v18 = vld [vmem:[#allocation13 + $0x128] sm:$0xff] }
 0x20c   :  { %1403 = vmatmul.mubr.f32.gmra.mrb[52].mxu1 %v6174_v63 }
 0x20d   :  { %1408 = vmatprep.mubr.f32.mxu1 %v6186_v4  ;;  %4497 = vmatpush1.bf16.msra.mxu1 %v4496_v28 }
 0x20e   :  { %4499 = vmatprep.subr.bf16.mxu1 %v4498_v29 }
 0x210   :  { %1409 = vmatmul.mubr.f32.gmra.mrb[54].mxu1 %v6182_v3 }
 0x211   :  { %1414 = vmatprep.mubr.f32.mxu1 %v6194_v6  ;;  %4501 = vmatpush1.bf16.msra.mxu1 %v4500_v30 }
 0x212   :  { %4503 = vmatprep.subr.bf16.mxu1 %v4502_v40 }
 0x214   :  { %1415 = vmatmul.mubr.f32.gmra.mrb[56].mxu1 %v6190_v5 }
 0x215   :  { %1420 = vmatprep.mubr.f32.mxu1 %v6202_v8  ;;  %4505 = vmatpush1.bf16.msra.mxu1 %v4504_v9 }
 0x216   :  { %4507 = vmatprep.subr.bf16.mxu1 %v4506_v23 }
 0x218   :  { %1421 = vmatmul.mubr.f32.gmra.mrb[58].mxu1 %v6198_v7 }
 0x219   :  { %1426 = vmatprep.mubr.f32.mxu1 %v6210_v11  ;;  %4509 = vmatpush1.bf16.msra.mxu1 %v4508_v47 }
 0x21a   :  { %4511 = vmatprep.subr.bf16.mxu1 %v4510_v48 }
 0x21c   :  { %1427 = vmatmul.mubr.f32.gmra.mrb[60].mxu1 %v6206_v10 }
 0x21d   :  { %1432 = vmatprep.mubr.f32.mxu1 %v6218_v24  ;;  %4513 = vmatpush1.bf16.msra.mxu1 %v4512_v14  ;;  %v2138_v14 = vld [vmem:[#allocation13 + $0x100] sm:$0xff] }
 0x21e   :  { %4515 = vmatprep.subr.bf16.mxu1 %v4514_v15  ;;  %v4518_v15 = vpack.c.bf16 %v2141_v21, %v2139_v13 }
 0x220   :  { %1433 = vmatmul.mubr.f32.gmra.mrb[62].mxu1 %v6214_v20  ;;  %4519 = vmatprep.subr.bf16.mxu0 %v4518_v15 }
 0x221   :  { %4517 = vmatpush1.bf16.msra.mxu1 %v4516_v19  ;;  %1601 = vmatprep.mubr.f32.mxu1 %v6110_v35  ;;  %v2145_v19 = vld [vmem:[#allocation13 + $0x138] sm:$0xff] }
 0x224   :  { %1602 = vmatmul.mubr.f32.vlgmr.msra.gmra.mrb[32].mxu1 %v6105_v32 }
 0x225   :  { %1607 = vmatprep.mubr.f32.mxu1 %v6120_v37 }
 0x228   :  { %1608 = vmatmul.mubr.f32.gmra.mrb[34].mxu1 %v6115_v16 }
 0x229   :  { %1613 = vmatprep.mubr.f32.mxu1 %v6130_v51 }
 0x22c   :  { %1614 = vmatmul.mubr.f32.gmra.mrb[36].mxu1 %v6126_v50 }
 0x22d   :  { %1619 = vmatprep.mubr.f32.mxu1 %v6138_v53 }
 0x230   :  { %1620 = vmatmul.mubr.f32.gmra.mrb[38].mxu1 %v6134_v52 }
 0x231   :  { %1625 = vmatprep.mubr.f32.mxu1 %v6146_v55 }
 0x234   :  { %1626 = vmatmul.mubr.f32.gmra.mrb[40].mxu1 %v6142_v54 }
 0x235   :  { %1631 = vmatprep.mubr.f32.mxu1 %v6154_v58 }
 0x238   :  { %1632 = vmatmul.mubr.f32.gmra.mrb[42].mxu1 %v6150_v56 }
 0x239   :  { %1637 = vmatprep.mubr.f32.mxu1 %v6162_v60 }
 0x23c   :  { %1638 = vmatmul.mubr.f32.gmra.mrb[44].mxu1 %v6158_v59 }
 0x23d   :  { %1643 = vmatprep.mubr.f32.mxu1 %v6170_v62 }
 0x240   :  { %1644 = vmatmul.mubr.f32.gmra.mrb[46].mxu1 %v6166_v61 }
 0x241   :  { %1649 = vmatprep.mubr.f32.mxu1 %v6178_v1 }
 0x244   :  { %1650 = vmatmul.mubr.f32.gmra.mrb[48].mxu1 %v6174_v63 }
 0x245   :  { %1655 = vmatprep.mubr.f32.mxu1 %v6186_v4 }
 0x248   :  { %1656 = vmatmul.mubr.f32.gmra.mrb[50].mxu1 %v6182_v3 }
 0x249   :  { %1661 = vmatprep.mubr.f32.mxu1 %v6194_v6 }
 0x24c   :  { %1662 = vmatmul.mubr.f32.gmra.mrb[52].mxu1 %v6190_v5 }
 0x24d   :  { %1667 = vmatprep.mubr.f32.mxu1 %v6202_v8 }
 0x250   :  { %1668 = vmatmul.mubr.f32.gmra.mrb[54].mxu1 %v6198_v7 }
 0x251   :  { %1673 = vmatprep.mubr.f32.mxu1 %v6210_v11 }
 0x254   :  { %1674 = vmatmul.mubr.f32.gmra.mrb[56].mxu1 %v6206_v10 }
 0x255   :  { %1679 = vmatprep.mubr.f32.mxu1 %v6218_v24 }
 0x258   :  { %1680 = vmatmul.mubr.f32.gmra.mrb[58].mxu1 %v6214_v20 }
 0x259   :  { %1685 = vmatprep.mubr.f32.mxu1 %v6226_v38 }
 0x25c   :  { %1686 = vmatmul.mubr.f32.gmra.mrb[60].mxu1 %v6222_v34 }
 0x25d   :  { %1691 = vmatprep.mubr.f32.mxu1 %v5734_v0 }
 0x260   :  { %1692 = vmatmul.mubr.f32.gmra.mrb[62].mxu1 %v5734_v0 }
 0x2f7   :  { %v1603_v32 = vpop.f32.mrb[32].mxu1 }
 0x2f8   :  { %v1605_v35 = vpop.f32.mrb[33].mxu1 }
 0x2fb   :  { %v1609_v16 = vpop.f32.mrb[34].mxu1 }
 0x2fc   :  { %v6294_v37 = vmax.f32 %v1603_v32, %v1609_v16  ;;  %v1611_v50 = vpop.f32.mrb[35].mxu1  ;;  %v4520_v32 = vpack.c.bf16 %v2140_v17, %v2138_v14  ;;  %v2142_v16 = vld [vmem:[#allocation13 + $0x120] sm:$0xff] }
 0x2fd   :  { %v6296_v51 = vmax.f32 %v1605_v35, %v1611_v50  ;;  %v4522_v35 = vpack.c.bf16 %v2145_v19, %v2143_v18  ;;  %v2144_v50 = vld [vmem:[#allocation13 + $0x130] sm:$0xff]  ;;  %v2167_v18 = vld [vmem:[#allocation13 + $0x1e8] sm:$0xff]  ;;  %v2169_v19 = vld [vmem:[#allocation13 + $0x1f8] sm:$0xff] }
 0x2fe   :  { %4521 = vmatpush1.bf16.msra.mxu0 %v4520_v32  ;;  %v2166_v32 = vld [vmem:[#allocation13 + $0x1e0] sm:$0xff] }
 0x2ff   :  { %v1615_v52 = vpop.f32.mrb[36].mxu1  ;;  %v5337_v53 = vpack.i.bf16 %v6296_v51, %v6294_v37  ;;  %4523 = vmatprep.subr.bf16.mxu0 %v4522_v35  ;;  %v2168_v35 = vld [vmem:[#allocation13 + $0x1f0] sm:$0xff] }
 0x300   :  { %v1617_v54 = vpop.f32.mrb[37].mxu1 }
 0x301   :  { %5338 = vrot.lane.b32.xlu0 %v5337_v53, %s5735_s6  ;;  %v2149_v53 = vld [vmem:[#allocation13 + $0x158] sm:$0xff] }
 0x303   :  { %v1621_v55 = vpop.f32.mrb[38].mxu1 }
 0x304   :  { %v6301_v56 = vmax.f32 %v1615_v52, %v1621_v55  ;;  %v1623_v58 = vpop.f32.mrb[39].mxu1  ;;  %v2147_v52 = vld [vmem:[#allocation13 + $0x148] sm:$0xff] }
 0x305   :  { %v6303_v59 = vmax.f32 %v1617_v54, %v1623_v58  ;;  %v4524_v54 = vpack.c.bf16 %v2144_v50, %v2142_v16  ;;  %v4526_v55 = vpack.c.bf16 %v2149_v53, %v2147_v52  ;;  %v2146_v58 = vld [vmem:[#allocation13 + $0x140] sm:$0xff] }
 0x307   :  { %v5342_v60 = vpack.i.bf16 %v6303_v59, %v6301_v56  ;;  %v1627_v61 = vpop.f32.mrb[40].mxu1  ;;  %4525 = vmatpush1.bf16.msra.mxu0 %v4524_v54 }
 0x308   :  { %v1629_v62 = vpop.f32.mrb[41].mxu1  ;;  %4527 = vmatprep.subr.bf16.mxu0 %v4526_v55 }
 0x309   :  { %5343 = vrot.lane.b32.xlu0 %v5342_v60, %s5735_s6  ;;  %v2148_v60 = vld [vmem:[#allocation13 + $0x150] sm:$0xff] }
 0x30b   :  { %v1633_v63 = vpop.f32.mrb[42].mxu1 }
 0x30c   :  { %v6308_v1 = vmax.f32 %v1627_v61, %v1633_v63  ;;  %v1635_v3 = vpop.f32.mrb[43].mxu1  ;;  %v2151_v61 = vld [vmem:[#allocation13 + $0x168] sm:$0xff]  ;;  %v4528_v63 = vpack.c.bf16 %v2148_v60, %v2146_v58 }
 0x30d   :  { %v6310_v4 = vmax.f32 %v1629_v62, %v1635_v3  ;;  %v2153_v62 = vld [vmem:[#allocation13 + $0x178] sm:$0xff] }
 0x30e   :  { %v4530_v3 = vpack.c.bf16 %v2153_v62, %v2151_v61  ;;  %4529 = vmatpush1.bf16.msra.mxu0 %v4528_v63 }
 0x30f   :  { %v1639_v5 = vpop.f32.mrb[44].mxu1  ;;  %v5347_v6 = vpack.i.bf16 %v6310_v4, %v6308_v1 }
 0x310   :  { %v1641_v7 = vpop.f32.mrb[45].mxu1  ;;  %4531 = vmatprep.subr.bf16.mxu0 %v4530_v3 }
 0x311   :  { %5348 = vrot.lane.b32.xlu1 %v5347_v6, %s5735_s6  ;;  %v2152_v6 = vld [vmem:[#allocation13 + $0x170] sm:$0xff] }
 0x313   :  { %v1645_v8 = vpop.f32.mrb[46].mxu1 }
 0x314   :  { %v6315_v10 = vmax.f32 %v1639_v5, %v1645_v8  ;;  %v1647_v11 = vpop.f32.mrb[47].mxu1  ;;  %v2150_v5 = vld [vmem:[#allocation13 + $0x160] sm:$0xff]  ;;  %v2155_v8 = vld [vmem:[#allocation13 + $0x188] sm:$0xff] }
 0x315   :  { %v6317_v20 = vmax.f32 %v1641_v7, %v1647_v11  ;;  %v4532_v7 = vpack.c.bf16 %v2152_v6, %v2150_v5  ;;  %v2157_v11 = vld [vmem:[#allocation13 + $0x198] sm:$0xff]  ;;  %v2098_v5 = vld [vmem:[#allocation13 + $0x8] sm:$0xff] }
 0x316   :  { %v2100_v6 = vld [vmem:[#allocation13 + $0x18] sm:$0xff] }
 0x317   :  { %v5352_v24 = vpack.i.bf16 %v6317_v20, %v6315_v10  ;;  %v1651_v34 = vpop.f32.mrb[48].mxu1  ;;  %4533 = vmatpush1.bf16.msra.mxu0 %v4532_v7 }
 0x318   :  { %v1653_v38 = vpop.f32.mrb[49].mxu1 }
 0x319   :  { %5353 = vrot.lane.b32.xlu1 %v5352_v24, %s5735_s6  ;;  %v4534_v24 = vpack.c.bf16 %v2157_v11, %v2155_v8  ;;  %v4550_v8 = vpack.c.bf16 %v2100_v6, %v2098_v5 }
 0x31b   :  { %v1657_v22 = vpop.f32.mrb[50].mxu1  ;;  %4535 = vmatprep.subr.bf16.mxu0 %v4534_v24 }
 0x31c   :  { %v6322_v25 = vmax.f32 %v1651_v34, %v1657_v22  ;;  %v1659_v26 = vpop.f32.mrb[51].mxu1  ;;  %v2154_v34 = vld [vmem:[#allocation13 + $0x180] sm:$0xff] }
 0x31d   :  { %v6324_v27 = vmax.f32 %v1653_v38, %v1659_v26  ;;  %v2156_v38 = vld [vmem:[#allocation13 + $0x190] sm:$0xff] }
 0x31e   :  { %v4536_v22 = vpack.c.bf16 %v2156_v38, %v2154_v34 }
 0x31f   :  { %v5357_v28 = vpack.i.bf16 %v6324_v27, %v6322_v25  ;;  %v1663_v29 = vpop.f32.mrb[52].mxu1 }
 0x320   :  { %v1665_v31 = vpop.f32.mrb[53].mxu1  ;;  %4537 = vmatpush1.bf16.msra.mxu0 %v4536_v22 }
 0x321   :  { %5358 = vrot.lane.b32.xlu0 %v5357_v28, %s5735_s6  ;;  %v2159_v28 = vld [vmem:[#allocation13 + $0x1a8] sm:$0xff] }
 0x323   :  { %v1669_v33 = vpop.f32.mrb[54].mxu1 }
 0x324   :  { %v6329_v36 = vmax.f32 %v1663_v29, %v1669_v33  ;;  %v1671_v39 = vpop.f32.mrb[55].mxu1  ;;  %v2161_v29 = vld [vmem:[#allocation13 + $0x1b8] sm:$0xff]  ;;  %v2158_v33 = vld [vmem:[#allocation13 + $0x1a0] sm:$0xff] }
 0x325   :  { %v6331_v30 = vmax.f32 %v1665_v31, %v1671_v39  ;;  %v4538_v31 = vpack.c.bf16 %v2161_v29, %v2159_v28  ;;  %v2160_v39 = vld [vmem:[#allocation13 + $0x1b0] sm:$0xff] }
 0x327   :  { %v5362_v40 = vpack.i.bf16 %v6331_v30, %v6329_v36  ;;  %v1675_v43 = vpop.f32.mrb[56].mxu1  ;;  %4539 = vmatprep.subr.bf16.mxu0 %v4538_v31 }
 0x328   :  { %v1677_v41 = vpop.f32.mrb[57].mxu1 }
 0x329   :  { %5363 = vrot.lane.b32.xlu1 %v5362_v40, %s5735_s6 }
 0x32b   :  { %v1681_v57 = vpop.f32.mrb[58].mxu1 }
 0x32c   :  { %v6336_v2 = vmax.f32 %v1675_v43, %v1681_v57  ;;  %v1683_v9 = vpop.f32.mrb[59].mxu1  ;;  %v4540_v43 = vpack.c.bf16 %v2160_v39, %v2158_v33 }
 0x32d   :  { %v6338_v23 = vmax.f32 %v1677_v41, %v1683_v9 }
 0x32e   :  { %4541 = vmatpush1.bf16.msra.mxu0 %v4540_v43 }
 0x32f   :  { %v5367_v42 = vpack.i.bf16 %v6338_v23, %v6336_v2  ;;  %v1687_v44 = vpop.f32.mrb[60].mxu1 }
 0x330   :  { %v1689_v45 = vpop.f32.mrb[61].mxu1 }
 0x331   :  { %5368 = vrot.lane.b32.xlu0 %v5367_v42, %s5735_s6  ;;  %v2163_v42 = vld [vmem:[#allocation13 + $0x1c8] sm:$0xff] }
 0x333   :  { %v1693_v46 = vpop.f32.mrb[62].mxu1 }
 0x334   :  { %v6343_v47 = vmax.f32 %v1687_v44, %v1693_v46  ;;  %v1695_v48 = vpop.f32.mrb[63].mxu1  ;;  %v2165_v44 = vld [vmem:[#allocation13 + $0x1d8] sm:$0xff]  ;;  %v2162_v46 = vld [vmem:[#allocation13 + $0x1c0] sm:$0xff] }
 0x335   :  { %v6345_v49 = vmax.f32 %v1689_v45, %v1695_v48  ;;  %v4542_v45 = vpack.c.bf16 %v2165_v44, %v2163_v42  ;;  %v2164_v48 = vld [vmem:[#allocation13 + $0x1d0] sm:$0xff] }
 0x336   :  { %v4544_v14 = vpack.c.bf16 %v2164_v48, %v2162_v46 }
 0x337   :  { %v5372_v12 = vpack.i.bf16 %v6345_v49, %v6343_v47  ;;  %4543 = vmatprep.subr.bf16.mxu0 %v4542_v45 }
 0x338   :  { %4545 = vmatpush1.bf16.msra.mxu0 %v4544_v14 }
 0x339   :  { %5373 = vrot.lane.b32.xlu1 %v5372_v12, %s5735_s6 }
 0x373   :  { %v5339_v26 = vpop.permute.xlu0 %5338 }
 0x374   :  { %v5340_v40 = vunpack.i.l.bf16 %v5339_v26  ;;  %v5341_v12 = vunpack.i.h.bf16 %v5339_v26 }
 0x376   :  { %v6351_v13 = vmax.f32 %v6294_v37, %v5340_v40  ;;  %v1818_v16 = vmax.f32 %v6296_v51, %v5341_v12  ;;  %v4546_v37 = vpack.c.bf16 %v2169_v19, %v2167_v18  ;;  %v2681_v18 = vld [vmem:[#allocation15 + $0x200] sm:$0xff] }
 0x378   :  { %4547 = vmatprep.subr.bf16.mxu0 %v4546_v37  ;;  %v2686_v37 = vld [vmem:[#allocation15 + $0x228] sm:$0xff] }
 0x37b   :  { %v5344_v41 = vpop.permute.xlu0 %5343 }
 0x37c   :  { %v5346_v57 = vunpack.i.h.bf16 %v5344_v41  ;;  %v5345_v9 = vunpack.i.l.bf16 %v5344_v41 }
 0x37e   :  { %v6354_v21 = vmax.f32 %v6301_v56, %v5345_v9  ;;  %v1819_v15 = vmax.f32 %v6303_v59, %v5346_v57  ;;  %v4548_v56 = vpack.c.bf16 %v2168_v35, %v2166_v32 }
 0x380   :  { %v5377_v17 = vpack.i.bf16 %v6354_v21, %v6351_v13  ;;  %v5392_v50 = vpack.i.bf16 %v1819_v15, %v1818_v16  ;;  %4549 = vmatpush1.bf16.msra.mxu0 %v4548_v56  ;;  %v2682_v15 = vld [vmem:[#allocation15 + $0x208] sm:$0xff]  ;;  %v2683_v16 = vld [vmem:[#allocation15 + $0x210] sm:$0xff]  ;;  %v2688_v56 = vld [vmem:[#allocation15 + $0x238] sm:$0xff] }
 0x381   :  { %4551 = vmatprep.subr.bf16.mxu0 %v4550_v8 }
 0x382   :  { %5378 = vrot.lane.b32.xlu0 %v5377_v17, %s5735_s6  ;;  %5383 = vrot.lane.b32.xlu1 %v5377_v17, %s5736_s11 }
 0x383   :  { %v5349_v59 = vpop.permute.xlu1 %5348 }
 0x384   :  { %v5350_v52 = vunpack.i.l.bf16 %v5349_v59  ;;  %v5351_v55 = vunpack.i.h.bf16 %v5349_v59  ;;  %v4618_v59 = vpack.c.bf16 %v2688_v56, %v2686_v37 }
 0x386   :  { %5388 = vrot.lane.b32.xlu0 %v5377_v17, %s5737_s0  ;;  %5393 = vrot.lane.b32.xlu1 %v5392_v50, %s5738_s17  ;;  %v6367_v58 = vmax.f32 %v6308_v1, %v5350_v52  ;;  %v1820_v63 = vmax.f32 %v6310_v4, %v5351_v55  ;;  %v2684_v17 = vld [vmem:[#allocation15 + $0x218] sm:$0xff]  ;;  %v2685_v52 = vld [vmem:[#allocation15 + $0x220] sm:$0xff] }
 0x387   :  { %v4614_v35 = vpack.c.bf16 %v2684_v17, %v2682_v15  ;;  %v2103_v15 = vld [vmem:[#allocation13 + $0x30] sm:$0xff] }
 0x389   :  { %4615 = vmatprep.subr.bf16.mxu1 %v4614_v35  ;;  %v2108_v35 = vld [vmem:[#allocation13 + $0x58] sm:$0xff] }
 0x38a   :  { %5398 = vrot.lane.b32.xlu0 %v5392_v50, %s5739_s19  ;;  %5403 = vrot.lane.b32.xlu1 %v5392_v50, %s5740_s20 }
 0x38b   :  { %v5354_v51 = vpop.permute.xlu1 %5353 }
 0x38c   :  { %v5356_v53 = vunpack.i.h.bf16 %v5354_v51  ;;  %v5355_v54 = vunpack.i.l.bf16 %v5354_v51  ;;  %v2687_v51 = vld [vmem:[#allocation15 + $0x230] sm:$0xff] }
 0x38e   :  { %v6370_v60 = vmax.f32 %v6315_v10, %v5355_v54  ;;  %5408 = vrot.lane.b32.xlu0 %v5392_v50, %s5725_s12  ;;  %v1821_v61 = vmax.f32 %v6317_v20, %v5356_v53  ;;  %v4616_v50 = vpack.c.bf16 %v2683_v16, %v2681_v18 }
 0x390   :  { %v5417_v62 = vpack.i.bf16 %v6370_v60, %v6367_v58  ;;  %v5427_v3 = vpack.i.bf16 %v1821_v61, %v1820_v63  ;;  %4617 = vmatpush1.bf16.msra.mxu1 %v4616_v50  ;;  %v2699_v50 = vld [vmem:[#allocation15 + $0x290] sm:$0xff] }
 0x391   :  { %4619 = vmatprep.subr.bf16.mxu1 %v4618_v59 }
 0x392   :  { %5418 = vrot.lane.b32.xlu0 %v5417_v62, %s5736_s11  ;;  %5413 = vrot.lane.b32.xlu1 %v5417_v62, %s5735_s6 }
 0x393   :  { %v5359_v1 = vpop.permute.xlu0 %5358 }
 0x394   :  { %v5360_v10 = vunpack.i.l.bf16 %v5359_v1  ;;  %v5361_v11 = vunpack.i.h.bf16 %v5359_v1 }
 0x396   :  { %5428 = vrot.lane.b32.xlu0 %v5427_v3, %s5738_s17  ;;  %5423 = vrot.lane.b32.xlu1 %v5417_v62, %s5737_s0  ;;  %v6384_v24 = vmax.f32 %v6322_v25, %v5360_v10  ;;  %v1822_v26 = vmax.f32 %v6324_v27, %v5361_v11  ;;  %v2692_v62 = vld [vmem:[#allocation15 + $0x258] sm:$0xff]  ;;  %v4620_v10 = vpack.c.bf16 %v2687_v51, %v2685_v52  ;;  %v2694_v11 = vld [vmem:[#allocation15 + $0x268] sm:$0xff] }
 0x397   :  { %v2702_v51 = vld [vmem:[#allocation15 + $0x2a8] sm:$0xff] }
 0x398   :  { %4621 = vmatpush1.bf16.msra.mxu1 %v4620_v10 }
 0x39a   :  { %5438 = vrot.lane.b32.xlu0 %v5427_v3, %s5740_s20  ;;  %5433 = vrot.lane.b32.xlu1 %v5427_v3, %s5739_s19 }
 0x39b   :  { %v5364_v20 = vpop.permute.xlu1 %5363 }
 0x39c   :  { %v5366_v7 = vunpack.i.h.bf16 %v5364_v20  ;;  %v5365_v4 = vunpack.i.l.bf16 %v5364_v20 }
 0x39e   :  { %v6387_v34 = vmax.f32 %v6329_v36, %v5365_v4  ;;  %5443 = vrot.lane.b32.xlu1 %v5427_v3, %s5725_s12  ;;  %v1823_v38 = vmax.f32 %v6331_v30, %v5366_v7  ;;  %v2689_v7 = vld [vmem:[#allocation15 + $0x240] sm:$0xff]  ;;  %v2691_v4 = vld [vmem:[#allocation15 + $0x250] sm:$0xff] }
 0x3a0   :  { %v5447_v22 = vpack.i.bf16 %v6387_v34, %v6384_v24  ;;  %v5462_v28 = vpack.i.bf16 %v1823_v38, %v1822_v26  ;;  %v2696_v38 = vld [vmem:[#allocation15 + $0x278] sm:$0xff] }
 0x3a2   :  { %5448 = vrot.lane.b32.xlu0 %v5447_v22, %s5735_s6  ;;  %5453 = vrot.lane.b32.xlu1 %v5447_v22, %s5736_s11 }
 0x3a3   :  { %v5369_v25 = vpop.permute.xlu0 %5368 }
 0x3a4   :  { %v5371_v36 = vunpack.i.h.bf16 %v5369_v25  ;;  %v5370_v29 = vunpack.i.l.bf16 %v5369_v25  ;;  %v2097_v25 = vld [vmem:[#allocation13] sm:$0xff] }
 0x3a6   :  { %5458 = vrot.lane.b32.xlu0 %v5447_v22, %s5737_s0  ;;  %5463 = vrot.lane.b32.xlu1 %v5462_v28, %s5738_s17  ;;  %v1824_v31 = vmax.f32 %v6338_v23, %v5371_v36  ;;  %v6402_v33 = vmax.f32 %v6336_v2, %v5370_v29  ;;  %v2099_v36 = vld [vmem:[#allocation13 + $0x10] sm:$0xff] }
 0x3aa   :  { %5468 = vrot.lane.b32.xlu0 %v5462_v28, %s5739_s19  ;;  %5473 = vrot.lane.b32.xlu1 %v5462_v28, %s5740_s20 }
 0x3ab   :  { %v5374_v30 = vpop.permute.xlu1 %5373 }
 0x3ac   :  { %v5375_v27 = vunpack.i.l.bf16 %v5374_v30  ;;  %v5376_v40 = vunpack.i.h.bf16 %v5374_v30 }
 0x3ae   :  { %v6405_v39 = vmax.f32 %v6343_v47, %v5375_v27  ;;  %5478 = vrot.lane.b32.xlu0 %v5462_v28, %s5725_s12  ;;  %1950 = vrot.lane.b32.xlu1 %v1824_v31, %s5739_s19  ;;  %v1825_v23 = vmax.f32 %v6345_v49, %v5376_v40  ;;  %v2102_v27 = vld [vmem:[#allocation13 + $0x28] sm:$0xff]  ;;  %v2104_v40 = vld [vmem:[#allocation13 + $0x38] sm:$0xff] }
 0x3b0   :  { %v5482_v43 = vpack.i.bf16 %v6405_v39, %v6402_v33  ;;  %v5497_v2 = vpack.i.bf16 %v1825_v23, %v1824_v31 }
 0x3b2   :  { %1974 = vrot.lane.b32.xlu0 %v1824_v31, %s5740_s20  ;;  %5483 = vrot.lane.b32.xlu1 %v5482_v43, %s5735_s6 }
 0x3b6   :  { %5488 = vrot.lane.b32.xlu0 %v5482_v43, %s5736_s11  ;;  %5493 = vrot.lane.b32.xlu1 %v5482_v43, %s5737_s0  ;;  %v4624_v43 = vpack.c.bf16 %v2691_v4, %v2689_v7 }
 0x3ba   :  { %5498 = vrot.lane.b32.xlu0 %v5497_v2, %s5738_s17  ;;  %1998 = vrot.lane.b32.xlu1 %v1824_v31, %s5725_s12  ;;  %v4626_v2 = vpack.c.bf16 %v2696_v38, %v2694_v11  ;;  %v2701_v11 = vld [vmem:[#allocation15 + $0x2a0] sm:$0xff]  ;;  %v2703_v38 = vld [vmem:[#allocation15 + $0x2b0] sm:$0xff] }
 0x3be   :  { %1952 = vrot.lane.b32.xlu0 %v1825_v23, %s5739_s19  ;;  %1976 = vrot.lane.b32.xlu1 %v1825_v23, %s5740_s20 }
 0x3c2   :  { %2000 = vrot.lane.b32.xlu0 %v1825_v23, %s5725_s12  ;;  %s5741_s12 = smov [#allocation19]  }
 0x3c3   :  { %s4227_s21 = sshll.u32 %s5741_s12, 4  ;;  %s4228_s21 = int_to_ptr.vmem [resolvable:$true] %s4227_s21 }
 0x3c4   :  { %s5691_s22 = scalar_lea.vmem %s4228_s21, 256  ;;  %p5696_p1 = scmp.lt.s32.totalorder %s4228_s21, %s4228_s21 }
 0x3c5   :  { %p5692_p0 = scmp.ne.s32.totalorder %s4228_s21, %s5691_s22  ;;  %p5697_p2 = scmp.lt.s32.totalorder %s5691_s22, %s5691_s22 }
 0x3c7   :  { %p5698_p3 = por %p5697_p2, %p5696_p1 }
 0x3c9   :  { %p5699_p4 = pnand %p5698_p3, %p5692_p0 }
 0x3f4   :  { %v5379_v47 = vpop.permute.xlu0 %5378  ;;  %v5384_v41 = vpop.permute.xlu1 %5383 }
 0x3f5   :  { %v5381_v57 = vunpack.i.h.bf16 %v5379_v47  ;;  %v5380_v49 = vunpack.i.l.bf16 %v5379_v47  ;;  %v5385_v9 = vunpack.i.l.bf16 %v5384_v41  ;;  %v5386_v44 = vunpack.i.h.bf16 %v5384_v41  ;;  %v2693_v47 = vld [vmem:[#allocation15 + $0x260] sm:$0xff]  ;;  %v2695_v41 = vld [vmem:[#allocation15 + $0x270] sm:$0xff] }
 0x3f6   :  { %v4628_v16 = vpack.c.bf16 %v2695_v41, %v2693_v47  ;;  %v2114_v47 = vld [vmem:[#allocation13 + $0x88] sm:$0xff]  ;;  %v2116_v41 = vld [vmem:[#allocation13 + $0x98] sm:$0xff] }
 0x3f7   :  { %v2011_v42 = vsel %vm2010_vm1, %v6351_v13, %v5380_v49  ;;  %v2012_v48 = vsel %vm2010_vm1, %v6354_v21, %v5381_v57  ;;  %v2690_v21 = vld [vmem:[#allocation15 + $0x248] sm:$0xff]  ;;  %v4552_v49 = vpack.c.bf16 %v2099_v36, %v2097_v25 }
 0x3f8   :  { %v5389_v45 = vpop.permute.xlu0 %5388  ;;  %v5394_v46 = vpop.permute.xlu1 %5393  ;;  %v2020_v19 = vsel %vm2019_vm2, %v2011_v42, %v5385_v9  ;;  %v2021_v53 = vsel %vm2019_vm2, %v2012_v48, %v5386_v44  ;;  %v4622_v6 = vpack.c.bf16 %v2692_v62, %v2690_v21  ;;  %v2698_v9 = vld [vmem:[#allocation15 + $0x288] sm:$0xff]  ;;  %v2700_v42 = vld [vmem:[#allocation15 + $0x298] sm:$0xff] }
 0x3f9   :  { %v5391_v12 = vunpack.i.h.bf16 %v5389_v45  ;;  %v5390_v14 = vunpack.i.l.bf16 %v5389_v45  ;;  %v5395_v32 = vunpack.i.l.bf16 %v5394_v46  ;;  %v5396_v54 = vunpack.i.h.bf16 %v5394_v46  ;;  %v2704_v21 = vld [vmem:[#allocation15 + $0x2b8] sm:$0xff] }
 0x3fa   :  { %4623 = vmatprep.subr.bf16.mxu1 %v4622_v6  ;;  %v4630_v56 = vpack.c.bf16 %v2700_v42, %v2698_v9 }
 0x3fb   :  { %v2028_v13 = vsel %vm201_vm0, %v2020_v19, %v5390_v14  ;;  %v2029_v63 = vsel %vm201_vm0, %v2021_v53, %v5391_v12  ;;  %v4554_v12 = vpack.c.bf16 %v2104_v40, %v2102_v27  ;;  %v2101_v14 = vld [vmem:[#allocation13 + $0x20] sm:$0xff]  ;;  %4625 = vmatpush1.bf16.msra.mxu1 %v4624_v43  ;;  %v2111_v40 = vld [vmem:[#allocation13 + $0x70] sm:$0xff] }
 0x3fc   :  { %v5399_v55 = vpop.permute.xlu0 %5398  ;;  %v5404_v61 = vpop.permute.xlu1 %5403  ;;  %v2037_v20 = vsel %vm2036_vm3, %v2028_v13, %v5395_v32  ;;  %v2038_v22 = vsel %vm2036_vm3, %v2029_v63, %v5396_v54  ;;  %v2106_v32 = vld [vmem:[#allocation13 + $0x48] sm:$0xff]  ;;  %4627 = vmatprep.subr.bf16.mxu1 %v4626_v2  ;;  %v2697_v13 = vld [vmem:[#allocation15 + $0x280] sm:$0xff]  ;;  %v4556_v52 = vpack.c.bf16 %v2103_v15, %v2101_v14 }
 0x3fd   :  { %v5401_v3 = vunpack.i.h.bf16 %v5399_v55  ;;  %v5400_v1 = vunpack.i.l.bf16 %v5399_v55  ;;  %v5405_v5 = vunpack.i.l.bf16 %v5404_v61  ;;  %v5406_v26 = vunpack.i.h.bf16 %v5404_v61  ;;  %v2105_v63 = vld [vmem:[#allocation13 + $0x40] sm:$0xff]  ;;  %v2710_v15 = vld [vmem:[#allocation15 + $0x2e8] sm:$0xff] }
 0x3fe   :  { %v4558_v62 = vpack.c.bf16 %v2108_v35, %v2106_v32  ;;  %v4632_v6 = vpack.c.bf16 %v2699_v50, %v2697_v13  ;;  %v2109_v27 = vld [vmem:[#allocation13 + $0x60] sm:$0xff]  ;;  %v4566_v35 = vpack.c.bf16 %v2116_v41, %v2114_v47 }
 0x3ff   :  { %v2046_v8 = vsel %vm2045_vm4, %v2037_v20, %v5400_v1  ;;  %v2047_v29 = vsel %vm2045_vm4, %v2038_v22, %v5401_v3  ;;  %v2107_v3 = vld [vmem:[#allocation13 + $0x50] sm:$0xff]  ;;  %v2110_v20 = vld [vmem:[#allocation13 + $0x68] sm:$0xff]  ;;  %4629 = vmatpush1.bf16.msra.mxu1 %v4628_v16  ;;  %v4564_v14 = vpack.c.bf16 %v2111_v40, %v2109_v27  ;;  %v2113_v16 = vld [vmem:[#allocation13 + $0x80] sm:$0xff] }
 0x400   :  { %v5409_v28 = vpop.permute.xlu0 %5408  ;;  %v2055_v23 = vsel %vm2054_vm5, %v2046_v8, %v5405_v5  ;;  %v2056_v44 = vsel %vm2054_vm5, %v2047_v29, %v5406_v26  ;;  %v2112_v5 = vld [vmem:[#allocation13 + $0x78] sm:$0xff]  ;;  %4631 = vmatprep.subr.bf16.mxu1 %v4630_v56  ;;  %v4634_v8 = vpack.c.bf16 %v2704_v21, %v2702_v51  ;;  %v2706_v26 = vld [vmem:[#allocation15 + $0x2c8] sm:$0xff] }
 0x401   :  { %v5411_v30 = vunpack.i.h.bf16 %v5409_v28  ;;  %v5410_v31 = vunpack.i.l.bf16 %v5409_v28  ;;  %v2708_v28 = vld [vmem:[#allocation15 + $0x2d8] sm:$0xff]  ;;  %v2718_v27 = vld [vmem:[#allocation15 + $0x328] sm:$0xff] }
 0x402   :  { %v2720_v40 = vld [vmem:[#allocation15 + $0x338] sm:$0xff] }
 0x403   :  { %v6435_v57 = vsel %vm2063_vm6, %v2055_v23, %v5410_v31  ;;  %v2065_v19 = vsel %vm2063_vm6, %v2056_v44, %v5411_v30  ;;  %v4562_v31 = vpack.c.bf16 %v2112_v5, %v2110_v20  ;;  %4633 = vmatpush1.bf16.msra.mxu1 %v4632_v6  ;;  %v4638_v44 = vpack.c.bf16 %v2708_v28, %v2706_v26 }
 0x404   :  { %v2072_v45 = vmax.f32 %v6435_v57, 0.0  ;;  %v5419_v46 = vpop.permute.xlu0 %5418  ;;  %v5414_v48 = vpop.permute.xlu1 %5413  ;;  %v6445_v61 = vmax.f32 %v2065_v19, 0.0  ;;  %4635 = vmatprep.subr.bf16.mxu1 %v4634_v8  ;;  %v2422_v57 = vld [vmem:[#allocation13 + $0x280] sm:$0xff] }
 0x405   :  { %v5416_v17 = vunpack.i.h.bf16 %v5414_v48  ;;  %v5415_v18 = vunpack.i.l.bf16 %v5414_v48  ;;  %v5420_v37 = vunpack.i.l.bf16 %v5419_v46  ;;  %v5421_v53 = vunpack.i.h.bf16 %v5419_v46  ;;  %v2705_v46 = vld [vmem:[#allocation15 + $0x2c0] sm:$0xff]  ;;  %v2707_v48 = vld [vmem:[#allocation15 + $0x2d0] sm:$0xff] }
 0x406   :  { %2235 = vmatmul.mubr.f32.vlgmr.msra.gmra.mrb[32].mxu0 %v2072_v45  ;;  %v4640_v51 = vpack.c.bf16 %v2707_v48, %v2705_v46  ;;  %v2126_v46 = vld [vmem:[#allocation13 + $0xe8] sm:$0xff]  ;;  %v2128_v48 = vld [vmem:[#allocation13 + $0xf8] sm:$0xff] }
 0x407   :  { %v2013_v59 = vsel %vm2010_vm1, %v6367_v58, %v5415_v18  ;;  %2240 = vmatprep.mubr.f32.mxu0 %v5734_v0  ;;  %4553 = vmatpush1.bf16.msra.mxu0 %v4552_v49  ;;  %v2014_v1 = vsel %vm2010_vm1, %v6370_v60, %v5416_v17  ;;  %v4560_v60 = vpack.c.bf16 %v2107_v3, %v2105_v63  ;;  %v2712_v17 = vld [vmem:[#allocation15 + $0x2f8] sm:$0xff]  ;;  %v2714_v3 = vld [vmem:[#allocation15 + $0x308] sm:$0xff] }
 0x408   :  { %v5429_v54 = vpop.permute.xlu0 %5428  ;;  %v5424_v55 = vpop.permute.xlu1 %5423  ;;  %4555 = vmatprep.subr.bf16.mxu0 %v4554_v12  ;;  %v2022_v4 = vsel %vm2019_vm2, %v2013_v59, %v5420_v37  ;;  %v2023_v36 = vsel %vm2019_vm2, %v2014_v1, %v5421_v53  ;;  %v4636_v49 = vpack.c.bf16 %v2703_v38, %v2701_v11  ;;  %v2115_v37 = vld [vmem:[#allocation13 + $0x90] sm:$0xff]  ;;  %v2118_v59 = vld [vmem:[#allocation13 + $0xa8] sm:$0xff]  ;;  %v4642_v53 = vpack.c.bf16 %v2712_v17, %v2710_v15  ;;  %v2716_v1 = vld [vmem:[#allocation15 + $0x318] sm:$0xff] }
 0x409   :  { %v5426_v10 = vunpack.i.h.bf16 %v5424_v55  ;;  %v5425_v58 = vunpack.i.l.bf16 %v5424_v55  ;;  %v5430_v7 = vunpack.i.l.bf16 %v5429_v54  ;;  %v5431_v25 = vunpack.i.h.bf16 %v5429_v54  ;;  %v2709_v54 = vld [vmem:[#allocation15 + $0x2e0] sm:$0xff]  ;;  %v2711_v55 = vld [vmem:[#allocation15 + $0x2f0] sm:$0xff] }
 0x40a   :  { %2241 = vmatmul.mubr.f32.gmra.mrb[34].mxu0 %v6445_v61  ;;  %4637 = vmatpush1.bf16.msra.mxu1 %v4636_v49  ;;  %v4568_v63 = vpack.c.bf16 %v2115_v37, %v2113_v16  ;;  %v4644_v26 = vpack.c.bf16 %v2711_v55, %v2709_v54  ;;  %v2121_v49 = vld [vmem:[#allocation13 + $0xc0] sm:$0xff]  ;;  %v4650_v17 = vpack.c.bf16 %v2720_v40, %v2718_v27  ;;  %v2724_v16 = vld [vmem:[#allocation15 + $0x358] sm:$0xff]  ;;  %v2407_v55 = vld [vmem:[#allocation13 + $0x208] sm:$0xff] }
 0x40b   :  { %v2030_v22 = vsel %vm201_vm0, %v2022_v4, %v5425_v58  ;;  %2246 = vmatprep.mubr.f32.mxu0 %v5734_v0  ;;  %4557 = vmatpush1.bf16.msra.mxu0 %v4556_v52  ;;  %v2031_v43 = vsel %vm201_vm0, %v2023_v36, %v5426_v10  ;;  %v2120_v52 = vld [vmem:[#allocation13 + $0xb8] sm:$0xff]  ;;  %v2119_v4 = vld [vmem:[#allocation13 + $0xb0] sm:$0xff]  ;;  %v2713_v36 = vld [vmem:[#allocation15 + $0x300] sm:$0xff] }
 0x40c   :  { %v5439_v29 = vpop.permute.xlu0 %5438  ;;  %v5434_v30 = vpop.permute.xlu1 %5433  ;;  %4559 = vmatprep.subr.bf16.mxu0 %v4558_v62  ;;  %v2039_v42 = vsel %vm2036_vm3, %v2030_v22, %v5430_v7  ;;  %v2040_v19 = vsel %vm2036_vm3, %v2031_v43, %v5431_v25  ;;  %4639 = vmatprep.subr.bf16.mxu1 %v4638_v44  ;;  %v4570_v6 = vpack.c.bf16 %v2120_v52, %v2118_v59  ;;  %v2117_v7 = vld [vmem:[#allocation13 + $0xa0] sm:$0xff]  ;;  %v2122_v22 = vld [vmem:[#allocation13 + $0xc8] sm:$0xff]  ;;  %v2727_v40 = vld [vmem:[#allocation15 + $0x370] sm:$0xff] }
 0x40d   :  { %v5436_v23 = vunpack.i.h.bf16 %v5434_v30  ;;  %v5435_v2 = vunpack.i.l.bf16 %v5434_v30  ;;  %v5440_v9 = vunpack.i.l.bf16 %v5439_v29  ;;  %v5441_v18 = vunpack.i.h.bf16 %v5439_v29  ;;  %v2715_v29 = vld [vmem:[#allocation15 + $0x310] sm:$0xff]  ;;  %v2125_v52 = vld [vmem:[#allocation13 + $0xe0] sm:$0xff] }
 0x40e   :  { %4641 = vmatpush1.bf16.msra.mxu1 %v4640_v51  ;;  %v4646_v25 = vpack.c.bf16 %v2716_v1, %v2714_v3  ;;  %v4578_v59 = vpack.c.bf16 %v2128_v48, %v2126_v46  ;;  %v2127_v51 = vld [vmem:[#allocation13 + $0xf0] sm:$0xff]  ;;  %v2725_v27 = vld [vmem:[#allocation15 + $0x360] sm:$0xff] }
 0x40f   :  { %v2048_v12 = vsel %vm2045_vm4, %v2039_v42, %v5435_v2  ;;  %4561 = vmatpush1.bf16.msra.mxu0 %v4560_v60  ;;  %v2049_v56 = vsel %vm2045_vm4, %v2040_v19, %v5436_v23  ;;  %v2124_v60 = vld [vmem:[#allocation13 + $0xd8] sm:$0xff]  ;;  %4643 = vmatprep.subr.bf16.mxu1 %v4642_v53  ;;  %v2719_v19 = vld [vmem:[#allocation15 + $0x330] sm:$0xff]  ;;  %v2729_v46 = vld [vmem:[#allocation15 + $0x380] sm:$0xff] }
 0x410   :  { %v5444_v32 = vpop.permute.xlu1 %5443  ;;  %4563 = vmatprep.subr.bf16.mxu0 %v4562_v31  ;;  %v2057_v21 = vsel %vm2054_vm5, %v2048_v12, %v5440_v9  ;;  %v2058_v5 = vsel %vm2054_vm5, %v2049_v56, %v5441_v18  ;;  %v4572_v31 = vpack.c.bf16 %v2119_v4, %v2117_v7  ;;  %v4574_v41 = vpack.c.bf16 %v2124_v60, %v2122_v22  ;;  %v2123_v9 = vld [vmem:[#allocation13 + $0xd0] sm:$0xff]  ;;  %v2717_v18 = vld [vmem:[#allocation15 + $0x320] sm:$0xff]  ;;  %v2726_v4 = vld [vmem:[#allocation15 + $0x368] sm:$0xff] }
 0x411   :  { %v5446_v13 = vunpack.i.h.bf16 %v5444_v32  ;;  %v5445_v50 = vunpack.i.l.bf16 %v5444_v32  ;;  %v4648_v12 = vpack.c.bf16 %v2715_v29, %v2713_v36  ;;  %v4580_v7 = vpack.c.bf16 %v2127_v51, %v2125_v52  ;;  %v2733_v51 = vld [vmem:[#allocation15 + $0x3a0] sm:$0xff] }
 0x412   :  { %4645 = vmatpush1.bf16.msra.mxu1 %v4644_v26 }
 0x413   :  { %v2066_v62 = vsel %vm2063_vm6, %v2057_v21, %v5445_v50  ;;  %4565 = vmatpush1.bf16.msra.mxu0 %v4564_v14  ;;  %v2067_v38 = vsel %vm2063_vm6, %v2058_v5, %v5446_v13  ;;  %4647 = vmatprep.subr.bf16.mxu1 %v4646_v25  ;;  %v2723_v5 = vld [vmem:[#allocation15 + $0x350] sm:$0xff] }
 0x414   :  { %v5449_v10 = vpop.permute.xlu0 %5448  ;;  %v5454_v58 = vpop.permute.xlu1 %5453  ;;  %v6461_v20 = vmax.f32 %v2066_v62, 0.0  ;;  %4567 = vmatprep.subr.bf16.mxu0 %v4566_v35  ;;  %v6469_v47 = vmax.f32 %v2067_v38, 0.0  ;;  %v2722_v35 = vld [vmem:[#allocation15 + $0x348] sm:$0xff]  ;;  %v2409_v62 = vld [vmem:[#allocation13 + $0x218] sm:$0xff] }
 0x415   :  { %v5451_v8 = vunpack.i.h.bf16 %v5449_v10  ;;  %v5450_v11 = vunpack.i.l.bf16 %v5449_v10  ;;  %v5455_v28 = vunpack.i.l.bf16 %v5454_v58  ;;  %v5456_v43 = vunpack.i.h.bf16 %v5454_v58  ;;  %v2721_v58 = vld [vmem:[#allocation15 + $0x340] sm:$0xff] }
 0x416   :  { %2247 = vmatmul.mubr.f32.gmra.mrb[36].mxu0 %v6461_v20  ;;  %4649 = vmatpush1.bf16.msra.mxu1 %v4648_v12  ;;  %v4654_v10 = vpack.c.bf16 %v2724_v16, %v2722_v35  ;;  %v4582_v26 = vpack.c.bf16 %v2409_v62, %v2407_v55  ;;  %v4656_v29 = vpack.c.bf16 %v2723_v5, %v2721_v58  ;;  %v2738_v55 = vld [vmem:[#allocation15 + $0x3c8] sm:$0xff]  ;;  %v2740_v62 = vld [vmem:[#allocation15 + $0x3d8] sm:$0xff] }
 0x417   :  { %v2015_v30 = vsel %vm2010_vm1, %v6384_v24, %v5450_v11  ;;  %2252 = vmatprep.mubr.f32.mxu0 %v5734_v0  ;;  %4569 = vmatpush1.bf16.msra.mxu0 %v4568_v63  ;;  %v2016_v42 = vsel %vm2010_vm1, %v6387_v34, %v5451_v8  ;;  %v4576_v34 = vpack.c.bf16 %v2123_v9, %v2121_v49  ;;  %v2728_v8 = vld [vmem:[#allocation15 + $0x378] sm:$0xff] }
 0x418   :  { %v5459_v23 = vpop.permute.xlu0 %5458  ;;  %v5464_v2 = vpop.permute.xlu1 %5463  ;;  %4571 = vmatprep.subr.bf16.mxu0 %v4570_v6  ;;  %v2024_v14 = vsel %vm2019_vm2, %v2015_v30, %v5455_v28  ;;  %v2025_v37 = vsel %vm2019_vm2, %v2016_v42, %v5456_v43  ;;  %v4652_v63 = vpack.c.bf16 %v2719_v19, %v2717_v18  ;;  %4651 = vmatprep.subr.bf16.mxu1 %v4650_v17  ;;  %v2734_v17 = vld [vmem:[#allocation15 + $0x3a8] sm:$0xff]  ;;  %v2736_v18 = vld [vmem:[#allocation15 + $0x3b8] sm:$0xff] }
 0x419   :  { %v5461_v44 = vunpack.i.h.bf16 %v5459_v23  ;;  %v5460_v24 = vunpack.i.l.bf16 %v5459_v23  ;;  %v5465_v15 = vunpack.i.l.bf16 %v5464_v2  ;;  %v5466_v56 = vunpack.i.h.bf16 %v5464_v2  ;;  %v2730_v23 = vld [vmem:[#allocation15 + $0x388] sm:$0xff]  ;;  %v2732_v2 = vld [vmem:[#allocation15 + $0x398] sm:$0xff] }
 0x41a   :  { %2253 = vmatmul.mubr.f32.gmra.mrb[38].mxu0 %v6469_v47  ;;  %4653 = vmatpush1.bf16.msra.mxu1 %v4652_v63  ;;  %v4670_v5 = vpack.c.bf16 %v2740_v62, %v2738_v55  ;;  %v2427_v55 = vld [vmem:[#allocation13 + $0x2a8] sm:$0xff]  ;;  %v2429_v62 = vld [vmem:[#allocation13 + $0x2b8] sm:$0xff] }
 0x41b   :  { %v2032_v32 = vsel %vm201_vm0, %v2024_v14, %v5460_v24  ;;  %2258 = vmatprep.mubr.f32.mxu0 %v5734_v0  ;;  %4573 = vmatpush1.bf16.msra.mxu0 %v4572_v31  ;;  %v2033_v21 = vsel %vm201_vm0, %v2025_v37, %v5461_v44  ;;  %v4658_v31 = vpack.c.bf16 %v2728_v8, %v2726_v4 }
 0x41c   :  { %v5469_v13 = vpop.permute.xlu0 %5468  ;;  %v5474_v50 = vpop.permute.xlu1 %5473  ;;  %4575 = vmatprep.subr.bf16.mxu0 %v4574_v41  ;;  %v2041_v3 = vsel %vm2036_vm3, %v2032_v32, %v5465_v15  ;;  %v2042_v11 = vsel %vm2036_vm3, %v2033_v21, %v5466_v56  ;;  %4655 = vmatprep.subr.bf16.mxu1 %v4654_v10  ;;  %v4660_v24 = vpack.c.bf16 %v2727_v40, %v2725_v27  ;;  %v2731_v15 = vld [vmem:[#allocation15 + $0x390] sm:$0xff]  ;;  %v2741_v27 = vld [vmem:[#allocation15 + $0x3e0] sm:$0xff] }
 0x41d   :  { %v5471_v53 = vunpack.i.h.bf16 %v5469_v13  ;;  %v5470_v54 = vunpack.i.l.bf16 %v5469_v13  ;;  %v5475_v1 = vunpack.i.l.bf16 %v5474_v50  ;;  %v5476_v38 = vunpack.i.h.bf16 %v5474_v50  ;;  %v2735_v21 = vld [vmem:[#allocation15 + $0x3b0] sm:$0xff] }
 0x41e   :  { %4657 = vmatpush1.bf16.msra.mxu1 %v4656_v29  ;;  %v4662_v14 = vpack.c.bf16 %v2732_v2, %v2730_v23  ;;  %v4664_v37 = vpack.c.bf16 %v2731_v15, %v2729_v46  ;;  %v4666_v56 = vpack.c.bf16 %v2736_v18, %v2734_v17  ;;  %v2743_v40 = vld [vmem:[#allocation15 + $0x3f0] sm:$0xff]  ;;  %v2413_v46 = vld [vmem:[#allocation13 + $0x238] sm:$0xff]  ;;  %v2415_v17 = vld [vmem:[#allocation13 + $0x248] sm:$0xff] }
 0x41f   :  { %v2050_v6 = vsel %vm2045_vm4, %v2041_v3, %v5470_v54  ;;  %4577 = vmatpush1.bf16.msra.mxu0 %v4576_v34  ;;  %v2051_v28 = vsel %vm2045_vm4, %v2042_v11, %v5471_v53  ;;  %4659 = vmatprep.subr.bf16.mxu1 %v4658_v31  ;;  %v2742_v11 = vld [vmem:[#allocation15 + $0x3e8] sm:$0xff]  ;;  %v2412_v15 = vld [vmem:[#allocation13 + $0x230] sm:$0xff]  ;;  %v2417_v18 = vld [vmem:[#allocation13 + $0x258] sm:$0xff] }
 0x420   :  { %v5479_v22 = vpop.permute.xlu0 %5478  ;;  %v6482_v60 = vpop.permute.xlu1 %1950  ;;  %4579 = vmatprep.subr.bf16.mxu0 %v4578_v59  ;;  %v2059_v30 = vsel %vm2054_vm5, %v2050_v6, %v5475_v1  ;;  %v2060_v41 = vsel %vm2054_vm5, %v2051_v28, %v5476_v38  ;;  %v2737_v6 = vld [vmem:[#allocation15 + $0x3c0] sm:$0xff]  ;;  %v2744_v38 = vld [vmem:[#allocation15 + $0x3f8] sm:$0xff] }
 0x421   :  { %v5481_v25 = vunpack.i.h.bf16 %v5479_v22  ;;  %v5480_v36 = vunpack.i.l.bf16 %v5479_v22  ;;  %v4674_v31 = vpack.c.bf16 %v2744_v38, %v2742_v11 }
 0x422   :  { %4661 = vmatpush1.bf16.msra.mxu1 %v4660_v24  ;;  %v2411_v24 = vld [vmem:[#allocation13 + $0x228] sm:$0xff] }
 0x423   :  { %v2068_v43 = vsel %vm2063_vm6, %v2059_v30, %v5480_v36  ;;  %4581 = vmatpush1.bf16.msra.mxu0 %v4580_v7  ;;  %v2069_v44 = vsel %vm2063_vm6, %v2060_v41, %v5481_v25  ;;  %4663 = vmatprep.subr.bf16.mxu1 %v4662_v14  ;;  %v2739_v7 = vld [vmem:[#allocation15 + $0x3d0] sm:$0xff]  ;;  %v4676_v41 = vpack.c.bf16 %v2743_v40, %v2741_v27  ;;  %v2410_v14 = vld [vmem:[#allocation13 + $0x220] sm:$0xff] }
 0x424   :  { %v1975_v49 = vpop.permute.xlu0 %1974  ;;  %v5484_v9 = vpop.permute.xlu1 %5483  ;;  %v6488_v42 = vmax.f32 %v2068_v43, 0.0  ;;  %4583 = vmatprep.subr.bf16.mxu0 %v4582_v26  ;;  %v6493_v34 = vmax.f32 %v2069_v44, 0.0  ;;  %v4672_v29 = vpack.c.bf16 %v2739_v7, %v2737_v6  ;;  %v2408_v44 = vld [vmem:[#allocation13 + $0x210] sm:$0xff]  ;;  %v2430_v6 = vld [vmem:[#allocation13 + $0x2c0] sm:$0xff] }
 0x425   :  { %v5486_v48 = vunpack.i.h.bf16 %v5484_v9  ;;  %v5485_v12 = vunpack.i.l.bf16 %v5484_v9  ;;  %v2406_v9 = vld [vmem:[#allocation13 + $0x200] sm:$0xff]  ;;  %v2432_v7 = vld [vmem:[#allocation13 + $0x2d0] sm:$0xff] }
 0x426   :  { %2259 = vmatmul.mubr.f32.gmra.mrb[40].mxu0 %v6488_v42  ;;  %4665 = vmatpush1.bf16.msra.mxu1 %v4664_v37  ;;  %v2419_v37 = vld [vmem:[#allocation13 + $0x268] sm:$0xff]  ;;  %v4608_v11 = vpack.c.bf16 %v2432_v7, %v2430_v6  ;;  %v2604_v40 = vld [vmem:[#allocation15 + $0x20] sm:$0xff]  ;;  %v2631_v6 = vld [vmem:[#allocation15 + $0xf8] sm:$0xff] }
 0x427   :  { %2264 = vmatprep.mubr.f32.mxu0 %v5734_v0  ;;  %v2018_v13 = vsel %vm2010_vm1, %v6405_v39, %v5486_v48  ;;  %v2017_v50 = vsel %vm2010_vm1, %v6402_v33, %v5485_v12  ;;  %v4668_v33 = vpack.c.bf16 %v2735_v21, %v2733_v51  ;;  %4667 = vmatprep.subr.bf16.mxu1 %v4666_v56  ;;  %v2421_v56 = vld [vmem:[#allocation13 + $0x278] sm:$0xff]  ;;  %v2423_v51 = vld [vmem:[#allocation13 + $0x288] sm:$0xff] }
 0x428   :  { %v5489_v19 = vpop.permute.xlu0 %5488  ;;  %v5494_v32 = vpop.permute.xlu1 %5493  ;;  %v4584_v48 = vpack.c.bf16 %v2408_v44, %v2406_v9  ;;  %v4586_v12 = vpack.c.bf16 %v2413_v46, %v2411_v24  ;;  %v2425_v21 = vld [vmem:[#allocation13 + $0x298] sm:$0xff]  ;;  %v2608_v44 = vld [vmem:[#allocation15 + $0x40] sm:$0xff]  ;;  %v2610_v24 = vld [vmem:[#allocation15 + $0x50] sm:$0xff] }
 0x429   :  { %v5491_v35 = vunpack.i.h.bf16 %v5489_v19  ;;  %v5490_v16 = vunpack.i.l.bf16 %v5489_v19  ;;  %v5496_v59 = vunpack.i.h.bf16 %v5494_v32  ;;  %v5495_v52 = vunpack.i.l.bf16 %v5494_v32  ;;  %v2613_v46 = vld [vmem:[#allocation15 + $0x68] sm:$0xff] }
 0x42a   :  { %2265 = vmatmul.mubr.f32.gmra.mrb[42].mxu0 %v6493_v34  ;;  %4669 = vmatpush1.bf16.msra.mxu1 %v4668_v33  ;;  %v4588_v19 = vpack.c.bf16 %v2412_v15, %v2410_v14  ;;  %v4590_v32 = vpack.c.bf16 %v2417_v18, %v2415_v17  ;;  %v2431_v33 = vld [vmem:[#allocation13 + $0x2c8] sm:$0xff]  ;;  %v4688_v14 = vpack.c.bf16 %v2610_v24, %v2608_v44  ;;  %v2612_v18 = vld [vmem:[#allocation15 + $0x60] sm:$0xff] }
 0x42b   :  { %v2026_v53 = vsel %vm2019_vm2, %v2017_v50, %v5490_v16  ;;  %v2027_v54 = vsel %vm2019_vm2, %v2018_v13, %v5491_v35  ;;  %2270 = vmatprep.mubr.f32.mxu0 %v5734_v0  ;;  %4671 = vmatprep.subr.bf16.mxu1 %v4670_v5  ;;  %v2414_v35 = vld [vmem:[#allocation13 + $0x240] sm:$0xff]  ;;  %v2416_v16 = vld [vmem:[#allocation13 + $0x250] sm:$0xff]  ;;  %v4594_v50 = vpack.c.bf16 %v2421_v56, %v2419_v37 }
 0x42c   :  { %v5499_v63 = vpop.permute.xlu0 %5498  ;;  %v1999_v39 = vpop.permute.xlu1 %1998  ;;  %v2034_v10 = vsel %vm201_vm0, %v2026_v53, %v5495_v52  ;;  %v2035_v58 = vsel %vm201_vm0, %v2027_v54, %v5496_v59  ;;  %v4592_v13 = vpack.c.bf16 %v2416_v16, %v2414_v35  ;;  %v2418_v59 = vld [vmem:[#allocation13 + $0x260] sm:$0xff]  ;;  %v2420_v52 = vld [vmem:[#allocation13 + $0x270] sm:$0xff]  ;;  %v4598_v54 = vpack.c.bf16 %v2425_v21, %v2423_v51  ;;  %v2619_v35 = vld [vmem:[#allocation15 + $0x98] sm:$0xff] }
 0x42d   :  { %v5501_v3 = vunpack.i.h.bf16 %v5499_v63  ;;  %v5500_v1 = vunpack.i.l.bf16 %v5499_v63  ;;  %v4596_v53 = vpack.c.bf16 %v2420_v52, %v2418_v59  ;;  %v2618_v59 = vld [vmem:[#allocation15 + $0x90] sm:$0xff]  ;;  %v2621_v52 = vld [vmem:[#allocation15 + $0xa8] sm:$0xff]  ;;  %v2623_v51 = vld [vmem:[#allocation15 + $0xb8] sm:$0xff] }
 0x42e   :  { %4673 = vmatpush1.bf16.msra.mxu1 %v4672_v29  ;;  %v2640_v24 = vld [vmem:[#allocation15 + $0x140] sm:$0xff] }
 0x42f   :  { %v2043_v4 = vsel %vm2036_vm3, %v2034_v10, %v5500_v1  ;;  %v2044_v8 = vsel %vm2036_vm3, %v2035_v58, %v5501_v3  ;;  %4675 = vmatprep.subr.bf16.mxu1 %v4674_v31  ;;  %v2426_v3 = vld [vmem:[#allocation13 + $0x2a0] sm:$0xff]  ;;  %v2428_v1 = vld [vmem:[#allocation13 + $0x2b0] sm:$0xff]  ;;  %v2433_v10 = vld [vmem:[#allocation13 + $0x2d8] sm:$0xff] }
 0x430   :  { %v2052_v22 = vsel %vm2045_vm4, %v2043_v4, %v6482_v60  ;;  %v1953_v26 = vpop.permute.xlu0 %1952  ;;  %v1977_v36 = vpop.permute.xlu1 %1976  ;;  %v4604_v58 = vpack.c.bf16 %v2428_v1, %v2426_v3  ;;  %v4606_v5 = vpack.c.bf16 %v2433_v10, %v2431_v33  ;;  %v2435_v4 = vld [vmem:[#allocation13 + $0x2e8] sm:$0xff]  ;;  %v2624_v10 = vld [vmem:[#allocation15 + $0xc0] sm:$0xff] }
 0x431   :  { %v2061_v28 = vsel %vm2054_vm5, %v2052_v22, %v1975_v49  ;;  %v2053_v25 = vsel %vm2045_vm4, %v2044_v8, %v1953_v26  ;;  %v2437_v8 = vld [vmem:[#allocation13 + $0x2f8] sm:$0xff]  ;;  %v2434_v22 = vld [vmem:[#allocation13 + $0x2e0] sm:$0xff]  ;;  %v2436_v26 = vld [vmem:[#allocation13 + $0x2f0] sm:$0xff] }
 0x432   :  { %v2070_v30 = vsel %vm2063_vm6, %v2061_v28, %v1999_v39  ;;  %v2062_v23 = vsel %vm2054_vm5, %v2053_v25, %v1977_v36  ;;  %4677 = vmatpush1.bf16.msra.mxu1 %v4676_v41  ;;  %v4602_v39 = vpack.c.bf16 %v2429_v62, %v2427_v55  ;;  %v4610_v38 = vpack.c.bf16 %v2437_v8, %v2435_v4  ;;  %v2605_v25 = vld [vmem:[#allocation15 + $0x28] sm:$0xff]  ;;  %v2607_v36 = vld [vmem:[#allocation15 + $0x38] sm:$0xff]  ;;  %v2622_v55 = vld [vmem:[#allocation15 + $0xb0] sm:$0xff] }
 0x433   :  { %v6512_v43 = vmax.f32 %v2070_v30, 0.0  ;;  %v4612_v28 = vpack.c.bf16 %v2436_v26, %v2434_v22  ;;  %v4682_v27 = vpack.c.bf16 %v2607_v36, %v2605_v25  ;;  %v2625_v62 = vld [vmem:[#allocation15 + $0xc8] sm:$0xff]  ;;  %v2630_v22 = vld [vmem:[#allocation15 + $0xf0] sm:$0xff] }
 0x434   :  { %v2001_v2 = vpop.permute.xlu0 %2000  ;;  %v2633_v26 = vld [vmem:[#allocation15 + $0x108] sm:$0xff]  ;;  %v2634_v25 = vld [vmem:[#allocation15 + $0x110] sm:$0xff] }
 0x435   :  { %v6516_v60 = vsel %vm2063_vm6, %v2062_v23, %v2001_v2  ;;  %2271 = vmatmul.mubr.f32.gmra.mrb[44].mxu0 %v6512_v43  ;;  %v2609_v23 = vld [vmem:[#allocation15 + $0x48] sm:$0xff]  ;;  %v2611_v2 = vld [vmem:[#allocation15 + $0x58] sm:$0xff] }
 0x436   :  { %v2079_v49 = vmax.f32 %v6516_v60, 0.0  ;;  %2276 = vmatprep.mubr.f32.mxu0 %v5734_v0  ;;  %v4686_v9 = vpack.c.bf16 %v2611_v2, %v2609_v23  ;;  %v2637_v36 = vld [vmem:[#allocation15 + $0x128] sm:$0xff]  ;;  %v2638_v23 = vld [vmem:[#allocation15 + $0x130] sm:$0xff] }
 0x437   :  { %v2641_v2 = vld [vmem:[#allocation15 + $0x148] sm:$0xff] }
 0x439   :  { %2277 = vmatmul.mubr.f32.gmra.mrb[46].mxu0 %v2079_v49 }
 0x43a   :  { %2347 = vmatprep.mubr.f32.mxu0 %v5734_v0 }
 0x43d   :  { %2348 = vmatmul.mubr.f32.vlgmr.msra.gmra.mrb[32].mxu0 %v5734_v0 }
 0x43e   :  { %4585 = vmatpush1.bf16.msra.mxu0 %v4584_v48  ;;  %2353 = vmatprep.mubr.f32.mxu0 %v5734_v0  ;;  %v2615_v48 = vld [vmem:[#allocation15 + $0x78] sm:$0xff] }
 0x43f   :  { %4587 = vmatprep.subr.bf16.mxu0 %v4586_v12  ;;  %v4690_v17 = vpack.c.bf16 %v2615_v48, %v2613_v46  ;;  %v2642_v46 = vld [vmem:[#allocation15 + $0x150] sm:$0xff]  ;;  %v2645_v48 = vld [vmem:[#allocation15 + $0x168] sm:$0xff] }
 0x441   :  { %2354 = vmatmul.mubr.f32.gmra.mrb[34].mxu0 %v2072_v45  ;;  %v2424_v45 = vld [vmem:[#allocation13 + $0x290] sm:$0xff] }
 0x442   :  { %4589 = vmatpush1.bf16.msra.mxu0 %v4588_v19  ;;  %2359 = vmatprep.mubr.f32.mxu0 %v5734_v0  ;;  %v4600_v63 = vpack.c.bf16 %v2424_v45, %v2422_v57  ;;  %v2614_v19 = vld [vmem:[#allocation15 + $0x70] sm:$0xff]  ;;  %v4698_v57 = vpack.c.bf16 %v2623_v51, %v2621_v52  ;;  %v2620_v45 = vld [vmem:[#allocation15 + $0xa0] sm:$0xff]  ;;  %v2653_v51 = vld [vmem:[#allocation15 + $0x1a8] sm:$0xff] }
 0x443   :  { %4591 = vmatprep.subr.bf16.mxu0 %v4590_v32  ;;  %v2617_v32 = vld [vmem:[#allocation15 + $0x88] sm:$0xff]  ;;  %v4692_v37 = vpack.c.bf16 %v2614_v19, %v2612_v18  ;;  %v4700_v3 = vpack.c.bf16 %v2622_v55, %v2620_v45  ;;  %v2644_v19 = vld [vmem:[#allocation15 + $0x160] sm:$0xff]  ;;  %v2650_v52 = vld [vmem:[#allocation15 + $0x190] sm:$0xff] }
 0x444   :  { %v2652_v55 = vld [vmem:[#allocation15 + $0x1a0] sm:$0xff] }
 0x445   :  { %2360 = vmatmul.mubr.f32.gmra.mrb[36].mxu0 %v6445_v61 }
 0x446   :  { %4593 = vmatpush1.bf16.msra.mxu0 %v4592_v13  ;;  %2365 = vmatprep.mubr.f32.mxu0 %v5734_v0  ;;  %v4694_v13 = vpack.c.bf16 %v2619_v35, %v2617_v32  ;;  %v2646_v32 = vld [vmem:[#allocation15 + $0x170] sm:$0xff]  ;;  %v2649_v35 = vld [vmem:[#allocation15 + $0x188] sm:$0xff] }
 0x447   :  { %4595 = vmatprep.subr.bf16.mxu0 %v4594_v50  ;;  %v2616_v50 = vld [vmem:[#allocation15 + $0x80] sm:$0xff] }
 0x449   :  { %2366 = vmatmul.mubr.f32.gmra.mrb[38].mxu0 %v6461_v20 }
 0x44a   :  { %4597 = vmatpush1.bf16.msra.mxu0 %v4596_v53  ;;  %2371 = vmatprep.mubr.f32.mxu0 %v5734_v0  ;;  %v4696_v53 = vpack.c.bf16 %v2618_v59, %v2616_v50  ;;  %v2648_v59 = vld [vmem:[#allocation15 + $0x180] sm:$0xff] }
 0x44b   :  { %4599 = vmatprep.subr.bf16.mxu0 %v4598_v54 }
 0x44d   :  { %2372 = vmatmul.mubr.f32.gmra.mrb[40].mxu0 %v6469_v47 }
 0x44e   :  { %4601 = vmatpush1.bf16.msra.mxu0 %v4600_v63  ;;  %2377 = vmatprep.mubr.f32.mxu0 %v5734_v0  ;;  %v2627_v63 = vld [vmem:[#allocation15 + $0xd8] sm:$0xff] }
 0x44f   :  { %4603 = vmatprep.subr.bf16.mxu0 %v4602_v39  ;;  %v4702_v33 = vpack.c.bf16 %v2627_v63, %v2625_v62  ;;  %v2654_v62 = vld [vmem:[#allocation15 + $0x1b0] sm:$0xff]  ;;  %v2657_v63 = vld [vmem:[#allocation15 + $0x1c8] sm:$0xff] }
 0x451   :  { %2378 = vmatmul.mubr.f32.gmra.mrb[42].mxu0 %v6488_v42 }
 0x452   :  { %4605 = vmatpush1.bf16.msra.mxu0 %v4604_v58  ;;  %2383 = vmatprep.mubr.f32.mxu0 %v5734_v0  ;;  %v2626_v58 = vld [vmem:[#allocation15 + $0xd0] sm:$0xff] }
 0x453   :  { %4607 = vmatprep.subr.bf16.mxu0 %v4606_v5  ;;  %v2629_v5 = vld [vmem:[#allocation15 + $0xe8] sm:$0xff]  ;;  %v4704_v4 = vpack.c.bf16 %v2626_v58, %v2624_v10  ;;  %v2656_v58 = vld [vmem:[#allocation15 + $0x1c0] sm:$0xff] }
 0x455   :  { %2384 = vmatmul.mubr.f32.gmra.mrb[44].mxu0 %v6493_v34 }
 0x456   :  { %4609 = vmatpush1.bf16.msra.mxu0 %v4608_v11  ;;  %2389 = vmatprep.mubr.f32.mxu0 %v5734_v0  ;;  %v4706_v11 = vpack.c.bf16 %v2631_v6, %v2629_v5  ;;  %v2658_v5 = vld [vmem:[#allocation15 + $0x1d0] sm:$0xff]  ;;  %v2661_v6 = vld [vmem:[#allocation15 + $0x1e8] sm:$0xff] }
 0x457   :  { %4611 = vmatprep.subr.bf16.mxu0 %v4610_v38  ;;  %v2628_v38 = vld [vmem:[#allocation15 + $0xe0] sm:$0xff] }
 0x459   :  { %2390 = vmatmul.mubr.f32.gmra.mrb[46].mxu0 %v6512_v43 }
 0x45a   :  { %4613 = vmatpush1.bf16.msra.mxu0 %v4612_v28  ;;  %2502 = vmatprep.mubr.f32.mxu0 %v5734_v0  ;;  %v2635_v28 = vld [vmem:[#allocation15 + $0x118] sm:$0xff] }
 0x45d   :  { %2503 = vmatmul.mubr.f32.vlgmr.msra.gmra.mrb[32].mxu0 %v6445_v61  ;;  %v2601_v61 = vld [vmem:[#allocation15 + $0x8] sm:$0xff] }
 0x45e   :  { %2508 = vmatprep.mubr.f32.mxu0 %v5734_v0 }
 0x461   :  { %2509 = vmatmul.mubr.f32.gmra.mrb[34].mxu0 %v6461_v20  ;;  %v2603_v20 = vld [vmem:[#allocation15 + $0x18] sm:$0xff] }
 0x462   :  { %2514 = vmatprep.mubr.f32.mxu0 %v5734_v0 }
 0x465   :  { %2515 = vmatmul.mubr.f32.gmra.mrb[36].mxu0 %v6469_v47  ;;  %v4678_v47 = vpack.c.bf16 %v2603_v20, %v2601_v61  ;;  %v4708_v20 = vpack.c.bf16 %v2630_v22, %v2628_v38  ;;  %v2660_v22 = vld [vmem:[#allocation15 + $0x1e0] sm:$0xff] }
 0x466   :  { %2520 = vmatprep.mubr.f32.mxu0 %v5734_v0 }
 0x467   :  { %4679 = vmatprep.subr.bf16.mxu1 %v4678_v47 }
 0x469   :  { %2521 = vmatmul.mubr.f32.gmra.mrb[38].mxu0 %v6488_v42  ;;  %v2600_v42 = vld [vmem:[#allocation15] sm:$0xff] }
 0x46a   :  { %2526 = vmatprep.mubr.f32.mxu0 %v5734_v0 }
 0x46d   :  { %2527 = vmatmul.mubr.f32.gmra.mrb[40].mxu0 %v6493_v34  ;;  %v2602_v34 = vld [vmem:[#allocation15 + $0x10] sm:$0xff] }
 0x46e   :  { %2532 = vmatprep.mubr.f32.mxu0 %v5734_v0  ;;  %v4680_v30 = vpack.c.bf16 %v2602_v34, %v2600_v42  ;;  %v4710_v42 = vpack.c.bf16 %v2635_v28, %v2633_v26  ;;  %v2632_v34 = vld [vmem:[#allocation15 + $0x100] sm:$0xff]  ;;  %v2662_v26 = vld [vmem:[#allocation15 + $0x1f0] sm:$0xff]  ;;  %v2990_v28 = vld [vmem:[#allocation15 + $0x408] sm:$0xff] }
 0x471   :  { %2533 = vmatmul.mubr.f32.gmra.mrb[42].mxu0 %v6512_v43  ;;  %v2606_v43 = vld [vmem:[#allocation15 + $0x30] sm:$0xff] }
 0x472   :  { %2538 = vmatprep.mubr.f32.mxu0 %v5734_v0  ;;  %v4684_v41 = vpack.c.bf16 %v2606_v43, %v2604_v40  ;;  %v2636_v43 = vld [vmem:[#allocation15 + $0x120] sm:$0xff] }
 0x475   :  { %2539 = vmatmul.mubr.f32.gmra.mrb[44].mxu0 %v2079_v49 }
 0x476   :  { %2544 = vmatprep.mubr.f32.mxu0 %v5734_v0 }
 0x479   :  { %2545 = vmatmul.mubr.f32.gmra.mrb[46].mxu0 %v5734_v0 }
 0x47a   :  { %3521 = vmatprep.mubr.f32.mxu0 %v5734_v0 }
 0x530   :  { %v6558_v29 = vpop.f32.mrb[32].mxu0 }
 0x531   :  { %v6560_v31 = vpop.f32.mrb[33].mxu0 }
 0x532   :  { %2809 = vmatprep.mubr.f32.mxu1 %v6560_v31 }
 0x533   :  { %2810 = vmatmul.mubr.f32.vlgmr.msra.gmra.mrb[64].mxu1 %v6558_v29 }
 0x534   :  { %4681 = vmatpush1.bf16.msra.mxu1 %v4680_v30  ;;  %v6564_v60 = vpop.f32.mrb[34].mxu0  ;;  %v2639_v30 = vld [vmem:[#allocation15 + $0x138] sm:$0xff] }
 0x535   :  { %v6566_v49 = vpop.f32.mrb[35].mxu0  ;;  %4683 = vmatprep.subr.bf16.mxu1 %v4682_v27  ;;  %v4712_v27 = vpack.c.bf16 %v2634_v25, %v2632_v34  ;;  %v4714_v40 = vpack.c.bf16 %v2639_v30, %v2637_v36  ;;  %v2989_v25 = vld [vmem:[#allocation15 + $0x400] sm:$0xff]  ;;  %v2991_v36 = vld [vmem:[#allocation15 + $0x410] sm:$0xff]  ;;  %v2994_v30 = vld [vmem:[#allocation15 + $0x428] sm:$0xff] }
 0x536   :  { %2815 = vmatprep.mubr.f32.mxu1 %v6566_v49 }
 0x537   :  { %2816 = vmatmul.mubr.f32.gmra.mrb[66].mxu1 %v6564_v60 }
 0x538   :  { %4685 = vmatpush1.bf16.msra.mxu1 %v4684_v41  ;;  %v6570_v12 = vpop.f32.mrb[36].mxu0  ;;  %v2643_v41 = vld [vmem:[#allocation15 + $0x158] sm:$0xff] }
 0x539   :  { %v6572_v15 = vpop.f32.mrb[37].mxu0  ;;  %4687 = vmatprep.subr.bf16.mxu1 %v4686_v9  ;;  %v4716_v9 = vpack.c.bf16 %v2638_v23, %v2636_v43  ;;  %v4718_v44 = vpack.c.bf16 %v2643_v41, %v2641_v2  ;;  %v2993_v23 = vld [vmem:[#allocation15 + $0x420] sm:$0xff]  ;;  %v2995_v2 = vld [vmem:[#allocation15 + $0x430] sm:$0xff]  ;;  %v2998_v41 = vld [vmem:[#allocation15 + $0x448] sm:$0xff] }
 0x53a   :  { %2821 = vmatprep.mubr.f32.mxu1 %v6572_v15 }
 0x53b   :  { %2822 = vmatmul.mubr.f32.gmra.mrb[68].mxu1 %v6570_v12 }
 0x53c   :  { %4689 = vmatpush1.bf16.msra.mxu1 %v4688_v14  ;;  %v6576_v16 = vpop.f32.mrb[38].mxu0  ;;  %v2647_v14 = vld [vmem:[#allocation15 + $0x178] sm:$0xff] }
 0x53d   :  { %v6578_v56 = vpop.f32.mrb[39].mxu0  ;;  %4691 = vmatprep.subr.bf16.mxu1 %v4690_v17  ;;  %v4720_v17 = vpack.c.bf16 %v2642_v46, %v2640_v24  ;;  %v4722_v18 = vpack.c.bf16 %v2647_v14, %v2645_v48  ;;  %v2997_v46 = vld [vmem:[#allocation15 + $0x440] sm:$0xff]  ;;  %v2999_v48 = vld [vmem:[#allocation15 + $0x450] sm:$0xff]  ;;  %v3002_v14 = vld [vmem:[#allocation15 + $0x468] sm:$0xff] }
 0x53e   :  { %2827 = vmatprep.mubr.f32.mxu1 %v6578_v56 }
 0x53f   :  { %2828 = vmatmul.mubr.f32.gmra.mrb[70].mxu1 %v6576_v16 }
 0x540   :  { %4693 = vmatpush1.bf16.msra.mxu1 %v4692_v37  ;;  %v6582_v21 = vpop.f32.mrb[40].mxu0  ;;  %v2651_v37 = vld [vmem:[#allocation15 + $0x198] sm:$0xff] }
 0x541   :  { %v6584_v54 = vpop.f32.mrb[41].mxu0  ;;  %4695 = vmatprep.subr.bf16.mxu1 %v4694_v13  ;;  %v4724_v13 = vpack.c.bf16 %v2646_v32, %v2644_v19  ;;  %v4726_v50 = vpack.c.bf16 %v2651_v37, %v2649_v35  ;;  %v3001_v32 = vld [vmem:[#allocation15 + $0x460] sm:$0xff]  ;;  %v3003_v35 = vld [vmem:[#allocation15 + $0x470] sm:$0xff]  ;;  %v3006_v37 = vld [vmem:[#allocation15 + $0x488] sm:$0xff] }
 0x542   :  { %2833 = vmatprep.mubr.f32.mxu1 %v6584_v54 }
 0x543   :  { %2834 = vmatmul.mubr.f32.gmra.mrb[72].mxu1 %v6582_v21 }
 0x544   :  { %4697 = vmatpush1.bf16.msra.mxu1 %v4696_v53  ;;  %v6588_v39 = vpop.f32.mrb[42].mxu0  ;;  %v2655_v53 = vld [vmem:[#allocation15 + $0x1b8] sm:$0xff] }
 0x545   :  { %v6590_v1 = vpop.f32.mrb[43].mxu0  ;;  %4699 = vmatprep.subr.bf16.mxu1 %v4698_v57  ;;  %v4728_v57 = vpack.c.bf16 %v2650_v52, %v2648_v59  ;;  %v4730_v45 = vpack.c.bf16 %v2655_v53, %v2653_v51  ;;  %v3005_v59 = vld [vmem:[#allocation15 + $0x480] sm:$0xff]  ;;  %v3010_v52 = vld [vmem:[#allocation15 + $0x4a8] sm:$0xff]  ;;  %v3012_v51 = vld [vmem:[#allocation15 + $0x4b8] sm:$0xff] }
 0x546   :  { %2839 = vmatprep.mubr.f32.mxu1 %v6590_v1 }
 0x547   :  { %2840 = vmatmul.mubr.f32.gmra.mrb[74].mxu1 %v6588_v39 }
 0x548   :  { %4701 = vmatpush1.bf16.msra.mxu1 %v4700_v3  ;;  %v6594_v7 = vpop.f32.mrb[44].mxu0  ;;  %v2659_v3 = vld [vmem:[#allocation15 + $0x1d8] sm:$0xff] }
 0x549   :  { %v6596_v8 = vpop.f32.mrb[45].mxu0  ;;  %4703 = vmatprep.subr.bf16.mxu1 %v4702_v33  ;;  %v4732_v33 = vpack.c.bf16 %v2654_v62, %v2652_v55  ;;  %v4734_v10 = vpack.c.bf16 %v2659_v3, %v2657_v63  ;;  %v3011_v55 = vld [vmem:[#allocation15 + $0x4b0] sm:$0xff]  ;;  %v3014_v62 = vld [vmem:[#allocation15 + $0x4c8] sm:$0xff]  ;;  %v3016_v63 = vld [vmem:[#allocation15 + $0x4d8] sm:$0xff] }
 0x54a   :  { %2845 = vmatprep.mubr.f32.mxu1 %v6596_v8 }
 0x54b   :  { %2846 = vmatmul.mubr.f32.gmra.mrb[76].mxu1 %v6594_v7 }
 0x54c   :  { %4705 = vmatpush1.bf16.msra.mxu1 %v4704_v4  ;;  %v6600_v61 = vpop.f32.mrb[46].mxu0  ;;  %v2663_v4 = vld [vmem:[#allocation15 + $0x1f8] sm:$0xff] }
 0x54d   :  { %v6602_v47 = vpop.f32.mrb[47].mxu0  ;;  %4707 = vmatprep.subr.bf16.mxu1 %v4706_v11  ;;  %v4736_v11 = vpack.c.bf16 %v2658_v5, %v2656_v58  ;;  %v4738_v38 = vpack.c.bf16 %v2663_v4, %v2661_v6  ;;  %v3015_v58 = vld [vmem:[#allocation15 + $0x4d0] sm:$0xff]  ;;  %v3018_v5 = vld [vmem:[#allocation15 + $0x4e8] sm:$0xff]  ;;  %v3020_v6 = vld [vmem:[#allocation15 + $0x4f8] sm:$0xff] }
 0x54e   :  { %2851 = vmatprep.mubr.f32.mxu1 %v6602_v47 }
 0x54f   :  { %2852 = vmatmul.mubr.f32.gmra.mrb[78].mxu1 %v6600_v61 }
 0x550   :  { %4709 = vmatpush1.bf16.msra.mxu1 %v4708_v20  ;;  %2922 = vmatprep.mubr.f32.mxu1 %v5734_v0  ;;  %v2992_v20 = vld [vmem:[#allocation15 + $0x418] sm:$0xff] }
 0x551   :  { %4711 = vmatprep.subr.bf16.mxu1 %v4710_v42  ;;  %v4740_v42 = vpack.c.bf16 %v2662_v26, %v2660_v22  ;;  %v4742_v34 = vpack.c.bf16 %v2992_v20, %v2990_v28  ;;  %v3019_v22 = vld [vmem:[#allocation15 + $0x4f0] sm:$0xff]  ;;  %v3022_v26 = vld [vmem:[#allocation15 + $0x508] sm:$0xff]  ;;  %v3024_v28 = vld [vmem:[#allocation15 + $0x518] sm:$0xff] }
 0x554   :  { %4713 = vmatpush1.bf16.msra.mxu1 %v4712_v27  ;;  %v2996_v27 = vld [vmem:[#allocation15 + $0x438] sm:$0xff] }
 0x555   :  { %4715 = vmatprep.subr.bf16.mxu1 %v4714_v40  ;;  %v4744_v40 = vpack.c.bf16 %v2991_v36, %v2989_v25  ;;  %v4746_v43 = vpack.c.bf16 %v2996_v27, %v2994_v30  ;;  %v3023_v25 = vld [vmem:[#allocation15 + $0x510] sm:$0xff]  ;;  %v3026_v36 = vld [vmem:[#allocation15 + $0x528] sm:$0xff]  ;;  %v3028_v30 = vld [vmem:[#allocation15 + $0x538] sm:$0xff] }
 0x558   :  { %4717 = vmatpush1.bf16.msra.mxu1 %v4716_v9  ;;  %v3000_v9 = vld [vmem:[#allocation15 + $0x458] sm:$0xff] }
 0x559   :  { %4719 = vmatprep.subr.bf16.mxu1 %v4718_v44  ;;  %v4748_v44 = vpack.c.bf16 %v2995_v2, %v2993_v23  ;;  %v4750_v24 = vpack.c.bf16 %v3000_v9, %v2998_v41  ;;  %v3027_v23 = vld [vmem:[#allocation15 + $0x530] sm:$0xff]  ;;  %v3030_v2 = vld [vmem:[#allocation15 + $0x548] sm:$0xff]  ;;  %v3032_v41 = vld [vmem:[#allocation15 + $0x558] sm:$0xff] }
 0x55c   :  { %4721 = vmatpush1.bf16.msra.mxu1 %v4720_v17  ;;  %v3004_v17 = vld [vmem:[#allocation15 + $0x478] sm:$0xff] }
 0x55d   :  { %4723 = vmatprep.subr.bf16.mxu1 %v4722_v18  ;;  %v4752_v18 = vpack.c.bf16 %v2999_v48, %v2997_v46  ;;  %v4754_v19 = vpack.c.bf16 %v3004_v17, %v3002_v14  ;;  %v3031_v46 = vld [vmem:[#allocation15 + $0x550] sm:$0xff]  ;;  %v3034_v48 = vld [vmem:[#allocation15 + $0x568] sm:$0xff]  ;;  %v3036_v14 = vld [vmem:[#allocation15 + $0x578] sm:$0xff] }
 0x560   :  { %4725 = vmatpush1.bf16.msra.mxu1 %v4724_v13  ;;  %v4756_v13 = vpack.c.bf16 %v3003_v35, %v3001_v32  ;;  %v3038_v32 = vld [vmem:[#allocation15 + $0x588] sm:$0xff]  ;;  %v3040_v35 = vld [vmem:[#allocation15 + $0x598] sm:$0xff] }
 0x561   :  { %4727 = vmatprep.subr.bf16.mxu1 %v4726_v50 }
 0x564   :  { %4729 = vmatpush1.bf16.msra.mxu1 %v4728_v57  ;;  %v4762_v57 = vpack.c.bf16 %v3012_v51, %v3010_v52 }
 0x565   :  { %4731 = vmatprep.subr.bf16.mxu1 %v4730_v45  ;;  %v3009_v45 = vld [vmem:[#allocation15 + $0x4a0] sm:$0xff] }
 0x566   :  { %v4764_v3 = vpack.c.bf16 %v3011_v55, %v3009_v45  ;;  %v3046_v45 = vld [vmem:[#allocation15 + $0x5c8] sm:$0xff]  ;;  %v3048_v55 = vld [vmem:[#allocation15 + $0x5d8] sm:$0xff] }
 0x568   :  { %4733 = vmatpush1.bf16.msra.mxu1 %v4732_v33  ;;  %v4766_v33 = vpack.c.bf16 %v3016_v63, %v3014_v62  ;;  %v4798_v63 = vpack.c.bf16 %v3048_v55, %v3046_v45  ;;  %v3336_v55 = vld [vmem:[#allocation16 + $0x100] sm:$0xff] }
 0x569   :  { %4735 = vmatprep.subr.bf16.mxu1 %v4734_v10  ;;  %v3013_v10 = vld [vmem:[#allocation15 + $0x4c0] sm:$0xff] }
 0x56a   :  { %v4768_v4 = vpack.c.bf16 %v3015_v58, %v3013_v10  ;;  %v3050_v10 = vld [vmem:[#allocation15 + $0x5e8] sm:$0xff]  ;;  %v3052_v58 = vld [vmem:[#allocation15 + $0x5f8] sm:$0xff] }
 0x56c   :  { %4737 = vmatpush1.bf16.msra.mxu1 %v4736_v11  ;;  %v4770_v11 = vpack.c.bf16 %v3020_v6, %v3018_v5  ;;  %v4802_v6 = vpack.c.bf16 %v3052_v58, %v3050_v10  ;;  %v3341_v10 = vld [vmem:[#allocation16 + $0x128] sm:$0xff]  ;;  %v3343_v58 = vld [vmem:[#allocation16 + $0x138] sm:$0xff] }
 0x56d   :  { %4739 = vmatprep.subr.bf16.mxu1 %v4738_v38  ;;  %v3017_v38 = vld [vmem:[#allocation15 + $0x4e0] sm:$0xff] }
 0x56e   :  { %v4772_v20 = vpack.c.bf16 %v3019_v22, %v3017_v38 }
 0x570   :  { %4741 = vmatpush1.bf16.msra.mxu1 %v4740_v42  ;;  %v4774_v42 = vpack.c.bf16 %v3024_v28, %v3022_v26 }
 0x571   :  { %4743 = vmatprep.subr.bf16.mxu1 %v4742_v34  ;;  %v3021_v34 = vld [vmem:[#allocation15 + $0x500] sm:$0xff] }
 0x572   :  { %v4776_v27 = vpack.c.bf16 %v3023_v25, %v3021_v34 }
 0x573   :  { %2923 = vmatmul.mubr.f32.vlgmr.msra.gmra.mrb[64].mxu1 %v5734_v0 }
 0x574   :  { %2928 = vmatprep.mubr.f32.mxu1 %v6560_v31  ;;  %4745 = vmatpush1.bf16.msra.mxu1 %v4744_v40  ;;  %v3008_v31 = vld [vmem:[#allocation15 + $0x498] sm:$0xff]  ;;  %v4778_v40 = vpack.c.bf16 %v3028_v30, %v3026_v36  ;;  %v3300_v36 = vld [vmem:[#allocation16 + $0x8] sm:$0xff] }
 0x575   :  { %4747 = vmatprep.subr.bf16.mxu1 %v4746_v43  ;;  %v4758_v50 = vpack.c.bf16 %v3008_v31, %v3006_v37  ;;  %v3025_v43 = vld [vmem:[#allocation15 + $0x520] sm:$0xff]  ;;  %v4790_v31 = vpack.c.bf16 %v3040_v35, %v3038_v32  ;;  %v3302_v30 = vld [vmem:[#allocation16 + $0x18] sm:$0xff] }
 0x576   :  { %v4780_v9 = vpack.c.bf16 %v3027_v23, %v3025_v43  ;;  %v4838_v23 = vpack.c.bf16 %v3302_v30, %v3300_v36  ;;  %v3307_v35 = vld [vmem:[#allocation16 + $0x40] sm:$0xff]  ;;  %v3351_v36 = vld [vmem:[#allocation16 + $0x178] sm:$0xff] }
 0x577   :  { %2929 = vmatmul.mubr.f32.gmra.mrb[66].mxu1 %v6558_v29  ;;  %v3007_v29 = vld [vmem:[#allocation15 + $0x490] sm:$0xff] }
 0x578   :  { %2934 = vmatprep.mubr.f32.mxu1 %v6566_v49  ;;  %4749 = vmatpush1.bf16.msra.mxu1 %v4748_v44  ;;  %v4760_v53 = vpack.c.bf16 %v3007_v29, %v3005_v59  ;;  %v4782_v44 = vpack.c.bf16 %v3032_v41, %v3030_v2  ;;  %v3042_v59 = vld [vmem:[#allocation15 + $0x5a8] sm:$0xff]  ;;  %v3044_v29 = vld [vmem:[#allocation15 + $0x5b8] sm:$0xff]  ;;  %v3301_v2 = vld [vmem:[#allocation16 + $0x10] sm:$0xff] }
 0x579   :  { %4751 = vmatprep.subr.bf16.mxu1 %v4750_v24  ;;  %v3029_v24 = vld [vmem:[#allocation15 + $0x540] sm:$0xff]  ;;  %v4794_v51 = vpack.c.bf16 %v3044_v29, %v3042_v59  ;;  %v3304_v41 = vld [vmem:[#allocation16 + $0x28] sm:$0xff]  ;;  %4839 = vmatprep.subr.bf16.mxu0 %v4838_v23  ;;  %v3314_v59 = vld [vmem:[#allocation16 + $0x78] sm:$0xff] }
 0x57a   :  { %v4784_v17 = vpack.c.bf16 %v3031_v46, %v3029_v24  ;;  %v3337_v29 = vld [vmem:[#allocation16 + $0x108] sm:$0xff]  ;;  %v3350_v23 = vld [vmem:[#allocation16 + $0x170] sm:$0xff] }
 0x57b   :  { %2935 = vmatmul.mubr.f32.gmra.mrb[68].mxu1 %v6564_v60 }
 0x57c   :  { %2940 = vmatprep.mubr.f32.mxu1 %v6572_v15  ;;  %4753 = vmatpush1.bf16.msra.mxu1 %v4752_v18  ;;  %v4786_v18 = vpack.c.bf16 %v3036_v14, %v3034_v48  ;;  %v3303_v48 = vld [vmem:[#allocation16 + $0x20] sm:$0xff]  ;;  %v3305_v14 = vld [vmem:[#allocation16 + $0x30] sm:$0xff] }
 0x57d   :  { %4755 = vmatprep.subr.bf16.mxu1 %v4754_v19  ;;  %v3035_v19 = vld [vmem:[#allocation15 + $0x570] sm:$0xff] }
 0x57f   :  { %2941 = vmatmul.mubr.f32.gmra.mrb[70].mxu1 %v6570_v12 }
 0x580   :  { %2946 = vmatprep.mubr.f32.mxu1 %v6578_v56  ;;  %4757 = vmatpush1.bf16.msra.mxu1 %v4756_v13  ;;  %v3037_v13 = vld [vmem:[#allocation15 + $0x580] sm:$0xff] }
 0x581   :  { %4759 = vmatprep.subr.bf16.mxu1 %v4758_v50  ;;  %v3039_v50 = vld [vmem:[#allocation15 + $0x590] sm:$0xff] }
 0x582   :  { %v4792_v52 = vpack.c.bf16 %v3039_v50, %v3037_v13  ;;  %v3312_v50 = vld [vmem:[#allocation16 + $0x68] sm:$0xff] }
 0x583   :  { %2947 = vmatmul.mubr.f32.gmra.mrb[72].mxu1 %v6576_v16 }
 0x584   :  { %2952 = vmatprep.mubr.f32.mxu1 %v6584_v54  ;;  %4761 = vmatpush1.bf16.msra.mxu1 %v4760_v53  ;;  %v3041_v53 = vld [vmem:[#allocation15 + $0x5a0] sm:$0xff] }
 0x585   :  { %4763 = vmatprep.subr.bf16.mxu1 %v4762_v57  ;;  %v3043_v57 = vld [vmem:[#allocation15 + $0x5b0] sm:$0xff] }
 0x586   :  { %v4796_v62 = vpack.c.bf16 %v3043_v57, %v3041_v53  ;;  %v3311_v57 = vld [vmem:[#allocation16 + $0x60] sm:$0xff] }
 0x587   :  { %2953 = vmatmul.mubr.f32.gmra.mrb[74].mxu1 %v6582_v21 }
 0x588   :  { %2958 = vmatprep.mubr.f32.mxu1 %v6590_v1  ;;  %4765 = vmatpush1.bf16.msra.mxu1 %v4764_v3  ;;  %v3045_v3 = vld [vmem:[#allocation15 + $0x5c0] sm:$0xff] }
 0x589   :  { %4767 = vmatprep.subr.bf16.mxu1 %v4766_v33  ;;  %v3047_v33 = vld [vmem:[#allocation15 + $0x5d0] sm:$0xff] }
 0x58a   :  { %v4800_v5 = vpack.c.bf16 %v3047_v33, %v3045_v3  ;;  %v3313_v3 = vld [vmem:[#allocation16 + $0x70] sm:$0xff] }
 0x58b   :  { %2959 = vmatmul.mubr.f32.gmra.mrb[76].mxu1 %v6588_v39 }
 0x58c   :  { %2964 = vmatprep.mubr.f32.mxu1 %v6596_v8  ;;  %4769 = vmatpush1.bf16.msra.mxu1 %v4768_v4  ;;  %v3049_v4 = vld [vmem:[#allocation15 + $0x5e0] sm:$0xff] }
 0x58d   :  { %4771 = vmatprep.subr.bf16.mxu1 %v4770_v11  ;;  %v3051_v11 = vld [vmem:[#allocation15 + $0x5f0] sm:$0xff] }
 0x58e   :  { %v4804_v38 = vpack.c.bf16 %v3051_v11, %v3049_v4  ;;  %v4810_v4 = vpack.c.bf16 %v3343_v58, %v3341_v10  ;;  %v3340_v11 = vld [vmem:[#allocation16 + $0x120] sm:$0xff] }
 0x58f   :  { %2965 = vmatmul.mubr.f32.gmra.mrb[78].mxu1 %v6594_v7 }
 0x590   :  { %4773 = vmatpush1.bf16.msra.mxu1 %v4772_v20  ;;  %3117 = vmatprep.mubr.f32.mxu1 %v6566_v49  ;;  %v3033_v49 = vld [vmem:[#allocation15 + $0x560] sm:$0xff] }
 0x591   :  { %4775 = vmatprep.subr.bf16.mxu1 %v4774_v42  ;;  %v4788_v37 = vpack.c.bf16 %v3035_v19, %v3033_v49  ;;  %v4844_v49 = vpack.c.bf16 %v3305_v14, %v3303_v48 }
 0x594   :  { %4777 = vmatpush1.bf16.msra.mxu1 %v4776_v27  ;;  %v3299_v27 = vld [vmem:[#allocation16] sm:$0xff] }
 0x595   :  { %4779 = vmatprep.subr.bf16.mxu1 %v4778_v40  ;;  %v4840_v24 = vpack.c.bf16 %v3301_v2, %v3299_v27  ;;  %v3319_v27 = vld [vmem:[#allocation16 + $0xa0] sm:$0xff] }
 0x597   :  { %4841 = vmatpush1.bf16.msra.mxu0 %v4840_v24  ;;  %v3324_v24 = vld [vmem:[#allocation16 + $0xc8] sm:$0xff] }
 0x598   :  { %4781 = vmatpush1.bf16.msra.mxu1 %v4780_v9  ;;  %v3306_v9 = vld [vmem:[#allocation16 + $0x38] sm:$0xff] }
 0x599   :  { %4783 = vmatprep.subr.bf16.mxu1 %v4782_v44  ;;  %v4842_v46 = vpack.c.bf16 %v3306_v9, %v3304_v41  ;;  %v3321_v41 = vld [vmem:[#allocation16 + $0xb0] sm:$0xff]  ;;  %v3353_v9 = vld [vmem:[#allocation16 + $0x188] sm:$0xff] }
 0x59a   :  { %v4860_v14 = vpack.c.bf16 %v3321_v41, %v3319_v27  ;;  %v3360_v27 = vld [vmem:[#allocation16 + $0x1c0] sm:$0xff]  ;;  %v3566_v41 = vld [vmem:[#allocation16 + $0x270] sm:$0xff] }
 0x59b   :  { %4843 = vmatprep.subr.bf16.mxu0 %v4842_v46  ;;  %v3326_v46 = vld [vmem:[#allocation16 + $0xd8] sm:$0xff] }
 0x59c   :  { %4785 = vmatpush1.bf16.msra.mxu1 %v4784_v17  ;;  %v3308_v17 = vld [vmem:[#allocation16 + $0x48] sm:$0xff]  ;;  %4845 = vmatpush1.bf16.msra.mxu0 %v4844_v49  ;;  %v3352_v49 = vld [vmem:[#allocation16 + $0x180] sm:$0xff] }
 0x59d   :  { %4787 = vmatprep.subr.bf16.mxu1 %v4786_v18  ;;  %v3310_v18 = vld [vmem:[#allocation16 + $0x58] sm:$0xff] }
 0x59e   :  { %v4846_v32 = vpack.c.bf16 %v3310_v18, %v3308_v17  ;;  %v3323_v17 = vld [vmem:[#allocation16 + $0xc0] sm:$0xff] }
 0x5a0   :  { %4789 = vmatpush1.bf16.msra.mxu1 %v4788_v37  ;;  %v3309_v37 = vld [vmem:[#allocation16 + $0x50] sm:$0xff]  ;;  %4847 = vmatprep.subr.bf16.mxu0 %v4846_v32  ;;  %v4862_v32 = vpack.c.bf16 %v3326_v46, %v3324_v24  ;;  %v3365_v24 = vld [vmem:[#allocation16 + $0x1e8] sm:$0xff]  ;;  %v3367_v46 = vld [vmem:[#allocation16 + $0x1f8] sm:$0xff] }
 0x5a1   :  { %4791 = vmatprep.subr.bf16.mxu1 %v4790_v31  ;;  %v4848_v53 = vpack.c.bf16 %v3309_v37, %v3307_v35  ;;  %v3325_v35 = vld [vmem:[#allocation16 + $0xd0] sm:$0xff]  ;;  %v3357_v37 = vld [vmem:[#allocation16 + $0x1a8] sm:$0xff] }
 0x5a3   :  { %4849 = vmatpush1.bf16.msra.mxu0 %v4848_v53 }
 0x5a4   :  { %4793 = vmatpush1.bf16.msra.mxu1 %v4792_v52 }
 0x5a5   :  { %4795 = vmatprep.subr.bf16.mxu1 %v4794_v51  ;;  %v3339_v51 = vld [vmem:[#allocation16 + $0x118] sm:$0xff] }
 0x5a6   :  { %v4806_v45 = vpack.c.bf16 %v3339_v51, %v3337_v29  ;;  %v4864_v51 = vpack.c.bf16 %v3325_v35, %v3323_v17  ;;  %v3571_v17 = vld [vmem:[#allocation16 + $0x298] sm:$0xff]  ;;  %v3568_v35 = vld [vmem:[#allocation16 + $0x280] sm:$0xff] }
 0x5a8   :  { %4797 = vmatpush1.bf16.msra.mxu1 %v4796_v62  ;;  %v3338_v62 = vld [vmem:[#allocation16 + $0x110] sm:$0xff] }
 0x5a9   :  { %4799 = vmatprep.subr.bf16.mxu1 %v4798_v63  ;;  %v4850_v63 = vpack.c.bf16 %v3314_v59, %v3312_v50  ;;  %v4808_v33 = vpack.c.bf16 %v3338_v62, %v3336_v55  ;;  %v3328_v50 = vld [vmem:[#allocation16 + $0xe8] sm:$0xff]  ;;  %v3330_v59 = vld [vmem:[#allocation16 + $0xf8] sm:$0xff]  ;;  %v3327_v62 = vld [vmem:[#allocation16 + $0xe0] sm:$0xff] }
 0x5aa   :  { %v4866_v55 = vpack.c.bf16 %v3330_v59, %v3328_v50 }
 0x5ab   :  { %4851 = vmatprep.subr.bf16.mxu0 %v4850_v63  ;;  %v3329_v63 = vld [vmem:[#allocation16 + $0xf0] sm:$0xff] }
 0x5ac   :  { %4801 = vmatpush1.bf16.msra.mxu1 %v4800_v5  ;;  %v3316_v5 = vld [vmem:[#allocation16 + $0x88] sm:$0xff]  ;;  %v4868_v58 = vpack.c.bf16 %v3329_v63, %v3327_v62  ;;  %v3572_v62 = vld [vmem:[#allocation16 + $0x2a0] sm:$0xff]  ;;  %v3574_v63 = vld [vmem:[#allocation16 + $0x2b0] sm:$0xff] }
 0x5ad   :  { %4803 = vmatprep.subr.bf16.mxu1 %v4802_v6  ;;  %v3318_v6 = vld [vmem:[#allocation16 + $0x98] sm:$0xff] }
 0x5b0   :  { %4805 = vmatpush1.bf16.msra.mxu1 %v4804_v38  ;;  %v3342_v38 = vld [vmem:[#allocation16 + $0x130] sm:$0xff] }
 0x5b1   :  { %4807 = vmatprep.subr.bf16.mxu1 %v4806_v45  ;;  %v3358_v45 = vld [vmem:[#allocation16 + $0x1b0] sm:$0xff] }
 0x5b3   :  { %3118 = vmatmul.mubr.f32.vlgmr.msra.gmra.mrb[64].mxu1 %v6564_v60 }
 0x5b4   :  { %3123 = vmatprep.mubr.f32.mxu1 %v6572_v15  ;;  %4809 = vmatpush1.bf16.msra.mxu1 %v4808_v33  ;;  %v3555_v33 = vld [vmem:[#allocation16 + $0x218] sm:$0xff] }
 0x5b5   :  { %4811 = vmatprep.subr.bf16.mxu1 %v4810_v4  ;;  %v3554_v4 = vld [vmem:[#allocation16 + $0x210] sm:$0xff] }
 0x5b7   :  { %3124 = vmatmul.mubr.f32.gmra.mrb[66].mxu1 %v6570_v12 }
 0x5b8   :  { %3129 = vmatprep.mubr.f32.mxu1 %v6578_v56 }
 0x5bb   :  { %3130 = vmatmul.mubr.f32.gmra.mrb[68].mxu1 %v6576_v16 }
 0x5bc   :  { %3135 = vmatprep.mubr.f32.mxu1 %v6584_v54 }
 0x5bf   :  { %3136 = vmatmul.mubr.f32.gmra.mrb[70].mxu1 %v6582_v21 }
 0x5c0   :  { %3141 = vmatprep.mubr.f32.mxu1 %v6590_v1 }
 0x5c3   :  { %3142 = vmatmul.mubr.f32.gmra.mrb[72].mxu1 %v6588_v39 }
 0x5c4   :  { %3147 = vmatprep.mubr.f32.mxu1 %v6596_v8 }
 0x5c7   :  { %3148 = vmatmul.mubr.f32.gmra.mrb[74].mxu1 %v6594_v7 }
 0x5c8   :  { %3153 = vmatprep.mubr.f32.mxu1 %v6602_v47 }
 0x5cb   :  { %3154 = vmatmul.mubr.f32.gmra.mrb[76].mxu1 %v6600_v61 }
 0x5cc   :  { %3159 = vmatprep.mubr.f32.mxu1 %v5734_v0 }
 0x5cf   :  { %3160 = vmatmul.mubr.f32.gmra.mrb[78].mxu1 %v5734_v0 }
 0x5d0   :  { %3432 = vmatprep.mubr.f32.mxu1 %v5734_v0 }
 0x686   :  { %v3119_v60 = vpop.f32.mrb[64].mxu1 }
 0x687   :  { %v3121_v12 = vpop.f32.mrb[65].mxu1 }
 0x68a   :  { %v3125_v15 = vpop.f32.mrb[66].mxu1 }
 0x68b   :  { %v6639_v16 = vmax.f32 %v3119_v60, %v3125_v15  ;;  %v3127_v56 = vpop.f32.mrb[67].mxu1  ;;  %v4852_v60 = vpack.c.bf16 %v3313_v3, %v3311_v57  ;;  %v4812_v15 = vpack.c.bf16 %v3342_v38, %v3340_v11  ;;  %v3356_v57 = vld [vmem:[#allocation16 + $0x1a0] sm:$0xff]  ;;  %v3553_v3 = vld [vmem:[#allocation16 + $0x208] sm:$0xff]  ;;  %v3559_v38 = vld [vmem:[#allocation16 + $0x238] sm:$0xff] }
 0x68c   :  { %v6641_v21 = vmax.f32 %v3121_v12, %v3127_v56  ;;  %v3315_v12 = vld [vmem:[#allocation16 + $0x80] sm:$0xff]  ;;  %v3345_v56 = vld [vmem:[#allocation16 + $0x148] sm:$0xff]  ;;  %v4828_v10 = vpack.c.bf16 %v3358_v45, %v3356_v57 }
 0x68d   :  { %4813 = vmatpush1.bf16.msra.mxu1 %v4812_v15  ;;  %4853 = vmatpush1.bf16.msra.mxu0 %v4852_v60  ;;  %v3557_v11 = vld [vmem:[#allocation16 + $0x228] sm:$0xff]  ;;  %v3556_v15 = vld [vmem:[#allocation16 + $0x220] sm:$0xff] }
 0x68e   :  { %v5502_v54 = vpack.i.bf16 %v6641_v21, %v6639_v16  ;;  %v3131_v39 = vpop.f32.mrb[68].mxu1 }
 0x68f   :  { %v3133_v1 = vpop.f32.mrb[69].mxu1 }
 0x690   :  { %5503 = vrot.lane.b32.xlu1 %v5502_v54, %s5736_s11  ;;  %v3347_v54 = vld [vmem:[#allocation16 + $0x158] sm:$0xff] }
 0x692   :  { %v3137_v7 = vpop.f32.mrb[70].mxu1 }
 0x693   :  { %v6646_v8 = vmax.f32 %v3131_v39, %v3137_v7  ;;  %v3139_v61 = vpop.f32.mrb[71].mxu1  ;;  %v4854_v39 = vpack.c.bf16 %v3318_v6, %v3316_v5  ;;  %v4814_v7 = vpack.c.bf16 %v3347_v54, %v3345_v56  ;;  %v4870_v5 = vpack.c.bf16 %v3555_v33, %v3553_v3  ;;  %v3552_v6 = vld [vmem:[#allocation16 + $0x200] sm:$0xff]  ;;  %v3558_v56 = vld [vmem:[#allocation16 + $0x230] sm:$0xff]  ;;  %v3561_v54 = vld [vmem:[#allocation16 + $0x248] sm:$0xff] }
 0x694   :  { %v6648_v47 = vmax.f32 %v3133_v1, %v3139_v61  ;;  %v3317_v1 = vld [vmem:[#allocation16 + $0x90] sm:$0xff]  ;;  %v3344_v61 = vld [vmem:[#allocation16 + $0x140] sm:$0xff]  ;;  %v4872_v60 = vpack.c.bf16 %v3554_v4, %v3552_v6  ;;  %v4892_v3 = vpack.c.bf16 %v3574_v63, %v3572_v62  ;;  %v3577_v6 = vld [vmem:[#allocation16 + $0x2c8] sm:$0xff] }
 0x695   :  { %v4856_v30 = vpack.c.bf16 %v3317_v1, %v3315_v12  ;;  %4815 = vmatprep.subr.bf16.mxu1 %v4814_v7  ;;  %4855 = vmatprep.subr.bf16.mxu0 %v4854_v39  ;;  %v4874_v12 = vpack.c.bf16 %v3559_v38, %v3557_v11  ;;  %v3563_v39 = vld [vmem:[#allocation16 + $0x258] sm:$0xff]  ;;  %v4876_v1 = vpack.c.bf16 %v3558_v56, %v3556_v15  ;;  %v3578_v15 = vld [vmem:[#allocation16 + $0x2d0] sm:$0xff] }
 0x696   :  { %v5507_v22 = vpack.i.bf16 %v6648_v47, %v6646_v8  ;;  %v3143_v26 = vpop.f32.mrb[72].mxu1  ;;  %v4878_v7 = vpack.c.bf16 %v3563_v39, %v3561_v54  ;;  %v3579_v4 = vld [vmem:[#allocation16 + $0x2d8] sm:$0xff]  ;;  %v3580_v39 = vld [vmem:[#allocation16 + $0x2e0] sm:$0xff] }
 0x697   :  { %v3145_v28 = vpop.f32.mrb[73].mxu1  ;;  %4857 = vmatpush1.bf16.msra.mxu0 %v4856_v30  ;;  %v3567_v30 = vld [vmem:[#allocation16 + $0x278] sm:$0xff] }
 0x698   :  { %5508 = vrot.lane.b32.xlu0 %v5507_v22, %s5736_s11  ;;  %v3346_v22 = vld [vmem:[#allocation16 + $0x150] sm:$0xff] }
 0x69a   :  { %v3149_v20 = vpop.f32.mrb[74].mxu1 }
 0x69b   :  { %v6653_v42 = vmax.f32 %v3143_v26, %v3149_v20  ;;  %v3151_v34 = vpop.f32.mrb[75].mxu1  ;;  %v3320_v26 = vld [vmem:[#allocation16 + $0xa8] sm:$0xff] }
 0x69c   :  { %v6655_v25 = vmax.f32 %v3145_v28, %v3151_v34  ;;  %v3322_v28 = vld [vmem:[#allocation16 + $0xb8] sm:$0xff]  ;;  %v3349_v20 = vld [vmem:[#allocation16 + $0x168] sm:$0xff]  ;;  %v4816_v34 = vpack.c.bf16 %v3346_v22, %v3344_v61  ;;  %v3560_v61 = vld [vmem:[#allocation16 + $0x240] sm:$0xff] }
 0x69d   :  { %v4858_v2 = vpack.c.bf16 %v3322_v28, %v3320_v26  ;;  %v3562_v22 = vld [vmem:[#allocation16 + $0x250] sm:$0xff]  ;;  %v3361_v28 = vld [vmem:[#allocation16 + $0x1c8] sm:$0xff] }
 0x69e   :  { %v5512_v40 = vpack.i.bf16 %v6655_v25, %v6653_v42  ;;  %v3155_v43 = vpop.f32.mrb[76].mxu1  ;;  %4817 = vmatpush1.bf16.msra.mxu1 %v4816_v34  ;;  %v4880_v26 = vpack.c.bf16 %v3562_v22, %v3560_v61  ;;  %v3565_v34 = vld [vmem:[#allocation16 + $0x268] sm:$0xff] }
 0x69f   :  { %v3157_v44 = vpop.f32.mrb[77].mxu1  ;;  %4859 = vmatprep.subr.bf16.mxu0 %v4858_v2  ;;  %v3564_v2 = vld [vmem:[#allocation16 + $0x260] sm:$0xff] }
 0x6a0   :  { %5513 = vrot.lane.b32.xlu1 %v5512_v40, %s5736_s11  ;;  %v4818_v40 = vpack.c.bf16 %v3351_v36, %v3349_v20  ;;  %4861 = vmatpush1.bf16.msra.mxu0 %v4860_v14  ;;  %v3363_v20 = vld [vmem:[#allocation16 + $0x1d8] sm:$0xff]  ;;  %v4834_v14 = vpack.c.bf16 %v3367_v46, %v3365_v24 }
 0x6a1   :  { %4863 = vmatprep.subr.bf16.mxu0 %v4862_v32  ;;  %v4830_v36 = vpack.c.bf16 %v3363_v20, %v3361_v28 }
 0x6a2   :  { %v3161_v19 = vpop.f32.mrb[78].mxu1  ;;  %4819 = vmatprep.subr.bf16.mxu1 %v4818_v40  ;;  %v3362_v40 = vld [vmem:[#allocation16 + $0x1d0] sm:$0xff] }
 0x6a3   :  { %v6660_v31 = vmax.f32 %v3155_v43, %v3161_v19  ;;  %v3163_v13 = vpop.f32.mrb[79].mxu1  ;;  %v3348_v43 = vld [vmem:[#allocation16 + $0x160] sm:$0xff]  ;;  %v3354_v19 = vld [vmem:[#allocation16 + $0x190] sm:$0xff] }
 0x6a4   :  { %v6662_v52 = vmax.f32 %v3157_v44, %v3163_v13  ;;  %v3355_v44 = vld [vmem:[#allocation16 + $0x198] sm:$0xff]  ;;  %v4820_v48 = vpack.c.bf16 %v3350_v23, %v3348_v43  ;;  %v4824_v29 = vpack.c.bf16 %v3354_v19, %v3352_v49  ;;  %4865 = vmatpush1.bf16.msra.mxu0 %v4864_v51  ;;  %v4882_v43 = vpack.c.bf16 %v3567_v30, %v3565_v34  ;;  %v3366_v49 = vld [vmem:[#allocation16 + $0x1f0] sm:$0xff]  ;;  %v3573_v51 = vld [vmem:[#allocation16 + $0x2a8] sm:$0xff] }
 0x6a5   :  { %v4822_v18 = vpack.c.bf16 %v3355_v44, %v3353_v9  ;;  %v3359_v13 = vld [vmem:[#allocation16 + $0x1b8] sm:$0xff]  ;;  %4867 = vmatprep.subr.bf16.mxu0 %v4866_v55  ;;  %v4832_v23 = vpack.c.bf16 %v3362_v40, %v3360_v27  ;;  %v4884_v9 = vpack.c.bf16 %v3566_v41, %v3564_v2 }
 0x6a6   :  { %4821 = vmatpush1.bf16.msra.mxu1 %v4820_v48  ;;  %v4826_v53 = vpack.c.bf16 %v3359_v13, %v3357_v37  ;;  %v3569_v48 = vld [vmem:[#allocation16 + $0x288] sm:$0xff]  ;;  %v3570_v37 = vld [vmem:[#allocation16 + $0x290] sm:$0xff] }
 0x6a7   :  { %4823 = vmatprep.subr.bf16.mxu1 %v4822_v18  ;;  %v3364_v18 = vld [vmem:[#allocation16 + $0x1e0] sm:$0xff]  ;;  %v4886_v19 = vpack.c.bf16 %v3571_v17, %v3569_v48  ;;  %v4888_v59 = vpack.c.bf16 %v3570_v37, %v3568_v35  ;;  %v3772_v35 = vld [vmem:[#allocation18 + $0x208] sm:$0xff]  ;;  %v3774_v37 = vld [vmem:[#allocation18 + $0x218] sm:$0xff] }
 0x6a8   :  { %4869 = vmatpush1.bf16.msra.mxu0 %v4868_v58  ;;  %v4836_v32 = vpack.c.bf16 %v3366_v49, %v3364_v18 }
 0x6a9   :  { %4871 = vmatprep.subr.bf16.mxu0 %v4870_v5 }
 0x6aa   :  { %4825 = vmatpush1.bf16.msra.mxu1 %v4824_v29 }
 0x6ab   :  { %4827 = vmatprep.subr.bf16.mxu1 %v4826_v53  ;;  %3522 = vmatmul.mubr.f32.vlgmr.msra.gmra.mrb[48].mxu0 %v5734_v0  ;;  %v3575_v53 = vld [vmem:[#allocation16 + $0x2b8] sm:$0xff] }
 0x6ac   :  { %4873 = vmatpush1.bf16.msra.mxu0 %v4872_v60  ;;  %3527 = vmatprep.mubr.f32.mxu0 %v5734_v0  ;;  %v4890_v55 = vpack.c.bf16 %v3575_v53, %v3573_v51  ;;  %v4894_v60 = vpack.c.bf16 %v3579_v4, %v3577_v6  ;;  %v3771_v53 = vld [vmem:[#allocation18 + $0x200] sm:$0xff] }
 0x6ad   :  { %4875 = vmatprep.subr.bf16.mxu0 %v4874_v12  ;;  %v3576_v12 = vld [vmem:[#allocation16 + $0x2c0] sm:$0xff] }
 0x6ae   :  { %4829 = vmatpush1.bf16.msra.mxu1 %v4828_v10  ;;  %v4896_v56 = vpack.c.bf16 %v3578_v15, %v3576_v12  ;;  %v3779_v4 = vld [vmem:[#allocation18 + $0x240] sm:$0xff] }
 0x6af   :  { %4831 = vmatprep.subr.bf16.mxu1 %v4830_v36 }
 0x6b0   :  { %4877 = vmatpush1.bf16.msra.mxu0 %v4876_v1  ;;  %v3582_v1 = vld [vmem:[#allocation16 + $0x2f0] sm:$0xff] }
 0x6b1   :  { %4879 = vmatprep.subr.bf16.mxu0 %v4878_v7  ;;  %v4900_v7 = vpack.c.bf16 %v3582_v1, %v3580_v39  ;;  %v3787_v39 = vld [vmem:[#allocation18 + $0x280] sm:$0xff]  ;;  %v3789_v1 = vld [vmem:[#allocation18 + $0x290] sm:$0xff] }
 0x6b2   :  { %4833 = vmatpush1.bf16.msra.mxu1 %v4832_v23 }
 0x6b3   :  { %4835 = vmatprep.subr.bf16.mxu1 %v4834_v14 }
 0x6b4   :  { %4881 = vmatpush1.bf16.msra.mxu0 %v4880_v26 }
 0x6b5   :  { %4883 = vmatprep.subr.bf16.mxu0 %v4882_v43 }
 0x6b6   :  { %4837 = vmatpush1.bf16.msra.mxu1 %v4836_v32 }
 0x6b8   :  { %4885 = vmatpush1.bf16.msra.mxu0 %v4884_v9 }
 0x6b9   :  { %4887 = vmatprep.subr.bf16.mxu0 %v4886_v19 }
 0x6bc   :  { %4889 = vmatpush1.bf16.msra.mxu0 %v4888_v59  ;;  %v4902_v59 = vpack.c.bf16 %v3774_v37, %v3772_v35  ;;  %v3807_v37 = vld [vmem:[#allocation18 + $0x320] sm:$0xff] }
 0x6bd   :  { %4891 = vmatprep.subr.bf16.mxu0 %v4890_v55  ;;  %v3778_v55 = vld [vmem:[#allocation18 + $0x238] sm:$0xff] }
 0x6c0   :  { %4893 = vmatpush1.bf16.msra.mxu0 %v4892_v3  ;;  %v3775_v3 = vld [vmem:[#allocation18 + $0x220] sm:$0xff] }
 0x6c1   :  { %4895 = vmatprep.subr.bf16.mxu0 %v4894_v60  ;;  %v3786_v60 = vld [vmem:[#allocation18 + $0x278] sm:$0xff] }
 0x6c4   :  { %4897 = vmatpush1.bf16.msra.mxu0 %v4896_v56  ;;  %v3783_v56 = vld [vmem:[#allocation18 + $0x260] sm:$0xff] }
 0x702   :  { %v5504_v44 = vpop.permute.xlu1 %5503 }
 0x703   :  { %v5506_v13 = vunpack.i.h.bf16 %v5504_v44  ;;  %v5505_v50 = vunpack.i.l.bf16 %v5504_v44 }
 0x705   :  { %v3226_v33 = vmax.f32 %v6641_v21, %v5506_v13  ;;  %v3206_v10 = vmax.f32 %v6639_v16, %v5505_v50  ;;  %v3581_v16 = vld [vmem:[#allocation16 + $0x2e8] sm:$0xff] }
 0x70a   :  { %v5509_v29 = vpop.permute.xlu0 %5508 }
 0x70b   :  { %v5511_v57 = vunpack.i.h.bf16 %v5509_v29  ;;  %v5510_v45 = vunpack.i.l.bf16 %v5509_v29 }
 0x70d   :  { %v3227_v58 = vmax.f32 %v6648_v47, %v5511_v57  ;;  %v3207_v5 = vmax.f32 %v6646_v8, %v5510_v45  ;;  %v3583_v47 = vld [vmem:[#allocation16 + $0x2f8] sm:$0xff]  ;;  %v3773_v57 = vld [vmem:[#allocation18 + $0x210] sm:$0xff]  ;;  %v3776_v45 = vld [vmem:[#allocation18 + $0x228] sm:$0xff] }
 0x70e   :  { %v4898_v8 = vpack.c.bf16 %v3583_v47, %v3581_v16  ;;  %v4904_v62 = vpack.c.bf16 %v3773_v57, %v3771_v53  ;;  %v4906_v63 = vpack.c.bf16 %v3778_v55, %v3776_v45  ;;  %v3788_v16 = vld [vmem:[#allocation18 + $0x288] sm:$0xff]  ;;  %v3790_v47 = vld [vmem:[#allocation18 + $0x298] sm:$0xff] }
 0x70f   :  { %v5517_v11 = vpack.i.bf16 %v3207_v5, %v3206_v10  ;;  %v5522_v38 = vpack.i.bf16 %v3227_v58, %v3226_v33  ;;  %v3777_v33 = vld [vmem:[#allocation18 + $0x230] sm:$0xff]  ;;  %v3782_v58 = vld [vmem:[#allocation18 + $0x258] sm:$0xff]  ;;  %v3816_v53 = vld [vmem:[#allocation18 + $0x368] sm:$0xff] }
 0x710   :  { %4899 = vmatprep.subr.bf16.mxu0 %v4898_v8  ;;  %v4918_v8 = vpack.c.bf16 %v3790_v47, %v3788_v16  ;;  %v3818_v57 = vld [vmem:[#allocation18 + $0x378] sm:$0xff] }
 0x711   :  { %5518 = vrot.lane.b32.xlu0 %v5517_v11, %s5736_s11  ;;  %5523 = vrot.lane.b32.xlu1 %v5522_v38, %s5738_s17  ;;  %v3781_v11 = vld [vmem:[#allocation18 + $0x250] sm:$0xff]  ;;  %v4946_v55 = vpack.c.bf16 %v3818_v57, %v3816_v53  ;;  %v3830_v16 = vld [vmem:[#allocation18 + $0x3d8] sm:$0xff] }
 0x712   :  { %v5514_v21 = vpop.permute.xlu1 %5513  ;;  %4901 = vmatpush1.bf16.msra.mxu0 %v4900_v7  ;;  %v4912_v12 = vpack.c.bf16 %v3781_v11, %v3779_v4  ;;  %v3792_v7 = vld [vmem:[#allocation18 + $0x2a8] sm:$0xff] }
 0x713   :  { %v5515_v54 = vunpack.i.l.bf16 %v5514_v21  ;;  %v5516_v22 = vunpack.i.h.bf16 %v5514_v21  ;;  %4903 = vmatprep.subr.bf16.mxu0 %v4902_v59  ;;  %v3785_v21 = vld [vmem:[#allocation18 + $0x270] sm:$0xff]  ;;  %v3824_v11 = vld [vmem:[#allocation18 + $0x3a8] sm:$0xff] }
 0x715   :  { %v3208_v61 = vmax.f32 %v6653_v42, %v5515_v54  ;;  %5528 = vrot.lane.b32.xlu0 %v5522_v38, %s5740_s20  ;;  %v3228_v28 = vmax.f32 %v6655_v25, %v5516_v22  ;;  %v3784_v38 = vld [vmem:[#allocation18 + $0x268] sm:$0xff]  ;;  %v4916_v54 = vpack.c.bf16 %v3785_v21, %v3783_v56  ;;  %v4920_v22 = vpack.c.bf16 %v3789_v1, %v3787_v39 }
 0x716   :  { %v4914_v15 = vpack.c.bf16 %v3786_v60, %v3784_v38  ;;  %v3826_v38 = vld [vmem:[#allocation18 + $0x3b8] sm:$0xff]  ;;  %v3828_v21 = vld [vmem:[#allocation18 + $0x3c8] sm:$0xff] }
 0x717   :  { %v5532_v26 = vpack.i.bf16 %v3208_v61, %v6660_v31  ;;  %v4954_v60 = vpack.c.bf16 %v3826_v38, %v3824_v11  ;;  %v4958_v47 = vpack.c.bf16 %v3830_v16, %v3828_v21  ;;  %v3832_v1 = vld [vmem:[#allocation18 + $0x3e8] sm:$0xff]  ;;  %v3717_v11 = vld [vmem:[#allocation18 + $0x98] sm:$0xff] }
 0x718   :  { %v3721_v21 = vld [vmem:[#allocation18 + $0xb8] sm:$0xff] }
 0x719   :  { %5533 = vrot.lane.b32.xlu1 %v5532_v26, %s5736_s11  ;;  %3220 = vrot.lane.b32.xlu0 %v6662_v52, %s5736_s11 }
 0x71d   :  { %3254 = vrot.lane.b32.xlu1 %v3228_v28, %s5738_s17  ;;  %3266 = vrot.lane.b32.xlu0 %v3228_v28, %s5740_s20  ;;  %v3791_v28 = vld [vmem:[#allocation18 + $0x2a0] sm:$0xff] }
 0x783   :  { %v5519_v20 = vpop.permute.xlu0 %5518  ;;  %v5524_v42 = vpop.permute.xlu1 %5523 }
 0x784   :  { %v5521_v34 = vunpack.i.h.bf16 %v5519_v20  ;;  %v5520_v36 = vunpack.i.l.bf16 %v5519_v20  ;;  %v5525_v30 = vunpack.i.l.bf16 %v5524_v42  ;;  %v5526_v40 = vunpack.i.h.bf16 %v5524_v42  ;;  %v3793_v20 = vld [vmem:[#allocation18 + $0x2b0] sm:$0xff]  ;;  %v3796_v42 = vld [vmem:[#allocation18 + $0x2c8] sm:$0xff] }
 0x786   :  { %v3274_v27 = vsel %vm2019_vm2, %v3206_v10, %v5520_v36  ;;  %v3275_v23 = vsel %vm2019_vm2, %v3207_v5, %v5521_v34  ;;  %v3780_v10 = vld [vmem:[#allocation18 + $0x248] sm:$0xff]  ;;  %v4908_v5 = vpack.c.bf16 %v3777_v33, %v3775_v3  ;;  %v3798_v34 = vld [vmem:[#allocation18 + $0x2d8] sm:$0xff]  ;;  %v4924_v36 = vpack.c.bf16 %v3793_v20, %v3791_v28 }
 0x787   :  { %v5529_v43 = vpop.permute.xlu0 %5528  ;;  %v3278_v9 = vsel %vm2036_vm3, %v3274_v27, %v5525_v30  ;;  %v3279_v44 = vsel %vm2036_vm3, %v3275_v23, %v5526_v40  ;;  %v4910_v6 = vpack.c.bf16 %v3782_v58, %v3780_v10  ;;  %v4926_v30 = vpack.c.bf16 %v3798_v34, %v3796_v42  ;;  %v3795_v27 = vld [vmem:[#allocation18 + $0x2c0] sm:$0xff]  ;;  %v3797_v40 = vld [vmem:[#allocation18 + $0x2d0] sm:$0xff]  ;;  %v3802_v23 = vld [vmem:[#allocation18 + $0x2f8] sm:$0xff] }
 0x788   :  { %v5531_v2 = vunpack.i.h.bf16 %v5529_v43  ;;  %v5530_v41 = vunpack.i.l.bf16 %v5529_v43  ;;  %v3800_v43 = vld [vmem:[#allocation18 + $0x2e8] sm:$0xff]  ;;  %v3822_v10 = vld [vmem:[#allocation18 + $0x398] sm:$0xff] }
 0x789   :  { %v3820_v33 = vld [vmem:[#allocation18 + $0x388] sm:$0xff]  ;;  %v3701_v42 = vld [vmem:[#allocation18 + $0x18] sm:$0xff] }
 0x78a   :  { %v3282_v25 = vsel %vm2054_vm5, %v3278_v9, %v5530_v41  ;;  %v3283_v49 = vsel %vm2054_vm5, %v3279_v44, %v5531_v2  ;;  %v4928_v2 = vpack.c.bf16 %v3797_v40, %v3795_v27  ;;  %v4930_v41 = vpack.c.bf16 %v3802_v23, %v3800_v43  ;;  %v3799_v9 = vld [vmem:[#allocation18 + $0x2e0] sm:$0xff]  ;;  %v3804_v44 = vld [vmem:[#allocation18 + $0x308] sm:$0xff] }
 0x78b   :  { %v3286_v24 = vmax.f32 %v3282_v25, 0.0  ;;  %v5534_v46 = vpop.permute.xlu1 %5533  ;;  %v3221_v48 = vpop.permute.xlu0 %3220  ;;  %v3801_v25 = vld [vmem:[#allocation18 + $0x2f0] sm:$0xff]  ;;  %v4950_v58 = vpack.c.bf16 %v3822_v10, %v3820_v33  ;;  %v3699_v20 = vld [vmem:[#allocation18 + $0x8] sm:$0xff]  ;;  %v3713_v33 = vld [vmem:[#allocation18 + $0x78] sm:$0xff] }
 0x78c   :  { %v5536_v14 = vunpack.i.h.bf16 %v5534_v46  ;;  %v5535_v17 = vunpack.i.l.bf16 %v5534_v46  ;;  %v3229_v18 = vmax.f32 %v6662_v52, %v3221_v48  ;;  %v3287_v52 = vmax.f32 %v3283_v49, 0.0  ;;  %v3810_v49 = vld [vmem:[#allocation18 + $0x338] sm:$0xff] }
 0x78d   :  { %3433 = vmatmul.mubr.f32.vlgmr.msra.gmra.mrb[80].mxu1 %v3286_v24  ;;  %3528 = vmatmul.mubr.f32.gmra.mrb[50].mxu0 %v3286_v24  ;;  %v3806_v24 = vld [vmem:[#allocation18 + $0x318] sm:$0xff]  ;;  %v4932_v46 = vpack.c.bf16 %v3801_v25, %v3799_v9  ;;  %v4966_v34 = vpack.c.bf16 %v3701_v42, %v3699_v20 }
 0x78e   :  { %v6689_v19 = vmax.f32 %v6660_v31, %v5535_v17  ;;  %3256 = vrot.lane.b32.xlu0 %v3229_v18, %s5738_s17  ;;  %v3276_v32 = vsel %vm2019_vm2, %v3208_v61, %v5536_v14  ;;  %3438 = vmatprep.mubr.f32.mxu1 %v5734_v0  ;;  %v3794_v61 = vld [vmem:[#allocation18 + $0x2b8] sm:$0xff]  ;;  %v4934_v48 = vpack.c.bf16 %v3806_v24, %v3804_v44  ;;  %v3803_v14 = vld [vmem:[#allocation18 + $0x300] sm:$0xff]  ;;  %v3805_v17 = vld [vmem:[#allocation18 + $0x310] sm:$0xff] }
 0x78f   :  { %v3255_v13 = vpop.permute.xlu1 %3254  ;;  %v3267_v50 = vpop.permute.xlu0 %3266  ;;  %3533 = vmatprep.mubr.f32.mxu0 %v5734_v0  ;;  %v4922_v26 = vpack.c.bf16 %v3794_v61, %v3792_v7  ;;  %v3834_v7 = vld [vmem:[#allocation18 + $0x3f8] sm:$0xff] }
 0x790   :  { %v3280_v29 = vsel %vm2036_vm3, %v3276_v32, %v3255_v13  ;;  %3240 = vrot.lane.b32.xlu1 %v6689_v19, %s5736_s11  ;;  %v4936_v32 = vpack.c.bf16 %v3805_v17, %v3803_v14  ;;  %v3809_v13 = vld [vmem:[#allocation18 + $0x330] sm:$0xff]  ;;  %v4962_v61 = vpack.c.bf16 %v3834_v7, %v3832_v1  ;;  %v3703_v17 = vld [vmem:[#allocation18 + $0x28] sm:$0xff]  ;;  %v3725_v1 = vld [vmem:[#allocation18 + $0xd8] sm:$0xff] }
 0x791   :  { %v3284_v31 = vsel %vm2054_vm5, %v3280_v29, %v3267_v50  ;;  %3439 = vmatmul.mubr.f32.gmra.mrb[82].mxu1 %v3287_v52  ;;  %3534 = vmatmul.mubr.f32.gmra.mrb[52].mxu0 %v3287_v52  ;;  %v3812_v50 = vld [vmem:[#allocation18 + $0x348] sm:$0xff]  ;;  %v4940_v59 = vpack.c.bf16 %v3809_v13, %v3807_v37  ;;  %v3729_v20 = vld [vmem:[#allocation18 + $0xf8] sm:$0xff] }
 0x792   :  { %v3288_v51 = vmax.f32 %v3284_v31, 0.0  ;;  %3444 = vmatprep.mubr.f32.mxu1 %v5734_v0  ;;  %3539 = vmatprep.mubr.f32.mxu0 %v5734_v0  ;;  %v3811_v31 = vld [vmem:[#allocation18 + $0x340] sm:$0xff] }
 0x794   :  { %3268 = vrot.lane.b32.xlu1 %v3229_v18, %s5740_s20  ;;  %v3808_v18 = vld [vmem:[#allocation18 + $0x328] sm:$0xff] }
 0x795   :  { %3445 = vmatmul.mubr.f32.gmra.mrb[84].mxu1 %v3288_v51  ;;  %3540 = vmatmul.mubr.f32.gmra.mrb[54].mxu0 %v3288_v51  ;;  %v4938_v35 = vpack.c.bf16 %v3810_v49, %v3808_v18  ;;  %v3705_v18 = vld [vmem:[#allocation18 + $0x38] sm:$0xff] }
 0x796   :  { %3648 = vmatprep.mubr.f32.mxu0 %v5734_v0  ;;  %3450 = vmatprep.mubr.f32.mxu1 %v5734_v0  ;;  %v4970_v13 = vpack.c.bf16 %v3705_v18, %v3703_v17  ;;  %v3739_v17 = vld [vmem:[#allocation18 + $0x148] sm:$0xff]  ;;  %v3741_v18 = vld [vmem:[#allocation18 + $0x158] sm:$0xff] }
 0x799   :  { %3649 = vmatmul.mubr.f32.vlgmr.msra.gmra.mrb[48].mxu0 %v3287_v52  ;;  %v3814_v52 = vld [vmem:[#allocation18 + $0x358] sm:$0xff] }
 0x79a   :  { %3654 = vmatprep.mubr.f32.mxu0 %v5734_v0  ;;  %4905 = vmatpush1.bf16.msra.mxu0 %v4904_v62  ;;  %v4942_v29 = vpack.c.bf16 %v3814_v52, %v3812_v50  ;;  %v3815_v62 = vld [vmem:[#allocation18 + $0x360] sm:$0xff]  ;;  %v3704_v52 = vld [vmem:[#allocation18 + $0x30] sm:$0xff] }
 0x79b   :  { %4907 = vmatprep.subr.bf16.mxu0 %v4906_v63  ;;  %v3817_v63 = vld [vmem:[#allocation18 + $0x370] sm:$0xff]  ;;  %v3702_v50 = vld [vmem:[#allocation18 + $0x20] sm:$0xff] }
 0x79c   :  { %v4948_v3 = vpack.c.bf16 %v3817_v63, %v3815_v62  ;;  %v3706_v62 = vld [vmem:[#allocation18 + $0x40] sm:$0xff]  ;;  %v3708_v63 = vld [vmem:[#allocation18 + $0x50] sm:$0xff] }
 0x79d   :  { %3655 = vmatmul.mubr.f32.gmra.mrb[50].mxu0 %v3288_v51  ;;  %v3813_v51 = vld [vmem:[#allocation18 + $0x350] sm:$0xff]  ;;  %v4976_v10 = vpack.c.bf16 %v3708_v63, %v3706_v62  ;;  %v3749_v62 = vld [vmem:[#allocation18 + $0x198] sm:$0xff] }
 0x79e   :  { %3660 = vmatprep.mubr.f32.mxu0 %v5734_v0  ;;  %4909 = vmatpush1.bf16.msra.mxu0 %v4908_v5  ;;  %v4944_v45 = vpack.c.bf16 %v3813_v51, %v3811_v31  ;;  %v3819_v5 = vld [vmem:[#allocation18 + $0x380] sm:$0xff]  ;;  %v3709_v31 = vld [vmem:[#allocation18 + $0x58] sm:$0xff] }
 0x79f   :  { %4911 = vmatprep.subr.bf16.mxu0 %v4910_v6  ;;  %v3821_v6 = vld [vmem:[#allocation18 + $0x390] sm:$0xff] }
 0x7a0   :  { %v4952_v4 = vpack.c.bf16 %v3821_v6, %v3819_v5  ;;  %v3710_v5 = vld [vmem:[#allocation18 + $0x60] sm:$0xff]  ;;  %v3712_v6 = vld [vmem:[#allocation18 + $0x70] sm:$0xff] }
 0x7a1   :  { %v4980_v38 = vpack.c.bf16 %v3712_v6, %v3710_v5  ;;  %v3753_v5 = vld [vmem:[#allocation18 + $0x1b8] sm:$0xff] }
 0x7a2   :  { %4913 = vmatpush1.bf16.msra.mxu0 %v4912_v12  ;;  %v3823_v12 = vld [vmem:[#allocation18 + $0x3a0] sm:$0xff] }
 0x7a3   :  { %4915 = vmatprep.subr.bf16.mxu0 %v4914_v15  ;;  %v3825_v15 = vld [vmem:[#allocation18 + $0x3b0] sm:$0xff] }
 0x7a4   :  { %v4956_v56 = vpack.c.bf16 %v3825_v15, %v3823_v12  ;;  %v3714_v12 = vld [vmem:[#allocation18 + $0x80] sm:$0xff]  ;;  %v3716_v15 = vld [vmem:[#allocation18 + $0x90] sm:$0xff] }
 0x7a5   :  { %v4984_v16 = vpack.c.bf16 %v3716_v15, %v3714_v12  ;;  %v3757_v12 = vld [vmem:[#allocation18 + $0x1d8] sm:$0xff] }
 0x7a6   :  { %4917 = vmatpush1.bf16.msra.mxu0 %v4916_v54  ;;  %v3827_v54 = vld [vmem:[#allocation18 + $0x3c0] sm:$0xff] }
 0x7a7   :  { %4919 = vmatprep.subr.bf16.mxu0 %v4918_v8  ;;  %v3829_v8 = vld [vmem:[#allocation18 + $0x3d0] sm:$0xff] }
 0x7a8   :  { %v4960_v39 = vpack.c.bf16 %v3829_v8, %v3827_v54  ;;  %v3718_v54 = vld [vmem:[#allocation18 + $0xa0] sm:$0xff]  ;;  %v3720_v8 = vld [vmem:[#allocation18 + $0xb0] sm:$0xff] }
 0x7a9   :  { %v4988_v7 = vpack.c.bf16 %v3720_v8, %v3718_v54  ;;  %v3761_v54 = vld [vmem:[#allocation18 + $0x1f8] sm:$0xff] }
 0x7aa   :  { %4921 = vmatpush1.bf16.msra.mxu0 %v4920_v22  ;;  %v3831_v22 = vld [vmem:[#allocation18 + $0x3e0] sm:$0xff] }
 0x7ab   :  { %4923 = vmatprep.subr.bf16.mxu0 %v4922_v26  ;;  %v3833_v26 = vld [vmem:[#allocation18 + $0x3f0] sm:$0xff] }
 0x7ac   :  { %v4964_v28 = vpack.c.bf16 %v3833_v26, %v3831_v22  ;;  %v3722_v22 = vld [vmem:[#allocation18 + $0xc0] sm:$0xff]  ;;  %v3724_v26 = vld [vmem:[#allocation18 + $0xd0] sm:$0xff] }
 0x7ad   :  { %v4992_v42 = vpack.c.bf16 %v3724_v26, %v3722_v22  ;;  %v4026_v22 = vld [vmem:[#allocation18 + $0x418] sm:$0xff] }
 0x7ae   :  { %4925 = vmatpush1.bf16.msra.mxu0 %v4924_v36 }
 0x7af   :  { %4927 = vmatprep.subr.bf16.mxu0 %v4926_v30 }
 0x7b2   :  { %4929 = vmatpush1.bf16.msra.mxu0 %v4928_v2 }
 0x7b3   :  { %4931 = vmatprep.subr.bf16.mxu0 %v4930_v41 }
 0x7b6   :  { %4933 = vmatpush1.bf16.msra.mxu0 %v4932_v46  ;;  %v3698_v46 = vld [vmem:[#allocation18] sm:$0xff] }
 0x7b7   :  { %4935 = vmatprep.subr.bf16.mxu0 %v4934_v48  ;;  %v3700_v48 = vld [vmem:[#allocation18 + $0x10] sm:$0xff] }
 0x7b8   :  { %v4968_v37 = vpack.c.bf16 %v3700_v48, %v3698_v46  ;;  %v3734_v48 = vld [vmem:[#allocation18 + $0x120] sm:$0xff] }
 0x7ba   :  { %4937 = vmatpush1.bf16.msra.mxu0 %v4936_v32 }
 0x7bb   :  { %4939 = vmatprep.subr.bf16.mxu0 %v4938_v35 }
 0x7be   :  { %4941 = vmatpush1.bf16.msra.mxu0 %v4940_v59 }
 0x7bf   :  { %4943 = vmatprep.subr.bf16.mxu0 %v4942_v29  ;;  %v3707_v29 = vld [vmem:[#allocation18 + $0x48] sm:$0xff] }
 0x7c2   :  { %4945 = vmatpush1.bf16.msra.mxu0 %v4944_v45  ;;  %v4972_v45 = vpack.c.bf16 %v3704_v52, %v3702_v50  ;;  %v3740_v50 = vld [vmem:[#allocation18 + $0x150] sm:$0xff]  ;;  %v3743_v52 = vld [vmem:[#allocation18 + $0x168] sm:$0xff] }
 0x7c3   :  { %4947 = vmatprep.subr.bf16.mxu0 %v4946_v55  ;;  %v4974_v55 = vpack.c.bf16 %v3709_v31, %v3707_v29 }
 0x7c6   :  { %4949 = vmatpush1.bf16.msra.mxu0 %v4948_v3  ;;  %v3711_v3 = vld [vmem:[#allocation18 + $0x68] sm:$0xff] }
 0x7c7   :  { %4951 = vmatprep.subr.bf16.mxu0 %v4950_v58  ;;  %v4978_v58 = vpack.c.bf16 %v3713_v33, %v3711_v3  ;;  %v3746_v33 = vld [vmem:[#allocation18 + $0x180] sm:$0xff] }
 0x7ca   :  { %4953 = vmatpush1.bf16.msra.mxu0 %v4952_v4  ;;  %v3715_v4 = vld [vmem:[#allocation18 + $0x88] sm:$0xff] }
 0x7cb   :  { %4955 = vmatprep.subr.bf16.mxu0 %v4954_v60  ;;  %v4982_v60 = vpack.c.bf16 %v3717_v11, %v3715_v4  ;;  %v3750_v11 = vld [vmem:[#allocation18 + $0x1a0] sm:$0xff] }
 0x7ce   :  { %4957 = vmatpush1.bf16.msra.mxu0 %v4956_v56  ;;  %v3719_v56 = vld [vmem:[#allocation18 + $0xa8] sm:$0xff] }
 0x7cf   :  { %4959 = vmatprep.subr.bf16.mxu0 %v4958_v47  ;;  %v4986_v47 = vpack.c.bf16 %v3721_v21, %v3719_v56  ;;  %v3754_v21 = vld [vmem:[#allocation18 + $0x1c0] sm:$0xff] }
 0x7d2   :  { %4961 = vmatpush1.bf16.msra.mxu0 %v4960_v39  ;;  %v3723_v39 = vld [vmem:[#allocation18 + $0xc8] sm:$0xff] }
 0x7d3   :  { %4963 = vmatprep.subr.bf16.mxu0 %v4962_v61  ;;  %v4990_v61 = vpack.c.bf16 %v3725_v1, %v3723_v39  ;;  %v3758_v1 = vld [vmem:[#allocation18 + $0x1e0] sm:$0xff] }
 0x7d6   :  { %4965 = vmatpush1.bf16.msra.mxu0 %v4964_v28  ;;  %v3727_v28 = vld [vmem:[#allocation18 + $0xe8] sm:$0xff] }
 0x7d7   :  { %4967 = vmatprep.subr.bf16.mxu0 %v4966_v34  ;;  %v4994_v34 = vpack.c.bf16 %v3729_v20, %v3727_v28 }
 0x800   :  { %v3257_v27 = vpop.permute.xlu0 %3256 }
 0x802   :  { %v3241_v36 = vpop.permute.xlu1 %3240 }
 0x803   :  { %v3277_v30 = vsel %vm2019_vm2, %v6689_v19, %v3241_v36  ;;  %v3726_v36 = vld [vmem:[#allocation18 + $0xe0] sm:$0xff] }
 0x804   :  { %v3281_v43 = vsel %vm2036_vm3, %v3277_v30, %v3257_v27  ;;  %v3728_v30 = vld [vmem:[#allocation18 + $0xf0] sm:$0xff]  ;;  %v3731_v27 = vld [vmem:[#allocation18 + $0x108] sm:$0xff] }
 0x806   :  { %v3269_v40 = vpop.permute.xlu1 %3268 }
 0x807   :  { %v3285_v23 = vsel %vm2054_vm5, %v3281_v43, %v3269_v40  ;;  %v3733_v40 = vld [vmem:[#allocation18 + $0x118] sm:$0xff]  ;;  %v4996_v43 = vpack.c.bf16 %v3728_v30, %v3726_v36 }
 0x808   :  { %v3289_v2 = vmax.f32 %v3285_v23, 0.0  ;;  %v4998_v23 = vpack.c.bf16 %v3733_v40, %v3731_v27 }
 0x80a   :  { %3451 = vmatmul.mubr.f32.gmra.mrb[86].mxu1 %v3289_v2  ;;  %3661 = vmatmul.mubr.f32.gmra.mrb[52].mxu0 %v3289_v2  ;;  %v3730_v2 = vld [vmem:[#allocation18 + $0x100] sm:$0xff] }
 0x80b   :  { %3666 = vmatprep.mubr.f32.mxu0 %v5734_v0 }
 0x80e   :  { %3667 = vmatmul.mubr.f32.gmra.mrb[54].mxu0 %v5734_v0 }
 0x860   :  { %v3434_v41 = vpop.f32.mrb[80].mxu1 }
 0x861   :  { %v3436_v9 = vpop.f32.mrb[81].mxu1 }
 0x864   :  { %v3440_v25 = vpop.f32.mrb[82].mxu1 }
 0x865   :  { %v3442_v44 = vpop.f32.mrb[83].mxu1 }
 0x868   :  { %v6712_v24 = vpop.f32.mrb[84].mxu1 }
 0x869   :  { %v6714_v19 = vpop.f32.mrb[85].mxu1 }
 0x86c   :  { %v3650_v14 = vpop.f32.mrb[48].mxu0 }
 0x86d   :  { %v6716_v49 = vadd.f32 %v3650_v14, %v3434_v41  ;;  %v3652_v32 = vpop.f32.mrb[49].mxu0  ;;  %v3732_v41 = vld [vmem:[#allocation18 + $0x110] sm:$0xff] }
 0x86e   :  { %v6718_v35 = vadd.f32 %v3652_v32, %v3436_v9  ;;  %v3735_v9 = vld [vmem:[#allocation18 + $0x128] sm:$0xff]  ;;  %v3736_v14 = vld [vmem:[#allocation18 + $0x130] sm:$0xff] }
 0x86f   :  { %v5004_v32 = vpack.c.bf16 %v3736_v14, %v3734_v48  ;;  %v4029_v48 = vld [vmem:[#allocation18 + $0x430] sm:$0xff]  ;;  %v4032_v14 = vld [vmem:[#allocation18 + $0x448] sm:$0xff] }
 0x870   :  { %v3656_v59 = vpop.f32.mrb[50].mxu0  ;;  %3899 = vmatprep.mubr.f32.mxu0 %v6718_v35 }
 0x871   :  { %v6721_v51 = vadd.f32 %v3656_v59, %v3440_v25  ;;  %v3658_v53 = vpop.f32.mrb[51].mxu0  ;;  %3900 = vmatmul.mubr.f32.vlgmr.msra.gmra.mrb[56].mxu0 %v6716_v49  ;;  %v3737_v25 = vld [vmem:[#allocation18 + $0x138] sm:$0xff] }
 0x872   :  { %v6724_v57 = vadd.f32 %v3658_v53, %v3442_v44  ;;  %4969 = vmatpush1.bf16.msra.mxu0 %v4968_v37  ;;  %v5000_v44 = vpack.c.bf16 %v3732_v41, %v3730_v2  ;;  %v5002_v46 = vpack.c.bf16 %v3737_v25, %v3735_v9  ;;  %v5006_v37 = vpack.c.bf16 %v3741_v18, %v3739_v17  ;;  %v3745_v59 = vld [vmem:[#allocation18 + $0x178] sm:$0xff]  ;;  %v3742_v53 = vld [vmem:[#allocation18 + $0x160] sm:$0xff]  ;;  %v4025_v9 = vld [vmem:[#allocation18 + $0x410] sm:$0xff] }
 0x873   :  { %4971 = vmatprep.subr.bf16.mxu0 %v4970_v13  ;;  %v3738_v13 = vld [vmem:[#allocation18 + $0x140] sm:$0xff]  ;;  %v5010_v31 = vpack.c.bf16 %v3745_v59, %v3743_v52  ;;  %v4030_v25 = vld [vmem:[#allocation18 + $0x438] sm:$0xff] }
 0x874   :  { %3905 = vmatprep.mubr.f32.mxu0 %v6724_v57  ;;  %v5008_v29 = vpack.c.bf16 %v3740_v50, %v3738_v13  ;;  %v4023_v41 = vld [vmem:[#allocation18 + $0x400] sm:$0xff]  ;;  %v4034_v17 = vld [vmem:[#allocation18 + $0x458] sm:$0xff]  ;;  %v4033_v13 = vld [vmem:[#allocation18 + $0x450] sm:$0xff] }
 0x875   :  { %3906 = vmatmul.mubr.f32.gmra.mrb[58].mxu0 %v6721_v51  ;;  %v4036_v50 = vld [vmem:[#allocation18 + $0x468] sm:$0xff]  ;;  %v4038_v52 = vld [vmem:[#allocation18 + $0x478] sm:$0xff] }
 0x876   :  { %4973 = vmatpush1.bf16.msra.mxu0 %v4972_v45  ;;  %v3744_v45 = vld [vmem:[#allocation18 + $0x170] sm:$0xff] }
 0x877   :  { %4975 = vmatprep.subr.bf16.mxu0 %v4974_v55  ;;  %v3747_v55 = vld [vmem:[#allocation18 + $0x188] sm:$0xff]  ;;  %v5012_v63 = vpack.c.bf16 %v3744_v45, %v3742_v53  ;;  %v4037_v53 = vld [vmem:[#allocation18 + $0x470] sm:$0xff] }
 0x878   :  { %v5014_v3 = vpack.c.bf16 %v3749_v62, %v3747_v55  ;;  %v4040_v45 = vld [vmem:[#allocation18 + $0x488] sm:$0xff]  ;;  %v4042_v55 = vld [vmem:[#allocation18 + $0x498] sm:$0xff] }
 0x879   :  { %v5046_v62 = vpack.c.bf16 %v4042_v55, %v4040_v45  ;;  %v4075_v45 = vld [vmem:[#allocation18 + $0x5a0] sm:$0xff]  ;;  %v4077_v55 = vld [vmem:[#allocation18 + $0x5b0] sm:$0xff] }
 0x87a   :  { %4977 = vmatpush1.bf16.msra.mxu0 %v4976_v10  ;;  %v3748_v10 = vld [vmem:[#allocation18 + $0x190] sm:$0xff] }
 0x87b   :  { %4979 = vmatprep.subr.bf16.mxu0 %v4978_v58  ;;  %v3751_v58 = vld [vmem:[#allocation18 + $0x1a8] sm:$0xff]  ;;  %v5016_v6 = vpack.c.bf16 %v3748_v10, %v3746_v33  ;;  %v4046_v33 = vld [vmem:[#allocation18 + $0x4b8] sm:$0xff] }
 0x87c   :  { %v5018_v4 = vpack.c.bf16 %v3753_v5, %v3751_v58  ;;  %v4043_v5 = vld [vmem:[#allocation18 + $0x4a0] sm:$0xff] }
 0x87e   :  { %4981 = vmatpush1.bf16.msra.mxu0 %v4980_v38  ;;  %v3752_v38 = vld [vmem:[#allocation18 + $0x1b0] sm:$0xff] }
 0x87f   :  { %4983 = vmatprep.subr.bf16.mxu0 %v4982_v60  ;;  %v3755_v60 = vld [vmem:[#allocation18 + $0x1c8] sm:$0xff]  ;;  %v5020_v15 = vpack.c.bf16 %v3752_v38, %v3750_v11  ;;  %v4050_v11 = vld [vmem:[#allocation18 + $0x4d8] sm:$0xff] }
 0x880   :  { %v5022_v56 = vpack.c.bf16 %v3757_v12, %v3755_v60  ;;  %v4047_v12 = vld [vmem:[#allocation18 + $0x4c0] sm:$0xff] }
 0x882   :  { %4985 = vmatpush1.bf16.msra.mxu0 %v4984_v16  ;;  %v3756_v16 = vld [vmem:[#allocation18 + $0x1d0] sm:$0xff] }
 0x883   :  { %4987 = vmatprep.subr.bf16.mxu0 %v4986_v47  ;;  %v3759_v47 = vld [vmem:[#allocation18 + $0x1e8] sm:$0xff]  ;;  %v5024_v8 = vpack.c.bf16 %v3756_v16, %v3754_v21  ;;  %v4054_v21 = vld [vmem:[#allocation18 + $0x4f8] sm:$0xff] }
 0x884   :  { %v5026_v39 = vpack.c.bf16 %v3761_v54, %v3759_v47  ;;  %v4053_v54 = vld [vmem:[#allocation18 + $0x4f0] sm:$0xff] }
 0x886   :  { %4989 = vmatpush1.bf16.msra.mxu0 %v4988_v7  ;;  %v3760_v7 = vld [vmem:[#allocation18 + $0x1f0] sm:$0xff] }
 0x887   :  { %4991 = vmatprep.subr.bf16.mxu0 %v4990_v61  ;;  %v4024_v61 = vld [vmem:[#allocation18 + $0x408] sm:$0xff]  ;;  %v5028_v26 = vpack.c.bf16 %v3760_v7, %v3758_v1 }
 0x888   :  { %v5030_v28 = vpack.c.bf16 %v4026_v22, %v4024_v61  ;;  %v4055_v61 = vld [vmem:[#allocation18 + $0x500] sm:$0xff]  ;;  %v4057_v22 = vld [vmem:[#allocation18 + $0x510] sm:$0xff] }
 0x88a   :  { %4993 = vmatpush1.bf16.msra.mxu0 %v4992_v42 }
 0x88b   :  { %4995 = vmatprep.subr.bf16.mxu0 %v4994_v34 }
 0x88e   :  { %4997 = vmatpush1.bf16.msra.mxu0 %v4996_v43 }
 0x88f   :  { %4999 = vmatprep.subr.bf16.mxu0 %v4998_v23 }
 0x892   :  { %5001 = vmatpush1.bf16.msra.mxu0 %v5000_v44 }
 0x893   :  { %5003 = vmatprep.subr.bf16.mxu0 %v5002_v46  ;;  %v4027_v46 = vld [vmem:[#allocation18 + $0x420] sm:$0xff] }
 0x894   :  { %v5036_v18 = vpack.c.bf16 %v4029_v48, %v4027_v46 }
 0x896   :  { %5005 = vmatpush1.bf16.msra.mxu0 %v5004_v32  ;;  %v5038_v32 = vpack.c.bf16 %v4034_v17, %v4032_v14  ;;  %v4067_v14 = vld [vmem:[#allocation18 + $0x560] sm:$0xff]  ;;  %v4069_v17 = vld [vmem:[#allocation18 + $0x570] sm:$0xff] }
 0x897   :  { %5007 = vmatprep.subr.bf16.mxu0 %v5006_v37  ;;  %v4031_v37 = vld [vmem:[#allocation18 + $0x440] sm:$0xff] }
 0x898   :  { %v5040_v59 = vpack.c.bf16 %v4033_v13, %v4031_v37  ;;  %v5076_v37 = vpack.c.bf16 %v4069_v17, %v4067_v14 }
 0x89a   :  { %5009 = vmatpush1.bf16.msra.mxu0 %v5008_v29  ;;  %v5042_v29 = vpack.c.bf16 %v4038_v52, %v4036_v50  ;;  %v4071_v50 = vld [vmem:[#allocation18 + $0x580] sm:$0xff]  ;;  %v4073_v52 = vld [vmem:[#allocation18 + $0x590] sm:$0xff] }
 0x89b   :  { %5011 = vmatprep.subr.bf16.mxu0 %v5010_v31  ;;  %v4035_v31 = vld [vmem:[#allocation18 + $0x460] sm:$0xff] }
 0x89e   :  { %5013 = vmatpush1.bf16.msra.mxu0 %v5012_v63  ;;  %v4039_v63 = vld [vmem:[#allocation18 + $0x480] sm:$0xff] }
 0x89f   :  { %5015 = vmatprep.subr.bf16.mxu0 %v5014_v3  ;;  %v4044_v3 = vld [vmem:[#allocation18 + $0x4a8] sm:$0xff] }
 0x8a0   :  { %v5050_v58 = vpack.c.bf16 %v4046_v33, %v4044_v3  ;;  %v4079_v3 = vld [vmem:[#allocation18 + $0x5c0] sm:$0xff]  ;;  %v4081_v33 = vld [vmem:[#allocation18 + $0x5d0] sm:$0xff] }
 0x8a2   :  { %5017 = vmatpush1.bf16.msra.mxu0 %v5016_v6  ;;  %v4045_v6 = vld [vmem:[#allocation18 + $0x4b0] sm:$0xff] }
 0x8a3   :  { %5019 = vmatprep.subr.bf16.mxu0 %v5018_v4  ;;  %v4048_v4 = vld [vmem:[#allocation18 + $0x4c8] sm:$0xff]  ;;  %v5052_v38 = vpack.c.bf16 %v4045_v6, %v4043_v5  ;;  %v5088_v5 = vpack.c.bf16 %v4081_v33, %v4079_v3 }
 0x8a4   :  { %v5054_v60 = vpack.c.bf16 %v4050_v11, %v4048_v4  ;;  %v4083_v4 = vld [vmem:[#allocation18 + $0x5e0] sm:$0xff]  ;;  %v4085_v11 = vld [vmem:[#allocation18 + $0x5f0] sm:$0xff] }
 0x8a6   :  { %5021 = vmatpush1.bf16.msra.mxu0 %v5020_v15  ;;  %v4049_v15 = vld [vmem:[#allocation18 + $0x4d0] sm:$0xff] }
 0x8a7   :  { %5023 = vmatprep.subr.bf16.mxu0 %v5022_v56  ;;  %v4052_v56 = vld [vmem:[#allocation18 + $0x4e8] sm:$0xff]  ;;  %v5056_v16 = vpack.c.bf16 %v4049_v15, %v4047_v12 }
 0x8a8   :  { %v5058_v47 = vpack.c.bf16 %v4054_v21, %v4052_v56 }
 0x8aa   :  { %5025 = vmatpush1.bf16.msra.mxu0 %v5024_v8  ;;  %v4056_v8 = vld [vmem:[#allocation18 + $0x508] sm:$0xff] }
 0x8ab   :  { %5027 = vmatprep.subr.bf16.mxu0 %v5026_v39  ;;  %v4058_v39 = vld [vmem:[#allocation18 + $0x518] sm:$0xff] }
 0x8ac   :  { %v5062_v7 = vpack.c.bf16 %v4058_v39, %v4056_v8 }
 0x8ae   :  { %5029 = vmatpush1.bf16.msra.mxu0 %v5028_v26  ;;  %v4060_v26 = vld [vmem:[#allocation18 + $0x528] sm:$0xff] }
 0x8af   :  { %5031 = vmatprep.subr.bf16.mxu0 %v5030_v28  ;;  %v4062_v28 = vld [vmem:[#allocation18 + $0x538] sm:$0xff] }
 0x8dd   :  { %v3452_v20 = vpop.f32.mrb[86].mxu1  ;;  %v3662_v42 = vpop.f32.mrb[52].mxu0 }
 0x8de   :  { %v6729_v34 = vadd.f32 %v3662_v42, %v6712_v24  ;;  %v3454_v36 = vpop.f32.mrb[87].mxu1  ;;  %v3664_v30 = vpop.f32.mrb[53].mxu0  ;;  %v4028_v24 = vld [vmem:[#allocation18 + $0x428] sm:$0xff]  ;;  %v5066_v42 = vpack.c.bf16 %v4062_v28, %v4060_v26 }
 0x8df   :  { %v6732_v27 = vadd.f32 %v3664_v30, %v6714_v19  ;;  %v5032_v19 = vpack.c.bf16 %v4025_v9, %v4023_v41  ;;  %v5034_v44 = vpack.c.bf16 %v4030_v25, %v4028_v24  ;;  %v4061_v30 = vld [vmem:[#allocation18 + $0x530] sm:$0xff]  ;;  %v4063_v24 = vld [vmem:[#allocation18 + $0x540] sm:$0xff] }
 0x8e0   :  { %v4065_v25 = vld [vmem:[#allocation18 + $0x550] sm:$0xff] }
 0x8e1   :  { %v3668_v40 = vpop.f32.mrb[54].mxu0  ;;  %3911 = vmatprep.mubr.f32.mxu0 %v6732_v27  ;;  %v5072_v46 = vpack.c.bf16 %v4065_v25, %v4063_v24 }
 0x8e2   :  { %v6735_v43 = vadd.f32 %v3668_v40, %v3452_v20  ;;  %v3670_v23 = vpop.f32.mrb[55].mxu0  ;;  %3912 = vmatmul.mubr.f32.gmra.mrb[60].mxu0 %v6729_v34  ;;  %v5064_v20 = vpack.c.bf16 %v4057_v22, %v4055_v61  ;;  %v4064_v40 = vld [vmem:[#allocation18 + $0x548] sm:$0xff] }
 0x8e3   :  { %v6738_v2 = vadd.f32 %v3670_v23, %v3454_v36  ;;  %v4059_v36 = vld [vmem:[#allocation18 + $0x520] sm:$0xff]  ;;  %v4066_v23 = vld [vmem:[#allocation18 + $0x558] sm:$0xff] }
 0x8e4   :  { %v5068_v41 = vpack.c.bf16 %v4061_v30, %v4059_v36  ;;  %v5070_v9 = vpack.c.bf16 %v4066_v23, %v4064_v40 }
 0x8e5   :  { %3917 = vmatprep.mubr.f32.mxu0 %v6738_v2 }
 0x8e6   :  { %3918 = vmatmul.mubr.f32.gmra.mrb[62].mxu0 %v6735_v43 }
 0x8e7   :  { %3988 = vmatprep.mubr.f32.mxu0 %v5734_v0 }
 0x8ea   :  { %3989 = vmatmul.mubr.f32.vlgmr.msra.gmra.mrb[56].mxu0 %v5734_v0 }
 0x8eb   :  { %5033 = vmatpush1.bf16.msra.mxu0 %v5032_v19  ;;  %3994 = vmatprep.mubr.f32.mxu0 %v6718_v35  ;;  %v5044_v35 = vpack.c.bf16 %v4037_v53, %v4035_v31  ;;  %v4068_v19 = vld [vmem:[#allocation18 + $0x568] sm:$0xff]  ;;  %v5080_v31 = vpack.c.bf16 %v4073_v52, %v4071_v50 }
 0x8ec   :  { %5035 = vmatprep.subr.bf16.mxu0 %v5034_v44  ;;  %v4070_v44 = vld [vmem:[#allocation18 + $0x578] sm:$0xff] }
 0x8ed   :  { %v5074_v48 = vpack.c.bf16 %v4070_v44, %v4068_v19 }
 0x8ee   :  { %3995 = vmatmul.mubr.f32.gmra.mrb[58].mxu0 %v6716_v49  ;;  %v4041_v49 = vld [vmem:[#allocation18 + $0x490] sm:$0xff] }
 0x8ef   :  { %5037 = vmatpush1.bf16.msra.mxu0 %v5036_v18  ;;  %4000 = vmatprep.mubr.f32.mxu0 %v6724_v57  ;;  %v5048_v10 = vpack.c.bf16 %v4041_v49, %v4039_v63  ;;  %v4072_v18 = vld [vmem:[#allocation18 + $0x588] sm:$0xff]  ;;  %v5084_v63 = vpack.c.bf16 %v4077_v55, %v4075_v45 }
 0x8f0   :  { %5039 = vmatprep.subr.bf16.mxu0 %v5038_v32  ;;  %v4074_v32 = vld [vmem:[#allocation18 + $0x598] sm:$0xff] }
 0x8f1   :  { %v5078_v13 = vpack.c.bf16 %v4074_v32, %v4072_v18 }
 0x8f2   :  { %4001 = vmatmul.mubr.f32.gmra.mrb[60].mxu0 %v6721_v51 }
 0x8f3   :  { %5041 = vmatpush1.bf16.msra.mxu0 %v5040_v59  ;;  %4006 = vmatprep.mubr.f32.mxu0 %v6732_v27  ;;  %v4076_v59 = vld [vmem:[#allocation18 + $0x5a8] sm:$0xff] }
 0x8f4   :  { %5043 = vmatprep.subr.bf16.mxu0 %v5042_v29  ;;  %v4078_v29 = vld [vmem:[#allocation18 + $0x5b8] sm:$0xff] }
 0x8f5   :  { %v5082_v53 = vpack.c.bf16 %v4078_v29, %v4076_v59 }
 0x8f6   :  { %4007 = vmatmul.mubr.f32.gmra.mrb[62].mxu0 %v6729_v34 }
 0x8f7   :  { %5045 = vmatpush1.bf16.msra.mxu0 %v5044_v35  ;;  %4151 = vmatprep.mubr.f32.mxu0 %v6724_v57  ;;  %v4051_v57 = vld [vmem:[#allocation18 + $0x4e0] sm:$0xff]  ;;  %v4080_v35 = vld [vmem:[#allocation18 + $0x5c8] sm:$0xff] }
 0x8f8   :  { %5047 = vmatprep.subr.bf16.mxu0 %v5046_v62  ;;  %v5060_v1 = vpack.c.bf16 %v4053_v54, %v4051_v57  ;;  %v4082_v62 = vld [vmem:[#allocation18 + $0x5d8] sm:$0xff] }
 0x8f9   :  { %v5086_v49 = vpack.c.bf16 %v4082_v62, %v4080_v35 }
 0x8fb   :  { %5049 = vmatpush1.bf16.msra.mxu0 %v5048_v10  ;;  %v4084_v10 = vld [vmem:[#allocation18 + $0x5e8] sm:$0xff] }
 0x8fc   :  { %5051 = vmatprep.subr.bf16.mxu0 %v5050_v58  ;;  %v4086_v58 = vld [vmem:[#allocation18 + $0x5f8] sm:$0xff] }
 0x8fd   :  { %v5090_v6 = vpack.c.bf16 %v4086_v58, %v4084_v10 }
 0x8ff   :  { %5053 = vmatpush1.bf16.msra.mxu0 %v5052_v38  ;;  %v5092_v38 = vpack.c.bf16 %v4085_v11, %v4083_v4 }
 0x900   :  { %5055 = vmatprep.subr.bf16.mxu0 %v5054_v60 }
 0x903   :  { %5057 = vmatpush1.bf16.msra.mxu0 %v5056_v16 }
 0x904   :  { %5059 = vmatprep.subr.bf16.mxu0 %v5058_v47 }
 0x907   :  { %5061 = vmatpush1.bf16.msra.mxu0 %v5060_v1 }
 0x908   :  { %5063 = vmatprep.subr.bf16.mxu0 %v5062_v7 }
 0x90b   :  { %5065 = vmatpush1.bf16.msra.mxu0 %v5064_v20 }
 0x90c   :  { %5067 = vmatprep.subr.bf16.mxu0 %v5066_v42 }
 0x90f   :  { %5069 = vmatpush1.bf16.msra.mxu0 %v5068_v41 }
 0x910   :  { %5071 = vmatprep.subr.bf16.mxu0 %v5070_v9 }
 0x913   :  { %5073 = vmatpush1.bf16.msra.mxu0 %v5072_v46 }
 0x914   :  { %5075 = vmatprep.subr.bf16.mxu0 %v5074_v48 }
 0x917   :  { %5077 = vmatpush1.bf16.msra.mxu0 %v5076_v37 }
 0x918   :  { %5079 = vmatprep.subr.bf16.mxu0 %v5078_v13 }
 0x91b   :  { %5081 = vmatpush1.bf16.msra.mxu0 %v5080_v31 }
 0x91c   :  { %5083 = vmatprep.subr.bf16.mxu0 %v5082_v53 }
 0x91f   :  { %5085 = vmatpush1.bf16.msra.mxu0 %v5084_v63 }
 0x920   :  { %5087 = vmatprep.subr.bf16.mxu0 %v5086_v49 }
 0x923   :  { %5089 = vmatpush1.bf16.msra.mxu0 %v5088_v5 }
 0x924   :  { %5091 = vmatprep.subr.bf16.mxu0 %v5090_v6 }
 0x927   :  { %5093 = vmatpush1.bf16.msra.mxu0 %v5092_v38 }
 0x92a   :  { %4152 = vmatmul.mubr.f32.vlgmr.msra.gmra.mrb[56].mxu0 %v6721_v51 }
 0x92b   :  { %4157 = vmatprep.mubr.f32.mxu0 %v6732_v27 }
 0x92e   :  { %4158 = vmatmul.mubr.f32.gmra.mrb[58].mxu0 %v6729_v34 }
 0x92f   :  { %4163 = vmatprep.mubr.f32.mxu0 %v6738_v2 }
 0x932   :  { %4164 = vmatmul.mubr.f32.gmra.mrb[60].mxu0 %v6735_v43 }
 0x933   :  { %4169 = vmatprep.mubr.f32.mxu0 %v5734_v0 }
 0x936   :  { %4170 = vmatmul.mubr.f32.gmra.mrb[62].mxu0 %v5734_v0 }
 0x9fd   :  { %v4153_v60 = vpop.f32.mrb[56].mxu0 }
 0x9fe   :  { %v4155_v12 = vpop.f32.mrb[57].mxu0 }
 0xa01   :  { %v4159_v15 = vpop.f32.mrb[58].mxu0 }
 0xa02   :  { %v4184_v56 = vmax.f32 %v4153_v60, %v4159_v15  ;;  %v4161_v21 = vpop.f32.mrb[59].mxu0 }
 0xa03   :  { %v4185_v16 = vmax.f32 %v4155_v12, %v4161_v21 }
 0xa05   :  { %4200 = vrot.lane.b32.xlu0 %v4185_v16, %s5738_s17  ;;  %v4165_v51 = vpop.f32.mrb[60].mxu0 }
 0xa06   :  { %v4167_v27 = vpop.f32.mrb[61].mxu0 }
 0xa09   :  { %4190 = vrot.lane.b32.xlu0 %v4184_v56, %s5738_s17  ;;  %v4171_v34 = vpop.f32.mrb[62].mxu0 }
 0xa0a   :  { %v4186_v2 = vmax.f32 %v4165_v51, %v4171_v34  ;;  %v4173_v47 = vpop.f32.mrb[63].mxu0 }
 0xa0b   :  { %v4187_v43 = vmax.f32 %v4167_v27, %v4173_v47 }
 0xa0d   :  { %4202 = vrot.lane.b32.xlu1 %v4187_v43, %s5738_s17 }
 0xa11   :  { %4192 = vrot.lane.b32.xlu1 %v4186_v2, %s5738_s17 }
 0xa77   :  { %v4201_v0 = vpop.permute.xlu0 %4200 }
 0xa78   :  { %v4206_v57 = vmax.f32 %v4185_v16, %v4201_v0 }
 0xa7a   :  { %4210 = vrot.lane.b32.xlu0 %v4206_v57, %s5738_s17 }
 0xa7b   :  { %v4191_v39 = vpop.permute.xlu0 %4190 }
 0xa7c   :  { %v4196_v1 = vmax.f32 %v4184_v56, %v4191_v39 }
 0xa7f   :  { %v4203_v54 = vpop.permute.xlu1 %4202 }
 0xa80   :  { %v4207_v8 = vmax.f32 %v4187_v43, %v4203_v54 }
 0xa82   :  { %4212 = vrot.lane.b32.xlu1 %v4207_v8, %s5738_s17 }
 0xa83   :  { %v4193_v26 = vpop.permute.xlu1 %4192 }
 0xa84   :  { %v4197_v28 = vmax.f32 %v4186_v2, %v4193_v26 }
 0xaec   :  { %v4211_v7 = vpop.permute.xlu0 %4210 }
 0xaed   :  { %v4216_v61 = vsel %vm2036_vm3, %v4196_v1, %v4211_v7 }
 0xaee   :  { %v4218_v22 = vmax.f32 %v4216_v61, 0.0 }
 0xaf0   :  { %4220 = vst [vmem:[#allocation19] sm:$0xff] %v4218_v22 }
 0xaf4   :  { %v4213_v20 = vpop.permute.xlu1 %4212 }
 0xaf5   :  { %v4217_v42 = vsel %vm2036_vm3, %v4197_v28, %v4213_v20 }
 0xaf6   :  { %v4219_v36 = vmax.f32 %v4217_v42, 0.0 }
 0xaf8   :  { %4221 = vst [vmem:[#allocation19 + $0x8] sm:$0xff] %v4219_v36 }
 0xaf9   :  { %5702 = shalt.err (!%p5699_p4)
}
 0xafa   :  { %s5703_s26 = scalar_lea.hbm %s6788_s7, 256 }
 0xafb   :  { %p5704_p5 = scmp.ne.s32.totalorder %s6788_s7, %s5703_s26  ;;  %p5707_p6 = scmp.lt.u32.totalorder %s5703_s26, %s6788_s7 }
 0xafd   :  { %p5709_p7 = pnand %p5707_p6, %p5704_p5 }
 0xaff   :  { %5712 = shalt.err (!%p5709_p7)
}
 0xb00   :  { %4233 = dma.vmem_to_hbm [thread:$0]  %s4228_s21, 256, %s6788_s7, [#allocation9], %s5729_s5, %s5729_s5, %s5730_s18  }
 0xb01   :  { %5721 = dma.done.wait [#allocation9], 256  }
 0xb02   :  { %5722 = vsyncadd [#allocation9], 4294967040 }
 0xb03   :  { %4237 = vsyncpa [#allocation8], 1 }
 0xb04   :  { %4238 = vsyncpa [#allocation11], 1 }
 0xb05   :  { %4239 = vsyncpa [#allocation14], 1 }
 0xb06   :  { %4240 = vsyncpa [#allocation17], 1 }
 0xb07   :  { %4241 = vsyncpa [#allocation9], 1 }

</bundles_post_ra>
